<compile_context>
chip_gen: v7x
topology: tpu7x:2x2x1
jax: 0.10.0
libtpu: 0.0.40
codegen_flags: <defaults>
</compile_context>

<pallas_src>
import functools
import math

import jax
import jax.numpy as jnp
from jax import lax
from jax.experimental import pallas as pl
from jax.experimental.pallas import tpu as pltpu

NUM_LABELS = 5  # TODO(synk): NUM_LABELS not provided in the snippet; fixed to 5 here.

_VMEM_LIMIT = 32 * 1024 * 1024  # <= physical VMEM on v5e/v6e (128 MiB) and v7x (64 MiB)


# ----------------------------------------------------------------------------
# Pallas kernels
# ----------------------------------------------------------------------------

def _pw_conv_kernel(apply_silu, x_ref, w_ref, b_ref, g_ref, s_ref, o_ref):
    """1x1 Conv1d (channel matmul, bf16 MXU / fp32 accum) + FiLM + optional SiLU.

    x_ref: (1, Cin, L) f32   w_ref: (Cout, Cin) bf16   b_ref: (Cout, 1) f32
    g_ref, s_ref: (1, Cout, 1) f32 per-sample FiLM gamma / beta
    o_ref: (1, Cout, L) f32
    """
    x = x_ref[0].astype(jnp.bfloat16)                          # (Cin, L)
    y = jnp.dot(w_ref[...], x, preferred_element_type=jnp.float32) + b_ref[...]
    y = y * (1.0 + g_ref[0]) + s_ref[0]
    if apply_silu:
        y = y * jax.nn.sigmoid(y)
    o_ref[0] = y


def _layer_kernel(h_dim, H,
                  x_ref, a_ref, skip_ref,
                  w0x_ref, w0a_ref, b0_ref,
                  w1_ref, b1_ref,
                  dww_ref, dwb_ref,
                  wp_ref, bp_ref,
                  wo_ref, bo_ref,
                  g0_ref, s0_ref, g1_ref, s1_ref,
                  gd_ref, sd_ref, gp_ref, sp_ref, go_ref, so_ref,
                  h_out_ref, skip_out_ref):
    """Fully fused Denoiser residual layer for one batch element (grid over B).

    Layout: channels on sublanes, sequence L on lanes.  All intermediates stay in
    VMEM / vregs; only x, a, skip_in, h_out, skip_out touch HBM.
    """
    f32 = jnp.float32
    bf16 = jnp.bfloat16

    x = x_ref[0]                                               # (h_dim, L) f32
    a = a_ref[0]                                               # (a_dim, L) f32
    L = x.shape[1]

    # ---- hg[0]: modulated 1x1 conv over concat([x, a]) + SiLU ----------------
    # (weight pre-split outside -> two matmuls, no sublane concatenate)
    hg = (jnp.dot(w0x_ref[...], x.astype(bf16), preferred_element_type=f32)
          + jnp.dot(w0a_ref[...], a.astype(bf16), preferred_element_type=f32)
          + b0_ref[...])
    hg = hg * (1.0 + g0_ref[0]) + s0_ref[0]
    hg = hg * jax.nn.sigmoid(hg)                               # SiLU

    # ---- hg[2]: modulated 1x1 conv ------------------------------------------
    hg = jnp.dot(w1_ref[...], hg.astype(bf16), preferred_element_type=f32) + b1_ref[...]
    hg = hg * (1.0 + g1_ref[0]) + s1_ref[0]

    h = hg[:H]                                                 # (H, L)
    g = hg[H:]                                                 # (H, L)

    lane = lax.broadcasted_iota(jnp.int32, (H, L), 1)

    # ---- depthwise Conv1d(k=3, pad=1, groups=H) + FiLM + SiLU ----------------
    # Shifted neighbours via pltpu.roll (XLU slot) + boundary masks; no extra copies.
    h_m1 = jnp.where(lane >= 1, pltpu.roll(h, shift=1, axis=1), 0.0)       # h[:, l-1]
    h_p1 = jnp.where(lane < L - 1, pltpu.roll(h, shift=L - 1, axis=1), 0.0)  # h[:, l+1]
    dw = dww_ref[...]                                          # (H, 3) f32
    hd = dw[:, 0:1] * h_m1 + dw[:, 1:2] * h + dw[:, 2:3] * h_p1 + dwb_ref[...]
    hd = hd * (1.0 + gd_ref[0]) + sd_ref[0]
    hd = hd * jax.nn.sigmoid(hd)

    # ---- modulated 1x1 conv H -> 2H, then minGRU2 ----------------------------
    zh = jnp.dot(wp_ref[...], hd.astype(bf16), preferred_element_type=f32) + bp_ref[...]
    zh = zh * (1.0 + gp_ref[0]) + sp_ref[0]
    h_tilde = zh[:H]                                           # (H, L)
    z = jax.nn.sigmoid(zh[H:])                                 # (H, L)

    # minGRU recurrence  h_t = (1 - z_t) * h_{t-1} + z_t * htilde_t,  h_0 = 0,
    # evaluated as a lane-parallel log-depth (Hillis-Steele) scan along L.
    # TODO(synk): minGRU2 definition not provided; [h_tilde, gate] chunk order,
    # h_0 = 0 and identity readout are assumptions (kept from v1).
    coef = 1.0 - z                                             # multiplicative term
    acc = z * h_tilde                                          # additive term
    s = 1
    while s < L:                                               # static unroll, ceil(log2 L) steps
        coef_prev = jnp.where(lane >= s, pltpu.roll(coef, shift=s, axis=1), 1.0)
        acc_prev = jnp.where(lane >= s, pltpu.roll(acc, shift=s, axis=1), 0.0)
        acc = coef * acc_prev + acc
        coef = coef * coef_prev
        s *= 2
    h_gru = acc                                                # (H, L)

    # ---- SiLU gate + modulated out conv + fused residual / skip accumulation -
    h_gated = h_gru * (g * jax.nn.sigmoid(g))
    out = jnp.dot(wo_ref[...], h_gated.astype(bf16), preferred_element_type=f32) + bo_ref[...]
    out = out * (1.0 + go_ref[0]) + so_ref[0]                  # (2*h_dim, L)

    # TODO(synk): ResSkipNet not provided; (residual, skip) chunk order assumed.
    h_out_ref[0] = x + out[:h_dim]
    skip_out_ref[0] = skip_ref[0] + out[h_dim:]


# ----------------------------------------------------------------------------
# Pallas wrappers
# ----------------------------------------------------------------------------

def pointwise_conv(x, w, b, gamma=None, beta=None, apply_silu=False):
    """x: (B, Cin, L), w: (Cout, Cin), b: (Cout,) -> (B, Cout, L)."""
    f32, bf16 = jnp.float32, jnp.bfloat16
    x = x.astype(f32)
    B, cin, L = x.shape
    cout = w.shape[0]
    if gamma is None:
        gamma = jnp.zeros((B, cout), f32)
    if beta is None:
        beta = jnp.zeros((B, cout), f32)
    g = gamma.reshape(B, cout, 1).astype(f32)
    s = beta.reshape(B, cout, 1).astype(f32)
    kern = functools.partial(_pw_conv_kernel, apply_silu)
    return pl.pallas_call(
        kern,
        out_shape=jax.ShapeDtypeStruct((B, cout, L), f32),
        grid=(B,),
        in_specs=[
            pl.BlockSpec((1, cin, L), lambda i: (i, 0, 0)),
            pl.BlockSpec((cout, cin), lambda i: (0, 0)),
            pl.BlockSpec((cout, 1), lambda i: (0, 0)),
            pl.BlockSpec((1, cout, 1), lambda i: (i, 0, 0)),
            pl.BlockSpec((1, cout, 1), lambda i: (i, 0, 0)),
        ],
        out_specs=pl.BlockSpec((1, cout, L), lambda i: (i, 0, 0)),
        compiler_params=pltpu.CompilerParams(
            dimension_semantics=("parallel",),
            vmem_limit_bytes=_VMEM_LIMIT),
    )(x, w.astype(bf16), b.reshape(cout, 1).astype(f32), g, s)


def layer_forward(p, x, a, skip, c):
    """One fused residual layer: (h, skip) -> (h + res, skip + s)."""
    f32, bf16 = jnp.float32, jnp.bfloat16
    B, h_dim, L = x.shape
    a_dim = a.shape[1]
    H2 = p["hg1"]["w"].shape[0]        # 2H
    H = H2 // 2

    def col(v):                        # (B, C) -> (B, C, 1)
        return v.reshape(B, -1, 1).astype(f32)

    # conditioning -> per-sample FiLM gamma/beta (tiny MLPs, plain JAX)
    g0, s0 = apply_mod(p["hg0_mod"], c)
    g1, s1 = apply_mod(p["hg1_mod"], c)
    gd, sd = apply_mod(p["dw_mod"], c)
    gp, sp = apply_mod(p["pw_mod"], c)
    go, so = apply_mod(p["out_mod"], c)

    w0 = p["hg0"]["w"]
    inputs = (
        x.astype(f32), a.astype(f32), skip.astype(f32),
        w0[:, :h_dim].astype(bf16), w0[:, h_dim:].astype(bf16),
        p["hg0"]["b"].reshape(H2, 1).astype(f32),
        p["hg1"]["w"].astype(bf16), p["hg1"]["b"].reshape(H2, 1).astype(f32),
        p["dw"]["w"].astype(f32), p["dw"]["b"].reshape(H, 1).astype(f32),
        p["pw"]["w"].astype(bf16), p["pw"]["b"].reshape(H2, 1).astype(f32),
        p["out"]["w"].astype(bf16), p["out"]["b"].reshape(2 * h_dim, 1).astype(f32),
        col(g0), col(s0), col(g1), col(s1), col(gd), col(sd),
        col(gp), col(sp), col(go), col(so),
    )

    def full2d(arr):
        return pl.BlockSpec(arr.shape, lambda i: (0, 0))

    def per_b(cdim, ldim):
        return pl.BlockSpec((1, cdim, ldim), lambda i: (i, 0, 0))

    in_specs = [
        per_b(h_dim, L), per_b(a_dim, L), per_b(h_dim, L),
        full2d(inputs[3]), full2d(inputs[4]), full2d(inputs[5]),
        full2d(inputs[6]), full2d(inputs[7]),
        full2d(inputs[8]), full2d(inputs[9]),
        full2d(inputs[10]), full2d(inputs[11]),
        full2d(inputs[12]), full2d(inputs[13]),
        per_b(H2, 1), per_b(H2, 1), per_b(H2, 1), per_b(H2, 1),
        per_b(H, 1), per_b(H, 1), per_b(H2, 1), per_b(H2, 1),
        per_b(2 * h_dim, 1), per_b(2 * h_dim, 1),
    ]
    out_spec = pl.BlockSpec((1, h_dim, L), lambda i: (i, 0, 0))

    kern = functools.partial(_layer_kernel, h_dim, H)
    h_new, skip_new = pl.pallas_call(
        kern,
        out_shape=(jax.ShapeDtypeStruct((B, h_dim, L), f32),
                   jax.ShapeDtypeStruct((B, h_dim, L), f32)),
        grid=(B,),
        in_specs=in_specs,
        out_specs=(out_spec, out_spec),
        compiler_params=pltpu.CompilerParams(
            dimension_semantics=("parallel",),   # shards across v7x's 2 TensorCores
            vmem_limit_bytes=_VMEM_LIMIT),
    )(*inputs)
    return h_new, skip_new


# ----------------------------------------------------------------------------
# Deterministic parameter initialization (glue, plain JAX)
# ----------------------------------------------------------------------------

def _uniform(key, shape, bound):
    return jax.random.uniform(key, shape, jnp.float32, -bound, bound)


def linear_init(key, out_dim, in_dim, fan_in=None):
    fan_in = in_dim if fan_in is None else fan_in
    bound = 1.0 / math.sqrt(fan_in)
    kw, kb = jax.random.split(key)
    return {"w": _uniform(kw, (out_dim, in_dim), bound),
            "b": _uniform(kb, (out_dim,), bound)}


def mod_init(key, c_dim, mod_depth, out_ch):
    # TODO(synk): ModulateConv definition not provided; implemented as FiLM-style
    # output modulation: y = conv(x) * (1 + gamma) + beta, [gamma|beta] = MLP(c)
    # with `mod_depth` (Linear(c_dim,c_dim)+SiLU) hidden layers.
    keys = jax.random.split(key, mod_depth + 1)
    hidden = [linear_init(keys[i], c_dim, c_dim) for i in range(mod_depth)]
    final = linear_init(keys[-1], 2 * out_ch, c_dim)
    return {"hidden": hidden, "final": final}


def apply_mod(mod_p, c):
    # conditioning MLP (tiny, plain JAX): c (B, c_dim) -> gamma, beta (B, out_ch)
    h = c
    for lyr in mod_p["hidden"]:
        h = jax.nn.silu(h @ lyr["w"].T + lyr["b"])
    gb = h @ mod_p["final"]["w"].T + mod_p["final"]["b"]
    gamma, beta = jnp.split(gb, 2, axis=1)
    return gamma, beta


def layer_init(key, h_dim, a_dim, expand, c_dim, mod_depth):
    H = h_dim * expand
    ks = jax.random.split(key, 10)
    kdw_w, kdw_b = jax.random.split(ks[4])
    return {
        "hg0": linear_init(ks[0], 2 * H, h_dim + a_dim),
        "hg0_mod": mod_init(ks[1], c_dim, mod_depth, 2 * H),
        "hg1": linear_init(ks[2], 2 * H, 2 * H),
        "hg1_mod": mod_init(ks[3], c_dim, mod_depth, 2 * H),
        "dw": {"w": _uniform(kdw_w, (H, 3), 1.0 / math.sqrt(3.0)),
               "b": _uniform(kdw_b, (H,), 1.0 / math.sqrt(3.0))},
        "dw_mod": mod_init(ks[5], c_dim, mod_depth, H),
        "pw": linear_init(ks[6], 2 * H, H),
        "pw_mod": mod_init(ks[7], c_dim, mod_depth, 2 * H),
        "out": linear_init(ks[8], 2 * h_dim, H),
        "out_mod": mod_init(ks[9], c_dim, mod_depth, 2 * h_dim),
    }


def denoiser_init(key, dim, a_dim, args):
    n_keys = args["c_depth"] + 2 + args["depth"]
    ks = jax.random.split(key, n_keys)
    idx = 0
    proj_c = []
    d_in = 1 + NUM_LABELS
    for _ in range(args["c_depth"]):
        proj_c.append(linear_init(ks[idx], args["c_dim"], d_in))
        d_in = args["c_dim"]
        idx += 1
    proj_h = linear_init(ks[idx], args["h_dim"], dim); idx += 1
    proj_h_mod = mod_init(ks[idx], args["c_dim"], args["mod_depth"], args["h_dim"]); idx += 1
    layers = []
    for _ in range(args["depth"]):
        layers.append(layer_init(ks[idx], args["h_dim"], a_dim,
                                 args["expand"], args["c_dim"], args["mod_depth"]))
        idx += 1
    # proj_out is zero-initialized exactly as in the PyTorch module.
    proj_out = {"w": jnp.zeros((dim, args["h_dim"]), jnp.float32),
                "b": jnp.zeros((dim,), jnp.float32)}
    return {"proj_c": proj_c, "proj_h": proj_h, "proj_h_mod": proj_h_mod,
            "layers": layers, "proj_out": proj_out}


# ----------------------------------------------------------------------------
# Forward pass
# ----------------------------------------------------------------------------

def denoiser_forward(params, a, label, x, t):
    # proj_c: tiny MLP on [t, label] — plain JAX (L=1 tensors are not worth a kernel).
    c = jnp.concatenate([t[:, None], label], axis=1)              # (B, 1+NUM_LABELS)
    for lyr in params["proj_c"]:
        c = jax.nn.silu(c @ lyr["w"].T + lyr["b"])

    # proj_h (modulated 1x1 conv)
    gamma, beta = apply_mod(params["proj_h_mod"], c)
    h = pointwise_conv(x, params["proj_h"]["w"], params["proj_h"]["b"], gamma, beta)

    # TODO(synk): ResSkipNet definition not provided; each layer's output is chunked
    # into (residual, skip); residuals update h, skips accumulate (fused in-kernel).
    skip = jnp.zeros_like(h)
    for p in params["layers"]:
        h, skip = layer_forward(p, h, a, skip, c)

    # proj_out (zero-initialized, unmodulated 1x1 conv)
    return pointwise_conv(skip, params["proj_out"]["w"], params["proj_out"]["b"])


# ----------------------------------------------------------------------------

if __name__ == "__main__":
    args = dict(h_dim=16, depth=2, expand=2, c_dim=16, c_depth=2, mod_depth=1)
    dim, a_dim, B, L = 4, 4, 2, 128   # L=128 -> one full lane register per row

    key = jax.random.PRNGKey(0)
    kp, ka, kl, kx, kt = jax.random.split(key, 5)
    params = denoiser_init(kp, dim, a_dim, args)

    a = jax.random.normal(ka, (B, a_dim, L), jnp.float32)
    label = jax.random.normal(kl, (B, NUM_LABELS), jnp.float32)
    x = jax.random.normal(kx, (B, dim, L), jnp.float32)
    t = jax.random.uniform(kt, (B,), jnp.float32)

    out = jax.jit(denoiser_forward)(params, a, label, x, t)
    out = jax.block_until_ready(out)

    assert out.shape == (B, dim, L), out.shape
    assert bool(jnp.all(jnp.isfinite(out)))
    print("KERNEL_OK")
</pallas_src>

<mosaic_0001>
module attributes {stable_mosaic.version = 11 : i64} {
  func.func @_pw_conv_kernel(%arg0: i32, %arg1: memref<1x4x128xf32, #tpu.memory_space<vmem>>, %arg2: memref<16x4xbf16, #tpu.memory_space<vmem>>, %arg3: memref<16x1xf32, #tpu.memory_space<vmem>>, %arg4: memref<1x16x1xf32, #tpu.memory_space<vmem>>, %arg5: memref<1x16x1xf32, #tpu.memory_space<vmem>>, %arg6: memref<1x16x128xf32, #tpu.memory_space<vmem>>) attributes {dimension_semantics = [#tpu.dimension_semantics<parallel>], iteration_bounds = array<i64: 2>, scalar_prefetch = 0 : i64, scratch_operands = 0 : i64, tpu.core_type = #tpu.core_type<tc>, window_params = [{transform_indices = @transform_0, window_bounds = array<i64: 1, 4, 128>}, {pipeline_mode = #tpu.pipeline_mode<synchronous>, transform_indices = @transform_1, window_bounds = array<i64: 16, 4>}, {pipeline_mode = #tpu.pipeline_mode<synchronous>, transform_indices = @transform_2, window_bounds = array<i64: 16, 1>}, {transform_indices = @transform_3, window_bounds = array<i64: 1, 16, 1>}, {transform_indices = @transform_4, window_bounds = array<i64: 1, 16, 1>}, {transform_indices = @transform_5, window_bounds = array<i64: 1, 16, 128>}]} {
    %c0 = arith.constant 0 : index
    %c0_0 = arith.constant 0 : index
    %c0_1 = arith.constant 0 : index
    %0 = vector.load %arg1[%c0, %c0_0, %c0_1] : memref<1x4x128xf32, #tpu.memory_space<vmem>>, vector<1x4x128xf32>
    %1 = vector.shape_cast %0 : vector<1x4x128xf32> to vector<4x128xf32>
    %2 = arith.truncf %1 : vector<4x128xf32> to vector<4x128xbf16>
    %c0_2 = arith.constant 0 : index
    %c0_3 = arith.constant 0 : index
    %3 = vector.load %arg2[%c0_2, %c0_3] : memref<16x4xbf16, #tpu.memory_space<vmem>>, vector<16x4xbf16>
    %cst = arith.constant dense<0.000000e+00> : vector<16x128xf32>
    %4 = tpu.matmul %3, %2, %cst {dimension_numbers = #tpu.dot_dimension_numbers<[1], [0], [0], [1], [0, 0, 1, 1], [], []>} : vector<16x4xbf16>, vector<4x128xbf16>, vector<16x128xf32> -> vector<16x128xf32>
    %c0_4 = arith.constant 0 : index
    %c0_5 = arith.constant 0 : index
    %5 = vector.load %arg3[%c0_4, %c0_5] : memref<16x1xf32, #tpu.memory_space<vmem>>, vector<16x1xf32>
    %6 = vector.broadcast %5 : vector<16x1xf32> to vector<16x128xf32>
    %7 = arith.addf %4, %6 : vector<16x128xf32>
    %c0_6 = arith.constant 0 : index
    %c0_7 = arith.constant 0 : index
    %c0_8 = arith.constant 0 : index
    %8 = vector.load %arg4[%c0_6, %c0_7, %c0_8] : memref<1x16x1xf32, #tpu.memory_space<vmem>>, vector<1x16x1xf32>
    %9 = vector.shape_cast %8 : vector<1x16x1xf32> to vector<16x1xf32>
    %cst_9 = arith.constant 1.000000e+00 : f32
    %10 = vector.broadcast %cst_9 : f32 to vector<16x1xf32>
    %11 = arith.addf %10, %9 : vector<16x1xf32>
    %12 = vector.broadcast %11 : vector<16x1xf32> to vector<16x128xf32>
    %13 = arith.mulf %7, %12 : vector<16x128xf32>
    %c0_10 = arith.constant 0 : index
    %c0_11 = arith.constant 0 : index
    %c0_12 = arith.constant 0 : index
    %14 = vector.load %arg5[%c0_10, %c0_11, %c0_12] : memref<1x16x1xf32, #tpu.memory_space<vmem>>, vector<1x16x1xf32>
    %15 = vector.shape_cast %14 : vector<1x16x1xf32> to vector<16x1xf32>
    %16 = vector.broadcast %15 : vector<16x1xf32> to vector<16x128xf32>
    %17 = arith.addf %13, %16 : vector<16x128xf32>
    %c0_13 = arith.constant 0 : index
    %c0_14 = arith.constant 0 : index
    %c0_15 = arith.constant 0 : index
    %18 = vector.load %arg6[%c0_13, %c0_14, %c0_15] : memref<1x16x128xf32, #tpu.memory_space<vmem>>, vector<1x16x128xf32>
    %19 = vector.shape_cast %18 : vector<1x16x128xf32> to vector<16x128xf32>
    %20 = vector.shape_cast %17 : vector<16x128xf32> to vector<1x16x128xf32>
    tpu.vector_store %arg6[%c0_13, %c0_14, %c0_15], %20 {strides = array<i32>} : memref<1x16x128xf32, #tpu.memory_space<vmem>>, vector<1x16x128xf32>,
    return
  }
  func.func @transform_0(%arg0: i32) -> (i32, i32, i32) {
    %c0_i32 = arith.constant 0 : i32
    %c0_i32_0 = arith.constant 0 : i32
    %c0_i32_1 = arith.constant 0 : i32
    return %arg0, %c0_i32, %c0_i32_0 : i32, i32, i32
  }
  func.func @transform_1(%arg0: i32) -> (i32, i32) {
    %c0_i32 = arith.constant 0 : i32
    %c0_i32_0 = arith.constant 0 : i32
    %c0_i32_1 = arith.constant 0 : i32
    return %c0_i32, %c0_i32_0 : i32, i32
  }
  func.func @transform_2(%arg0: i32) -> (i32, i32) {
    %c0_i32 = arith.constant 0 : i32
    %c0_i32_0 = arith.constant 0 : i32
    %c0_i32_1 = arith.constant 0 : i32
    return %c0_i32, %c0_i32_0 : i32, i32
  }
  func.func @transform_3(%arg0: i32) -> (i32, i32, i32) {
    %c0_i32 = arith.constant 0 : i32
    %c0_i32_0 = arith.constant 0 : i32
    %c0_i32_1 = arith.constant 0 : i32
    return %arg0, %c0_i32, %c0_i32_0 : i32, i32, i32
  }
  func.func @transform_4(%arg0: i32) -> (i32, i32, i32) {
    %c0_i32 = arith.constant 0 : i32
    %c0_i32_0 = arith.constant 0 : i32
    %c0_i32_1 = arith.constant 0 : i32
    return %arg0, %c0_i32, %c0_i32_0 : i32, i32, i32
  }
  func.func @transform_5(%arg0: i32) -> (i32, i32, i32) {
    %c0_i32 = arith.constant 0 : i32
    %c0_i32_0 = arith.constant 0 : i32
    %c0_i32_1 = arith.constant 0 : i32
    return %arg0, %c0_i32, %c0_i32_0 : i32, i32, i32
  }
}

module attributes {stable_mosaic.version = 11 : i64} {
  func.func @_layer_kernel(%arg0: i32, %arg1: memref<1x16x128xf32, #tpu.memory_space<vmem>>, %arg2: memref<1x4x128xf32, #tpu.memory_space<vmem>>, %arg3: memref<1x16x128xf32, #tpu.memory_space<vmem>>, %arg4: memref<64x16xbf16, #tpu.memory_space<vmem>>, %arg5: memref<64x4xbf16, #tpu.memory_space<vmem>>, %arg6: memref<64x1xf32, #tpu.memory_space<vmem>>, %arg7: memref<64x64xbf16, #tpu.memory_space<vmem>>, %arg8: memref<64x1xf32, #tpu.memory_space<vmem>>, %arg9: memref<32x3xf32, #tpu.memory_space<vmem>>, %arg10: memref<32x1xf32, #tpu.memory_space<vmem>>, %arg11: memref<64x32xbf16, #tpu.memory_space<vmem>>, %arg12: memref<64x1xf32, #tpu.memory_space<vmem>>, %arg13: memref<32x32xbf16, #tpu.memory_space<vmem>>, %arg14: memref<32x1xf32, #tpu.memory_space<vmem>>, %arg15: memref<1x64x1xf32, #tpu.memory_space<vmem>>, %arg16: memref<1x64x1xf32, #tpu.memory_space<vmem>>, %arg17: memref<1x64x1xf32, #tpu.memory_space<vmem>>, %arg18: memref<1x64x1xf32, #tpu.memory_space<vmem>>, %arg19: memref<1x32x1xf32, #tpu.memory_space<vmem>>, %arg20: memref<1x32x1xf32, #tpu.memory_space<vmem>>, %arg21: memref<1x64x1xf32, #tpu.memory_space<vmem>>, %arg22: memref<1x64x1xf32, #tpu.memory_space<vmem>>, %arg23: memref<1x32x1xf32, #tpu.memory_space<vmem>>, %arg24: memref<1x32x1xf32, #tpu.memory_space<vmem>>, %arg25: memref<1x16x128xf32, #tpu.memory_space<vmem>>, %arg26: memref<1x16x128xf32, #tpu.memory_space<vmem>>) attributes {dimension_semantics = [#tpu.dimension_semantics<parallel>], iteration_bounds = array<i64: 2>, scalar_prefetch = 0 : i64, scratch_operands = 0 : i64, tpu.core_type = #tpu.core_type<tc>, window_params = [{transform_indices = @transform_0, window_bounds = array<i64: 1, 16, 128>}, {transform_indices = @transform_1, window_bounds = array<i64: 1, 4, 128>}, {transform_indices = @transform_2, window_bounds = array<i64: 1, 16, 128>}, {pipeline_mode = #tpu.pipeline_mode<synchronous>, transform_indices = @transform_3, window_bounds = array<i64: 64, 16>}, {pipeline_mode = #tpu.pipeline_mode<synchronous>, transform_indices = @transform_4, window_bounds = array<i64: 64, 4>}, {pipeline_mode = #tpu.pipeline_mode<synchronous>, transform_indices = @transform_5, window_bounds = array<i64: 64, 1>}, {pipeline_mode = #tpu.pipeline_mode<synchronous>, transform_indices = @transform_6, window_bounds = array<i64: 64, 64>}, {pipeline_mode = #tpu.pipeline_mode<synchronous>, transform_indices = @transform_7, window_bounds = array<i64: 64, 1>}, {pipeline_mode = #tpu.pipeline_mode<synchronous>, transform_indices = @transform_8, window_bounds = array<i64: 32, 3>}, {pipeline_mode = #tpu.pipeline_mode<synchronous>, transform_indices = @transform_9, window_bounds = array<i64: 32, 1>}, {pipeline_mode = #tpu.pipeline_mode<synchronous>, transform_indices = @transform_10, window_bounds = array<i64: 64, 32>}, {pipeline_mode = #tpu.pipeline_mode<synchronous>, transform_indices = @transform_11, window_bounds = array<i64: 64, 1>}, {pipeline_mode = #tpu.pipeline_mode<synchronous>, transform_indices = @transform_12, window_bounds = array<i64: 32, 32>}, {pipeline_mode = #tpu.pipeline_mode<synchronous>, transform_indices = @transform_13, window_bounds = array<i64: 32, 1>}, {transform_indices = @transform_14, window_bounds = array<i64: 1, 64, 1>}, {transform_indices = @transform_15, window_bounds = array<i64: 1, 64, 1>}, {transform_indices = @transform_16, window_bounds = array<i64: 1, 64, 1>}, {transform_indices = @transform_17, window_bounds = array<i64: 1, 64, 1>}, {transform_indices = @transform_18, window_bounds = array<i64: 1, 32, 1>}, {transform_indices = @transform_19, window_bounds = array<i64: 1, 32, 1>}, {transform_indices = @transform_20, window_bounds = array<i64: 1, 64, 1>}, {transform_indices = @transform_21, window_bounds = array<i64: 1, 64, 1>}, {transform_indices = @transform_22, window_bounds = array<i64: 1, 32, 1>}, {transform_indices = @transform_23, window_bounds = array<i64: 1, 32, 1>}, {transform_indices = @transform_24, window_bounds = array<i64: 1, 16, 128>}, {transform_indices = @transform_25, window_bounds = array<i64: 1, 16, 128>}]} {
    %c0 = arith.constant 0 : index
    %c0_0 = arith.constant 0 : index
    %c0_1 = arith.constant 0 : index
    %0 = vector.load %arg1[%c0, %c0_0, %c0_1] : memref<1x16x128xf32, #tpu.memory_space<vmem>>, vector<1x16x128xf32>
    %1 = vector.shape_cast %0 : vector<1x16x128xf32> to vector<16x128xf32>
    %c0_2 = arith.constant 0 : index
    %c0_3 = arith.constant 0 : index
    %c0_4 = arith.constant 0 : index
    %2 = vector.load %arg2[%c0_2, %c0_3, %c0_4] : memref<1x4x128xf32, #tpu.memory_space<vmem>>, vector<1x4x128xf32>
    %3 = vector.shape_cast %2 : vector<1x4x128xf32> to vector<4x128xf32>
    %c0_5 = arith.constant 0 : index
    %c0_6 = arith.constant 0 : index
    %4 = vector.load %arg4[%c0_5, %c0_6] : memref<64x16xbf16, #tpu.memory_space<vmem>>, vector<64x16xbf16>
    %5 = arith.truncf %1 : vector<16x128xf32> to vector<16x128xbf16>
    %cst = arith.constant dense<0.000000e+00> : vector<64x128xf32>
    %6 = tpu.matmul %4, %5, %cst {dimension_numbers = #tpu.dot_dimension_numbers<[1], [0], [0], [1], [0, 0, 1, 1], [], []>} : vector<64x16xbf16>, vector<16x128xbf16>, vector<64x128xf32> -> vector<64x128xf32>
    %c0_7 = arith.constant 0 : index
    %c0_8 = arith.constant 0 : index
    %7 = vector.load %arg5[%c0_7, %c0_8] : memref<64x4xbf16, #tpu.memory_space<vmem>>, vector<64x4xbf16>
    %8 = arith.truncf %3 : vector<4x128xf32> to vector<4x128xbf16>
    %cst_9 = arith.constant dense<0.000000e+00> : vector<64x128xf32>
    %9 = tpu.matmul %7, %8, %cst_9 {dimension_numbers = #tpu.dot_dimension_numbers<[1], [0], [0], [1], [0, 0, 1, 1], [], []>} : vector<64x4xbf16>, vector<4x128xbf16>, vector<64x128xf32> -> vector<64x128xf32>
    %10 = arith.addf %6, %9 : vector<64x128xf32>
    %c0_10 = arith.constant 0 : index
    %c0_11 = arith.constant 0 : index
    %11 = vector.load %arg6[%c0_10, %c0_11] : memref<64x1xf32, #tpu.memory_space<vmem>>, vector<64x1xf32>
    %12 = vector.broadcast %11 : vector<64x1xf32> to vector<64x128xf32>
    %13 = arith.addf %10, %12 : vector<64x128xf32>
    %c0_12 = arith.constant 0 : index
    %c0_13 = arith.constant 0 : index
    %c0_14 = arith.constant 0 : index
    %14 = vector.load %arg15[%c0_12, %c0_13, %c0_14] : memref<1x64x1xf32, #tpu.memory_space<vmem>>, vector<1x64x1xf32>
    %15 = vector.shape_cast %14 : vector<1x64x1xf32> to vector<64x1xf32>
    %cst_15 = arith.constant 1.000000e+00 : f32
    %16 = vector.broadcast %cst_15 : f32 to vector<64x1xf32>
    %17 = arith.addf %16, %15 : vector<64x1xf32>
    %18 = vector.broadcast %17 : vector<64x1xf32> to vector<64x128xf32>
    %19 = arith.mulf %13, %18 : vector<64x128xf32>
    %c0_16 = arith.constant 0 : index
    %c0_17 = arith.constant 0 : index
    %c0_18 = arith.constant 0 : index
    %20 = vector.load %arg16[%c0_16, %c0_17, %c0_18] : memref<1x64x1xf32, #tpu.memory_space<vmem>>, vector<1x64x1xf32>
    %21 = vector.shape_cast %20 : vector<1x64x1xf32> to vector<64x1xf32>
    %22 = vector.broadcast %21 : vector<64x1xf32> to vector<64x128xf32>
    %23 = arith.addf %19, %22 : vector<64x128xf32>
    %24 = arith.negf %23 : vector<64x128xf32>
    %25 = math.exp %24 : vector<64x128xf32>
    %cst_19 = arith.constant 1.000000e+00 : f32
    %26 = vector.broadcast %cst_19 : f32 to vector<64x128xf32>
    %27 = arith.addf %26, %25 : vector<64x128xf32>
    %28 = arith.divf %26, %27 : vector<64x128xf32>
    %29 = arith.mulf %23, %28 : vector<64x128xf32>
    %c0_20 = arith.constant 0 : index
    %c0_21 = arith.constant 0 : index
    %30 = vector.load %arg7[%c0_20, %c0_21] : memref<64x64xbf16, #tpu.memory_space<vmem>>, vector<64x64xbf16>
    %31 = arith.truncf %29 : vector<64x128xf32> to vector<64x128xbf16>
    %cst_22 = arith.constant dense<0.000000e+00> : vector<64x128xf32>
    %32 = tpu.matmul %30, %31, %cst_22 {dimension_numbers = #tpu.dot_dimension_numbers<[1], [0], [0], [1], [0, 0, 1, 1], [], []>} : vector<64x64xbf16>, vector<64x128xbf16>, vector<64x128xf32> -> vector<64x128xf32>
    %c0_23 = arith.constant 0 : index
    %c0_24 = arith.constant 0 : index
    %33 = vector.load %arg8[%c0_23, %c0_24] : memref<64x1xf32, #tpu.memory_space<vmem>>, vector<64x1xf32>
    %34 = vector.broadcast %33 : vector<64x1xf32> to vector<64x128xf32>
    %35 = arith.addf %32, %34 : vector<64x128xf32>
    %c0_25 = arith.constant 0 : index
    %c0_26 = arith.constant 0 : index
    %c0_27 = arith.constant 0 : index
    %36 = vector.load %arg17[%c0_25, %c0_26, %c0_27] : memref<1x64x1xf32, #tpu.memory_space<vmem>>, vector<1x64x1xf32>
    %37 = vector.shape_cast %36 : vector<1x64x1xf32> to vector<64x1xf32>
    %cst_28 = arith.constant 1.000000e+00 : f32
    %38 = vector.broadcast %cst_28 : f32 to vector<64x1xf32>
    %39 = arith.addf %38, %37 : vector<64x1xf32>
    %40 = vector.broadcast %39 : vector<64x1xf32> to vector<64x128xf32>
    %41 = arith.mulf %35, %40 : vector<64x128xf32>
    %c0_29 = arith.constant 0 : index
    %c0_30 = arith.constant 0 : index
    %c0_31 = arith.constant 0 : index
    %42 = vector.load %arg18[%c0_29, %c0_30, %c0_31] : memref<1x64x1xf32, #tpu.memory_space<vmem>>, vector<1x64x1xf32>
    %43 = vector.shape_cast %42 : vector<1x64x1xf32> to vector<64x1xf32>
    %44 = vector.broadcast %43 : vector<64x1xf32> to vector<64x128xf32>
    %45 = arith.addf %41, %44 : vector<64x128xf32>
    %46 = vector.extract_strided_slice %45 {offsets = [0, 0], sizes = [32, 128], strides = [1, 1]} : vector<64x128xf32> to vector<32x128xf32>
    %47 = vector.extract_strided_slice %45 {offsets = [32, 0], sizes = [32, 128], strides = [1, 1]} : vector<64x128xf32> to vector<32x128xf32>
    %48 = tpu.iota {dimensions = array<i32: 1>} : vector<32x128xi32>
    %c1_i32 = arith.constant 1 : i32
    %49 = vector.broadcast %c1_i32 : i32 to vector<32x128xi32>
    %50 = arith.cmpi sge, %48, %49 : vector<32x128xi32>
    %c1_i32_32 = arith.constant 1 : i32
    %51 = tpu.dynamic_rotate %46 by %c1_i32_32 dim 1 : vector<32x128xf32>, i32 -> vector<32x128xf32>
    %cst_33 = arith.constant 0.000000e+00 : f32
    %52 = vector.broadcast %cst_33 : f32 to vector<32x128xf32>
    %53 = arith.select %50, %51, %52 : vector<32x128xi1>, vector<32x128xf32>
    %c127_i32 = arith.constant 127 : i32
    %54 = vector.broadcast %c127_i32 : i32 to vector<32x128xi32>
    %55 = arith.cmpi slt, %48, %54 : vector<32x128xi32>
    %c127_i32_34 = arith.constant 127 : i32
    %56 = tpu.dynamic_rotate %46 by %c127_i32_34 dim 1 : vector<32x128xf32>, i32 -> vector<32x128xf32>
    %cst_35 = arith.constant 0.000000e+00 : f32
    %57 = vector.broadcast %cst_35 : f32 to vector<32x128xf32>
    %58 = arith.select %55, %56, %57 : vector<32x128xi1>, vector<32x128xf32>
    %c0_36 = arith.constant 0 : index
    %c0_37 = arith.constant 0 : index
    %59 = vector.load %arg9[%c0_36, %c0_37] : memref<32x3xf32, #tpu.memory_space<vmem>>, vector<32x3xf32>
    %60 = vector.extract_strided_slice %59 {offsets = [0, 0], sizes = [32, 1], strides = [1, 1]} : vector<32x3xf32> to vector<32x1xf32>
    %61 = vector.broadcast %60 : vector<32x1xf32> to vector<32x128xf32>
    %62 = arith.mulf %61, %53 : vector<32x128xf32>
    %63 = vector.extract_strided_slice %59 {offsets = [0, 1], sizes = [32, 1], strides = [1, 1]} : vector<32x3xf32> to vector<32x1xf32>
    %64 = vector.broadcast %63 : vector<32x1xf32> to vector<32x128xf32>
    %65 = arith.mulf %64, %46 : vector<32x128xf32>
    %66 = arith.addf %62, %65 : vector<32x128xf32>
    %67 = vector.extract_strided_slice %59 {offsets = [0, 2], sizes = [32, 1], strides = [1, 1]} : vector<32x3xf32> to vector<32x1xf32>
    %68 = vector.broadcast %67 : vector<32x1xf32> to vector<32x128xf32>
    %69 = arith.mulf %68, %58 : vector<32x128xf32>
    %70 = arith.addf %66, %69 : vector<32x128xf32>
    %c0_38 = arith.constant 0 : index
    %c0_39 = arith.constant 0 : index
    %71 = vector.load %arg10[%c0_38, %c0_39] : memref<32x1xf32, #tpu.memory_space<vmem>>, vector<32x1xf32>
    %72 = vector.broadcast %71 : vector<32x1xf32> to vector<32x128xf32>
    %73 = arith.addf %70, %72 : vector<32x128xf32>
    %c0_40 = arith.constant 0 : index
    %c0_41 = arith.constant 0 : index
    %c0_42 = arith.constant 0 : index
    %74 = vector.load %arg19[%c0_40, %c0_41, %c0_42] : memref<1x32x1xf32, #tpu.memory_space<vmem>>, vector<1x32x1xf32>
    %75 = vector.shape_cast %74 : vector<1x32x1xf32> to vector<32x1xf32>
    %cst_43 = arith.constant 1.000000e+00 : f32
    %76 = vector.broadcast %cst_43 : f32 to vector<32x1xf32>
    %77 = arith.addf %76, %75 : vector<32x1xf32>
    %78 = vector.broadcast %77 : vector<32x1xf32> to vector<32x128xf32>
    %79 = arith.mulf %73, %78 : vector<32x128xf32>
    %c0_44 = arith.constant 0 : index
    %c0_45 = arith.constant 0 : index
    %c0_46 = arith.constant 0 : index
    %80 = vector.load %arg20[%c0_44, %c0_45, %c0_46] : memref<1x32x1xf32, #tpu.memory_space<vmem>>, vector<1x32x1xf32>
    %81 = vector.shape_cast %80 : vector<1x32x1xf32> to vector<32x1xf32>
    %82 = vector.broadcast %81 : vector<32x1xf32> to vector<32x128xf32>
    %83 = arith.addf %79, %82 : vector<32x128xf32>
    %84 = arith.negf %83 : vector<32x128xf32>
    %85 = math.exp %84 : vector<32x128xf32>
    %cst_47 = arith.constant 1.000000e+00 : f32
    %86 = vector.broadcast %cst_47 : f32 to vector<32x128xf32>
    %87 = arith.addf %86, %85 : vector<32x128xf32>
    %88 = arith.divf %86, %87 : vector<32x128xf32>
    %89 = arith.mulf %83, %88 : vector<32x128xf32>
    %c0_48 = arith.constant 0 : index
    %c0_49 = arith.constant 0 : index
    %90 = vector.load %arg11[%c0_48, %c0_49] : memref<64x32xbf16, #tpu.memory_space<vmem>>, vector<64x32xbf16>
    %91 = arith.truncf %89 : vector<32x128xf32> to vector<32x128xbf16>
    %cst_50 = arith.constant dense<0.000000e+00> : vector<64x128xf32>
    %92 = tpu.matmul %90, %91, %cst_50 {dimension_numbers = #tpu.dot_dimension_numbers<[1], [0], [0], [1], [0, 0, 1, 1], [], []>} : vector<64x32xbf16>, vector<32x128xbf16>, vector<64x128xf32> -> vector<64x128xf32>
    %c0_51 = arith.constant 0 : index
    %c0_52 = arith.constant 0 : index
    %93 = vector.load %arg12[%c0_51, %c0_52] : memref<64x1xf32, #tpu.memory_space<vmem>>, vector<64x1xf32>
    %94 = vector.broadcast %93 : vector<64x1xf32> to vector<64x128xf32>
    %95 = arith.addf %92, %94 : vector<64x128xf32>
    %c0_53 = arith.constant 0 : index
    %c0_54 = arith.constant 0 : index
    %c0_55 = arith.constant 0 : index
    %96 = vector.load %arg21[%c0_53, %c0_54, %c0_55] : memref<1x64x1xf32, #tpu.memory_space<vmem>>, vector<1x64x1xf32>
    %97 = vector.shape_cast %96 : vector<1x64x1xf32> to vector<64x1xf32>
    %cst_56 = arith.constant 1.000000e+00 : f32
    %98 = vector.broadcast %cst_56 : f32 to vector<64x1xf32>
    %99 = arith.addf %98, %97 : vector<64x1xf32>
    %100 = vector.broadcast %99 : vector<64x1xf32> to vector<64x128xf32>
    %101 = arith.mulf %95, %100 : vector<64x128xf32>
    %c0_57 = arith.constant 0 : index
    %c0_58 = arith.constant 0 : index
    %c0_59 = arith.constant 0 : index
    %102 = vector.load %arg22[%c0_57, %c0_58, %c0_59] : memref<1x64x1xf32, #tpu.memory_space<vmem>>, vector<1x64x1xf32>
    %103 = vector.shape_cast %102 : vector<1x64x1xf32> to vector<64x1xf32>
    %104 = vector.broadcast %103 : vector<64x1xf32> to vector<64x128xf32>
    %105 = arith.addf %101, %104 : vector<64x128xf32>
    %106 = vector.extract_strided_slice %105 {offsets = [0, 0], sizes = [32, 128], strides = [1, 1]} : vector<64x128xf32> to vector<32x128xf32>
    %107 = vector.extract_strided_slice %105 {offsets = [32, 0], sizes = [32, 128], strides = [1, 1]} : vector<64x128xf32> to vector<32x128xf32>
    %108 = arith.negf %107 : vector<32x128xf32>
    %109 = math.exp %108 : vector<32x128xf32>
    %cst_60 = arith.constant 1.000000e+00 : f32
    %110 = vector.broadcast %cst_60 : f32 to vector<32x128xf32>
    %111 = arith.addf %110, %109 : vector<32x128xf32>
    %112 = arith.divf %110, %111 : vector<32x128xf32>
    %cst_61 = arith.constant 1.000000e+00 : f32
    %113 = vector.broadcast %cst_61 : f32 to vector<32x128xf32>
    %114 = arith.subf %113, %112 : vector<32x128xf32>
    %115 = arith.mulf %112, %106 : vector<32x128xf32>
    %c1_i32_62 = arith.constant 1 : i32
    %116 = vector.broadcast %c1_i32_62 : i32 to vector<32x128xi32>
    %117 = arith.cmpi sge, %48, %116 : vector<32x128xi32>
    %c1_i32_63 = arith.constant 1 : i32
    %118 = tpu.dynamic_rotate %114 by %c1_i32_63 dim 1 : vector<32x128xf32>, i32 -> vector<32x128xf32>
    %cst_64 = arith.constant 1.000000e+00 : f32
    %119 = vector.broadcast %cst_64 : f32 to vector<32x128xf32>
    %120 = arith.select %117, %118, %119 : vector<32x128xi1>, vector<32x128xf32>
    %c1_i32_65 = arith.constant 1 : i32
    %121 = vector.broadcast %c1_i32_65 : i32 to vector<32x128xi32>
    %122 = arith.cmpi sge, %48, %121 : vector<32x128xi32>
    %c1_i32_66 = arith.constant 1 : i32
    %123 = tpu.dynamic_rotate %115 by %c1_i32_66 dim 1 : vector<32x128xf32>, i32 -> vector<32x128xf32>
    %cst_67 = arith.constant 0.000000e+00 : f32
    %124 = vector.broadcast %cst_67 : f32 to vector<32x128xf32>
    %125 = arith.select %122, %123, %124 : vector<32x128xi1>, vector<32x128xf32>
    %126 = arith.mulf %114, %125 : vector<32x128xf32>
    %127 = arith.addf %126, %115 : vector<32x128xf32>
    %128 = arith.mulf %114, %120 : vector<32x128xf32>
    %c2_i32 = arith.constant 2 : i32
    %129 = vector.broadcast %c2_i32 : i32 to vector<32x128xi32>
    %130 = arith.cmpi sge, %48, %129 : vector<32x128xi32>
    %c2_i32_68 = arith.constant 2 : i32
    %131 = tpu.dynamic_rotate %128 by %c2_i32_68 dim 1 : vector<32x128xf32>, i32 -> vector<32x128xf32>
    %cst_69 = arith.constant 1.000000e+00 : f32
    %132 = vector.broadcast %cst_69 : f32 to vector<32x128xf32>
    %133 = arith.select %130, %131, %132 : vector<32x128xi1>, vector<32x128xf32>
    %c2_i32_70 = arith.constant 2 : i32
    %134 = vector.broadcast %c2_i32_70 : i32 to vector<32x128xi32>
    %135 = arith.cmpi sge, %48, %134 : vector<32x128xi32>
    %c2_i32_71 = arith.constant 2 : i32
    %136 = tpu.dynamic_rotate %127 by %c2_i32_71 dim 1 : vector<32x128xf32>, i32 -> vector<32x128xf32>
    %cst_72 = arith.constant 0.000000e+00 : f32
    %137 = vector.broadcast %cst_72 : f32 to vector<32x128xf32>
    %138 = arith.select %135, %136, %137 : vector<32x128xi1>, vector<32x128xf32>
    %139 = arith.mulf %128, %138 : vector<32x128xf32>
    %140 = arith.addf %139, %127 : vector<32x128xf32>
    %141 = arith.mulf %128, %133 : vector<32x128xf32>
    %c4_i32 = arith.constant 4 : i32
    %142 = vector.broadcast %c4_i32 : i32 to vector<32x128xi32>
    %143 = arith.cmpi sge, %48, %142 : vector<32x128xi32>
    %c4_i32_73 = arith.constant 4 : i32
    %144 = tpu.dynamic_rotate %141 by %c4_i32_73 dim 1 : vector<32x128xf32>, i32 -> vector<32x128xf32>
    %cst_74 = arith.constant 1.000000e+00 : f32
    %145 = vector.broadcast %cst_74 : f32 to vector<32x128xf32>
    %146 = arith.select %143, %144, %145 : vector<32x128xi1>, vector<32x128xf32>
    %c4_i32_75 = arith.constant 4 : i32
    %147 = vector.broadcast %c4_i32_75 : i32 to vector<32x128xi32>
    %148 = arith.cmpi sge, %48, %147 : vector<32x128xi32>
    %c4_i32_76 = arith.constant 4 : i32
    %149 = tpu.dynamic_rotate %140 by %c4_i32_76 dim 1 : vector<32x128xf32>, i32 -> vector<32x128xf32>
    %cst_77 = arith.constant 0.000000e+00 : f32
    %150 = vector.broadcast %cst_77 : f32 to vector<32x128xf32>
    %151 = arith.select %148, %149, %150 : vector<32x128xi1>, vector<32x128xf32>
    %152 = arith.mulf %141, %151 : vector<32x128xf32>
    %153 = arith.addf %152, %140 : vector<32x128xf32>
    %154 = arith.mulf %141, %146 : vector<32x128xf32>
    %c8_i32 = arith.constant 8 : i32
    %155 = vector.broadcast %c8_i32 : i32 to vector<32x128xi32>
    %156 = arith.cmpi sge, %48, %155 : vector<32x128xi32>
    %c8_i32_78 = arith.constant 8 : i32
    %157 = tpu.dynamic_rotate %154 by %c8_i32_78 dim 1 : vector<32x128xf32>, i32 -> vector<32x128xf32>
    %cst_79 = arith.constant 1.000000e+00 : f32
    %158 = vector.broadcast %cst_79 : f32 to vector<32x128xf32>
    %159 = arith.select %156, %157, %158 : vector<32x128xi1>, vector<32x128xf32>
    %c8_i32_80 = arith.constant 8 : i32
    %160 = vector.broadcast %c8_i32_80 : i32 to vector<32x128xi32>
    %161 = arith.cmpi sge, %48, %160 : vector<32x128xi32>
    %c8_i32_81 = arith.constant 8 : i32
    %162 = tpu.dynamic_rotate %153 by %c8_i32_81 dim 1 : vector<32x128xf32>, i32 -> vector<32x128xf32>
    %cst_82 = arith.constant 0.000000e+00 : f32
    %163 = vector.broadcast %cst_82 : f32 to vector<32x128xf32>
    %164 = arith.select %161, %162, %163 : vector<32x128xi1>, vector<32x128xf32>
    %165 = arith.mulf %154, %164 : vector<32x128xf32>
    %166 = arith.addf %165, %153 : vector<32x128xf32>
    %167 = arith.mulf %154, %159 : vector<32x128xf32>
    %c16_i32 = arith.constant 16 : i32
    %168 = vector.broadcast %c16_i32 : i32 to vector<32x128xi32>
    %169 = arith.cmpi sge, %48, %168 : vector<32x128xi32>
    %c16_i32_83 = arith.constant 16 : i32
    %170 = tpu.dynamic_rotate %167 by %c16_i32_83 dim 1 : vector<32x128xf32>, i32 -> vector<32x128xf32>
    %cst_84 = arith.constant 1.000000e+00 : f32
    %171 = vector.broadcast %cst_84 : f32 to vector<32x128xf32>
    %172 = arith.select %169, %170, %171 : vector<32x128xi1>, vector<32x128xf32>
    %c16_i32_85 = arith.constant 16 : i32
    %173 = vector.broadcast %c16_i32_85 : i32 to vector<32x128xi32>
    %174 = arith.cmpi sge, %48, %173 : vector<32x128xi32>
    %c16_i32_86 = arith.constant 16 : i32
    %175 = tpu.dynamic_rotate %166 by %c16_i32_86 dim 1 : vector<32x128xf32>, i32 -> vector<32x128xf32>
    %cst_87 = arith.constant 0.000000e+00 : f32
    %176 = vector.broadcast %cst_87 : f32 to vector<32x128xf32>
    %177 = arith.select %174, %175, %176 : vector<32x128xi1>, vector<32x128xf32>
    %178 = arith.mulf %167, %177 : vector<32x128xf32>
    %179 = arith.addf %178, %166 : vector<32x128xf32>
    %180 = arith.mulf %167, %172 : vector<32x128xf32>
    %c32_i32 = arith.constant 32 : i32
    %181 = vector.broadcast %c32_i32 : i32 to vector<32x128xi32>
    %182 = arith.cmpi sge, %48, %181 : vector<32x128xi32>
    %c32_i32_88 = arith.constant 32 : i32
    %183 = tpu.dynamic_rotate %180 by %c32_i32_88 dim 1 : vector<32x128xf32>, i32 -> vector<32x128xf32>
    %cst_89 = arith.constant 1.000000e+00 : f32
    %184 = vector.broadcast %cst_89 : f32 to vector<32x128xf32>
    %185 = arith.select %182, %183, %184 : vector<32x128xi1>, vector<32x128xf32>
    %c32_i32_90 = arith.constant 32 : i32
    %186 = vector.broadcast %c32_i32_90 : i32 to vector<32x128xi32>
    %187 = arith.cmpi sge, %48, %186 : vector<32x128xi32>
    %c32_i32_91 = arith.constant 32 : i32
    %188 = tpu.dynamic_rotate %179 by %c32_i32_91 dim 1 : vector<32x128xf32>, i32 -> vector<32x128xf32>
    %cst_92 = arith.constant 0.000000e+00 : f32
    %189 = vector.broadcast %cst_92 : f32 to vector<32x128xf32>
    %190 = arith.select %187, %188, %189 : vector<32x128xi1>, vector<32x128xf32>
    %191 = arith.mulf %180, %190 : vector<32x128xf32>
    %192 = arith.addf %191, %179 : vector<32x128xf32>
    %193 = arith.mulf %180, %185 : vector<32x128xf32>
    %c64_i32 = arith.constant 64 : i32
    %194 = vector.broadcast %c64_i32 : i32 to vector<32x128xi32>
    %195 = arith.cmpi sge, %48, %194 : vector<32x128xi32>
    %c64_i32_93 = arith.constant 64 : i32
    %196 = tpu.dynamic_rotate %192 by %c64_i32_93 dim 1 : vector<32x128xf32>, i32 -> vector<32x128xf32>
    %cst_94 = arith.constant 0.000000e+00 : f32
    %197 = vector.broadcast %cst_94 : f32 to vector<32x128xf32>
    %198 = arith.select %195, %196, %197 : vector<32x128xi1>, vector<32x128xf32>
    %199 = arith.mulf %193, %198 : vector<32x128xf32>
    %200 = arith.addf %199, %192 : vector<32x128xf32>
    %201 = arith.negf %47 : vector<32x128xf32>
    %202 = math.exp %201 : vector<32x128xf32>
    %cst_95 = arith.constant 1.000000e+00 : f32
    %203 = vector.broadcast %cst_95 : f32 to vector<32x128xf32>
    %204 = arith.addf %203, %202 : vector<32x128xf32>
    %205 = arith.divf %203, %204 : vector<32x128xf32>
    %206 = arith.mulf %47, %205 : vector<32x128xf32>
    %207 = arith.mulf %200, %206 : vector<32x128xf32>
    %c0_96 = arith.constant 0 : index
    %c0_97 = arith.constant 0 : index
    %208 = vector.load %arg13[%c0_96, %c0_97] : memref<32x32xbf16, #tpu.memory_space<vmem>>, vector<32x32xbf16>
    %209 = arith.truncf %207 : vector<32x128xf32> to vector<32x128xbf16>
    %cst_98 = arith.constant dense<0.000000e+00> : vector<32x128xf32>
    %210 = tpu.matmul %208, %209, %cst_98 {dimension_numbers = #tpu.dot_dimension_numbers<[1], [0], [0], [1], [0, 0, 1, 1], [], []>} : vector<32x32xbf16>, vector<32x128xbf16>, vector<32x128xf32> -> vector<32x128xf32>
    %c0_99 = arith.constant 0 : index
    %c0_100 = arith.constant 0 : index
    %211 = vector.load %arg14[%c0_99, %c0_100] : memref<32x1xf32, #tpu.memory_space<vmem>>, vector<32x1xf32>
    %212 = vector.broadcast %211 : vector<32x1xf32> to vector<32x128xf32>
    %213 = arith.addf %210, %212 : vector<32x128xf32>
    %c0_101 = arith.constant 0 : index
    %c0_102 = arith.constant 0 : index
    %c0_103 = arith.constant 0 : index
    %214 = vector.load %arg23[%c0_101, %c0_102, %c0_103] : memref<1x32x1xf32, #tpu.memory_space<vmem>>, vector<1x32x1xf32>
    %215 = vector.shape_cast %214 : vector<1x32x1xf32> to vector<32x1xf32>
    %cst_104 = arith.constant 1.000000e+00 : f32
    %216 = vector.broadcast %cst_104 : f32 to vector<32x1xf32>
    %217 = arith.addf %216, %215 : vector<32x1xf32>
    %218 = vector.broadcast %217 : vector<32x1xf32> to vector<32x128xf32>
    %219 = arith.mulf %213, %218 : vector<32x128xf32>
    %c0_105 = arith.constant 0 : index
    %c0_106 = arith.constant 0 : index
    %c0_107 = arith.constant 0 : index
    %220 = vector.load %arg24[%c0_105, %c0_106, %c0_107] : memref<1x32x1xf32, #tpu.memory_space<vmem>>, vector<1x32x1xf32>
    %221 = vector.shape_cast %220 : vector<1x32x1xf32> to vector<32x1xf32>
    %222 = vector.broadcast %221 : vector<32x1xf32> to vector<32x128xf32>
    %223 = arith.addf %219, %222 : vector<32x128xf32>
    %224 = vector.extract_strided_slice %223 {offsets = [0, 0], sizes = [16, 128], strides = [1, 1]} : vector<32x128xf32> to vector<16x128xf32>
    %225 = arith.addf %1, %224 : vector<16x128xf32>
    %c0_108 = arith.constant 0 : index
    %c0_109 = arith.constant 0 : index
    %c0_110 = arith.constant 0 : index
    %226 = vector.load %arg25[%c0_108, %c0_109, %c0_110] : memref<1x16x128xf32, #tpu.memory_space<vmem>>, vector<1x16x128xf32>
    %227 = vector.shape_cast %226 : vector<1x16x128xf32> to vector<16x128xf32>
    %228 = vector.shape_cast %225 : vector<16x128xf32> to vector<1x16x128xf32>
    tpu.vector_store %arg25[%c0_108, %c0_109, %c0_110], %228 {strides = array<i32>} : memref<1x16x128xf32, #tpu.memory_space<vmem>>, vector<1x16x128xf32>,
    %c0_111 = arith.constant 0 : index
    %c0_112 = arith.constant 0 : index
    %c0_113 = arith.constant 0 : index
    %229 = vector.load %arg3[%c0_111, %c0_112, %c0_113] : memref<1x16x128xf32, #tpu.memory_space<vmem>>, vector<1x16x128xf32>
    %230 = vector.shape_cast %229 : vector<1x16x128xf32> to vector<16x128xf32>
    %231 = vector.extract_strided_slice %223 {offsets = [16, 0], sizes = [16, 128], strides = [1, 1]} : vector<32x128xf32> to vector<16x128xf32>
    %232 = arith.addf %230, %231 : vector<16x128xf32>
    %c0_114 = arith.constant 0 : index
    %c0_115 = arith.constant 0 : index
    %c0_116 = arith.constant 0 : index
    %233 = vector.load %arg26[%c0_114, %c0_115, %c0_116] : memref<1x16x128xf32, #tpu.memory_space<vmem>>, vector<1x16x128xf32>
    %234 = vector.shape_cast %233 : vector<1x16x128xf32> to vector<16x128xf32>
    %235 = vector.shape_cast %232 : vector<16x128xf32> to vector<1x16x128xf32>
    tpu.vector_store %arg26[%c0_114, %c0_115, %c0_116], %235 {strides = array<i32>} : memref<1x16x128xf32, #tpu.memory_space<vmem>>, vector<1x16x128xf32>,
    return
  }
  func.func @transform_0(%arg0: i32) -> (i32, i32, i32) {
    %c0_i32 = arith.constant 0 : i32
    %c0_i32_0 = arith.constant 0 : i32
    %c0_i32_1 = arith.constant 0 : i32
    return %arg0, %c0_i32, %c0_i32_0 : i32, i32, i32
  }
  func.func @transform_1(%arg0: i32) -> (i32, i32, i32) {
    %c0_i32 = arith.constant 0 : i32
    %c0_i32_0 = arith.constant 0 : i32
    %c0_i32_1 = arith.constant 0 : i32
    return %arg0, %c0_i32, %c0_i32_0 : i32, i32, i32
  }
  func.func @transform_2(%arg0: i32) -> (i32, i32, i32) {
    %c0_i32 = arith.constant 0 : i32
    %c0_i32_0 = arith.constant 0 : i32
    %c0_i32_1 = arith.constant 0 : i32
    return %arg0, %c0_i32, %c0_i32_0 : i32, i32, i32
  }
  func.func @transform_3(%arg0: i32) -> (i32, i32) {
    %c0_i32 = arith.constant 0 : i32
    %c0_i32_0 = arith.constant 0 : i32
    %c0_i32_1 = arith.constant 0 : i32
    return %c0_i32, %c0_i32_0 : i32, i32
  }
  func.func @transform_4(%arg0: i32) -> (i32, i32) {
    %c0_i32 = arith.constant 0 : i32
    %c0_i32_0 = arith.constant 0 : i32
    %c0_i32_1 = arith.constant 0 : i32
    return %c0_i32, %c0_i32_0 : i32, i32
  }
  func.func @transform_5(%arg0: i32) -> (i32, i32) {
    %c0_i32 = arith.constant 0 : i32
    %c0_i32_0 = arith.constant 0 : i32
    %c0_i32_1 = arith.constant 0 : i32
    return %c0_i32, %c0_i32_0 : i32, i32
  }
  func.func @transform_6(%arg0: i32) -> (i32, i32) {
    %c0_i32 = arith.constant 0 : i32
    %c0_i32_0 = arith.constant 0 : i32
    %c0_i32_1 = arith.constant 0 : i32
    return %c0_i32, %c0_i32_0 : i32, i32
  }
  func.func @transform_7(%arg0: i32) -> (i32, i32) {
    %c0_i32 = arith.constant 0 : i32
    %c0_i32_0 = arith.constant 0 : i32
    %c0_i32_1 = arith.constant 0 : i32
    return %c0_i32, %c0_i32_0 : i32, i32
  }
  func.func @transform_8(%arg0: i32) -> (i32, i32) {
    %c0_i32 = arith.constant 0 : i32
    %c0_i32_0 = arith.constant 0 : i32
    %c0_i32_1 = arith.constant 0 : i32
    return %c0_i32, %c0_i32_0 : i32, i32
  }
  func.func @transform_9(%arg0: i32) -> (i32, i32) {
    %c0_i32 = arith.constant 0 : i32
    %c0_i32_0 = arith.constant 0 : i32
    %c0_i32_1 = arith.constant 0 : i32
    return %c0_i32, %c0_i32_0 : i32, i32
  }
  func.func @transform_10(%arg0: i32) -> (i32, i32) {
    %c0_i32 = arith.constant 0 : i32
    %c0_i32_0 = arith.constant 0 : i32
    %c0_i32_1 = arith.constant 0 : i32
    return %c0_i32, %c0_i32_0 : i32, i32
  }
  func.func @transform_11(%arg0: i32) -> (i32, i32) {
    %c0_i32 = arith.constant 0 : i32
    %c0_i32_0 = arith.constant 0 : i32
    %c0_i32_1 = arith.constant 0 : i32
    return %c0_i32, %c0_i32_0 : i32, i32
  }
  func.func @transform_12(%arg0: i32) -> (i32, i32) {
    %c0_i32 = arith.constant 0 : i32
    %c0_i32_0 = arith.constant 0 : i32
    %c0_i32_1 = arith.constant 0 : i32
    return %c0_i32, %c0_i32_0 : i32, i32
  }
  func.func @transform_13(%arg0: i32) -> (i32, i32) {
    %c0_i32 = arith.constant 0 : i32
    %c0_i32_0 = arith.constant 0 : i32
    %c0_i32_1 = arith.constant 0 : i32
    return %c0_i32, %c0_i32_0 : i32, i32
  }
  func.func @transform_14(%arg0: i32) -> (i32, i32, i32) {
    %c0_i32 = arith.constant 0 : i32
    %c0_i32_0 = arith.constant 0 : i32
    %c0_i32_1 = arith.constant 0 : i32
    return %arg0, %c0_i32, %c0_i32_0 : i32, i32, i32
  }
  func.func @transform_15(%arg0: i32) -> (i32, i32, i32) {
    %c0_i32 = arith.constant 0 : i32
    %c0_i32_0 = arith.constant 0 : i32
    %c0_i32_1 = arith.constant 0 : i32
    return %arg0, %c0_i32, %c0_i32_0 : i32, i32, i32
  }
  func.func @transform_16(%arg0: i32) -> (i32, i32, i32) {
    %c0_i32 = arith.constant 0 : i32
    %c0_i32_0 = arith.constant 0 : i32
    %c0_i32_1 = arith.constant 0 : i32
    return %arg0, %c0_i32, %c0_i32_0 : i32, i32, i32
  }
  func.func @transform_17(%arg0: i32) -> (i32, i32, i32) {
    %c0_i32 = arith.constant 0 : i32
    %c0_i32_0 = arith.constant 0 : i32
    %c0_i32_1 = arith.constant 0 : i32
    return %arg0, %c0_i32, %c0_i32_0 : i32, i32, i32
  }
  func.func @transform_18(%arg0: i32) -> (i32, i32, i32) {
    %c0_i32 = arith.constant 0 : i32
    %c0_i32_0 = arith.constant 0 : i32
    %c0_i32_1 = arith.constant 0 : i32
    return %arg0, %c0_i32, %c0_i32_0 : i32, i32, i32
  }
  func.func @transform_19(%arg0: i32) -> (i32, i32, i32) {
    %c0_i32 = arith.constant 0 : i32
    %c0_i32_0 = arith.constant 0 : i32
    %c0_i32_1 = arith.constant 0 : i32
    return %arg0, %c0_i32, %c0_i32_0 : i32, i32, i32
  }
  func.func @transform_20(%arg0: i32) -> (i32, i32, i32) {
    %c0_i32 = arith.constant 0 : i32
    %c0_i32_0 = arith.constant 0 : i32
    %c0_i32_1 = arith.constant 0 : i32
    return %arg0, %c0_i32, %c0_i32_0 : i32, i32, i32
  }
  func.func @transform_21(%arg0: i32) -> (i32, i32, i32) {
    %c0_i32 = arith.constant 0 : i32
    %c0_i32_0 = arith.constant 0 : i32
    %c0_i32_1 = arith.constant 0 : i32
    return %arg0, %c0_i32, %c0_i32_0 : i32, i32, i32
  }
  func.func @transform_22(%arg0: i32) -> (i32, i32, i32) {
    %c0_i32 = arith.constant 0 : i32
    %c0_i32_0 = arith.constant 0 : i32
    %c0_i32_1 = arith.constant 0 : i32
    return %arg0, %c0_i32, %c0_i32_0 : i32, i32, i32
  }
  func.func @transform_23(%arg0: i32) -> (i32, i32, i32) {
    %c0_i32 = arith.constant 0 : i32
    %c0_i32_0 = arith.constant 0 : i32
    %c0_i32_1 = arith.constant 0 : i32
    return %arg0, %c0_i32, %c0_i32_0 : i32, i32, i32
  }
  func.func @transform_24(%arg0: i32) -> (i32, i32, i32) {
    %c0_i32 = arith.constant 0 : i32
    %c0_i32_0 = arith.constant 0 : i32
    %c0_i32_1 = arith.constant 0 : i32
    return %arg0, %c0_i32, %c0_i32_0 : i32, i32, i32
  }
  func.func @transform_25(%arg0: i32) -> (i32, i32, i32) {
    %c0_i32 = arith.constant 0 : i32
    %c0_i32_0 = arith.constant 0 : i32
    %c0_i32_1 = arith.constant 0 : i32
    return %arg0, %c0_i32, %c0_i32_0 : i32, i32, i32
  }
}

module attributes {stable_mosaic.version = 11 : i64} {
  func.func @_layer_kernel(%arg0: i32, %arg1: memref<1x16x128xf32, #tpu.memory_space<vmem>>, %arg2: memref<1x4x128xf32, #tpu.memory_space<vmem>>, %arg3: memref<1x16x128xf32, #tpu.memory_space<vmem>>, %arg4: memref<64x16xbf16, #tpu.memory_space<vmem>>, %arg5: memref<64x4xbf16, #tpu.memory_space<vmem>>, %arg6: memref<64x1xf32, #tpu.memory_space<vmem>>, %arg7: memref<64x64xbf16, #tpu.memory_space<vmem>>, %arg8: memref<64x1xf32, #tpu.memory_space<vmem>>, %arg9: memref<32x3xf32, #tpu.memory_space<vmem>>, %arg10: memref<32x1xf32, #tpu.memory_space<vmem>>, %arg11: memref<64x32xbf16, #tpu.memory_space<vmem>>, %arg12: memref<64x1xf32, #tpu.memory_space<vmem>>, %arg13: memref<32x32xbf16, #tpu.memory_space<vmem>>, %arg14: memref<32x1xf32, #tpu.memory_space<vmem>>, %arg15: memref<1x64x1xf32, #tpu.memory_space<vmem>>, %arg16: memref<1x64x1xf32, #tpu.memory_space<vmem>>, %arg17: memref<1x64x1xf32, #tpu.memory_space<vmem>>, %arg18: memref<1x64x1xf32, #tpu.memory_space<vmem>>, %arg19: memref<1x32x1xf32, #tpu.memory_space<vmem>>, %arg20: memref<1x32x1xf32, #tpu.memory_space<vmem>>, %arg21: memref<1x64x1xf32, #tpu.memory_space<vmem>>, %arg22: memref<1x64x1xf32, #tpu.memory_space<vmem>>, %arg23: memref<1x32x1xf32, #tpu.memory_space<vmem>>, %arg24: memref<1x32x1xf32, #tpu.memory_space<vmem>>, %arg25: memref<1x16x128xf32, #tpu.memory_space<vmem>>, %arg26: memref<1x16x128xf32, #tpu.memory_space<vmem>>) attributes {dimension_semantics = [#tpu.dimension_semantics<parallel>], iteration_bounds = array<i64: 2>, scalar_prefetch = 0 : i64, scratch_operands = 0 : i64, tpu.core_type = #tpu.core_type<tc>, window_params = [{transform_indices = @transform_0, window_bounds = array<i64: 1, 16, 128>}, {transform_indices = @transform_1, window_bounds = array<i64: 1, 4, 128>}, {transform_indices = @transform_2, window_bounds = array<i64: 1, 16, 128>}, {pipeline_mode = #tpu.pipeline_mode<synchronous>, transform_indices = @transform_3, window_bounds = array<i64: 64, 16>}, {pipeline_mode = #tpu.pipeline_mode<synchronous>, transform_indices = @transform_4, window_bounds = array<i64: 64, 4>}, {pipeline_mode = #tpu.pipeline_mode<synchronous>, transform_indices = @transform_5, window_bounds = array<i64: 64, 1>}, {pipeline_mode = #tpu.pipeline_mode<synchronous>, transform_indices = @transform_6, window_bounds = array<i64: 64, 64>}, {pipeline_mode = #tpu.pipeline_mode<synchronous>, transform_indices = @transform_7, window_bounds = array<i64: 64, 1>}, {pipeline_mode = #tpu.pipeline_mode<synchronous>, transform_indices = @transform_8, window_bounds = array<i64: 32, 3>}, {pipeline_mode = #tpu.pipeline_mode<synchronous>, transform_indices = @transform_9, window_bounds = array<i64: 32, 1>}, {pipeline_mode = #tpu.pipeline_mode<synchronous>, transform_indices = @transform_10, window_bounds = array<i64: 64, 32>}, {pipeline_mode = #tpu.pipeline_mode<synchronous>, transform_indices = @transform_11, window_bounds = array<i64: 64, 1>}, {pipeline_mode = #tpu.pipeline_mode<synchronous>, transform_indices = @transform_12, window_bounds = array<i64: 32, 32>}, {pipeline_mode = #tpu.pipeline_mode<synchronous>, transform_indices = @transform_13, window_bounds = array<i64: 32, 1>}, {transform_indices = @transform_14, window_bounds = array<i64: 1, 64, 1>}, {transform_indices = @transform_15, window_bounds = array<i64: 1, 64, 1>}, {transform_indices = @transform_16, window_bounds = array<i64: 1, 64, 1>}, {transform_indices = @transform_17, window_bounds = array<i64: 1, 64, 1>}, {transform_indices = @transform_18, window_bounds = array<i64: 1, 32, 1>}, {transform_indices = @transform_19, window_bounds = array<i64: 1, 32, 1>}, {transform_indices = @transform_20, window_bounds = array<i64: 1, 64, 1>}, {transform_indices = @transform_21, window_bounds = array<i64: 1, 64, 1>}, {transform_indices = @transform_22, window_bounds = array<i64: 1, 32, 1>}, {transform_indices = @transform_23, window_bounds = array<i64: 1, 32, 1>}, {transform_indices = @transform_24, window_bounds = array<i64: 1, 16, 128>}, {transform_indices = @transform_25, window_bounds = array<i64: 1, 16, 128>}]} {
    %c0 = arith.constant 0 : index
    %c0_0 = arith.constant 0 : index
    %c0_1 = arith.constant 0 : index
    %0 = vector.load %arg1[%c0, %c0_0, %c0_1] : memref<1x16x128xf32, #tpu.memory_space<vmem>>, vector<1x16x128xf32>
    %1 = vector.shape_cast %0 : vector<1x16x128xf32> to vector<16x128xf32>
    %c0_2 = arith.constant 0 : index
    %c0_3 = arith.constant 0 : index
    %c0_4 = arith.constant 0 : index
    %2 = vector.load %arg2[%c0_2, %c0_3, %c0_4] : memref<1x4x128xf32, #tpu.memory_space<vmem>>, vector<1x4x128xf32>
    %3 = vector.shape_cast %2 : vector<1x4x128xf32> to vector<4x128xf32>
    %c0_5 = arith.constant 0 : index
    %c0_6 = arith.constant 0 : index
    %4 = vector.load %arg4[%c0_5, %c0_6] : memref<64x16xbf16, #tpu.memory_space<vmem>>, vector<64x16xbf16>
    %5 = arith.truncf %1 : vector<16x128xf32> to vector<16x128xbf16>
    %cst = arith.constant dense<0.000000e+00> : vector<64x128xf32>
    %6 = tpu.matmul %4, %5, %cst {dimension_numbers = #tpu.dot_dimension_numbers<[1], [0], [0], [1], [0, 0, 1, 1], [], []>} : vector<64x16xbf16>, vector<16x128xbf16>, vector<64x128xf32> -> vector<64x128xf32>
    %c0_7 = arith.constant 0 : index
    %c0_8 = arith.constant 0 : index
    %7 = vector.load %arg5[%c0_7, %c0_8] : memref<64x4xbf16, #tpu.memory_space<vmem>>, vector<64x4xbf16>
    %8 = arith.truncf %3 : vector<4x128xf32> to vector<4x128xbf16>
    %cst_9 = arith.constant dense<0.000000e+00> : vector<64x128xf32>
    %9 = tpu.matmul %7, %8, %cst_9 {dimension_numbers = #tpu.dot_dimension_numbers<[1], [0], [0], [1], [0, 0, 1, 1], [], []>} : vector<64x4xbf16>, vector<4x128xbf16>, vector<64x128xf32> -> vector<64x128xf32>
    %10 = arith.addf %6, %9 : vector<64x128xf32>
    %c0_10 = arith.constant 0 : index
    %c0_11 = arith.constant 0 : index
    %11 = vector.load %arg6[%c0_10, %c0_11] : memref<64x1xf32, #tpu.memory_space<vmem>>, vector<64x1xf32>
    %12 = vector.broadcast %11 : vector<64x1xf32> to vector<64x128xf32>
    %13 = arith.addf %10, %12 : vector<64x128xf32>
    %c0_12 = arith.constant 0 : index
    %c0_13 = arith.constant 0 : index
    %c0_14 = arith.constant 0 : index
    %14 = vector.load %arg15[%c0_12, %c0_13, %c0_14] : memref<1x64x1xf32, #tpu.memory_space<vmem>>, vector<1x64x1xf32>
    %15 = vector.shape_cast %14 : vector<1x64x1xf32> to vector<64x1xf32>
    %cst_15 = arith.constant 1.000000e+00 : f32
    %16 = vector.broadcast %cst_15 : f32 to vector<64x1xf32>
    %17 = arith.addf %16, %15 : vector<64x1xf32>
    %18 = vector.broadcast %17 : vector<64x1xf32> to vector<64x128xf32>
    %19 = arith.mulf %13, %18 : vector<64x128xf32>
    %c0_16 = arith.constant 0 : index
    %c0_17 = arith.constant 0 : index
    %c0_18 = arith.constant 0 : index
    %20 = vector.load %arg16[%c0_16, %c0_17, %c0_18] : memref<1x64x1xf32, #tpu.memory_space<vmem>>, vector<1x64x1xf32>
    %21 = vector.shape_cast %20 : vector<1x64x1xf32> to vector<64x1xf32>
    %22 = vector.broadcast %21 : vector<64x1xf32> to vector<64x128xf32>
    %23 = arith.addf %19, %22 : vector<64x128xf32>
    %24 = arith.negf %23 : vector<64x128xf32>
    %25 = math.exp %24 : vector<64x128xf32>
    %cst_19 = arith.constant 1.000000e+00 : f32
    %26 = vector.broadcast %cst_19 : f32 to vector<64x128xf32>
    %27 = arith.addf %26, %25 : vector<64x128xf32>
    %28 = arith.divf %26, %27 : vector<64x128xf32>
    %29 = arith.mulf %23, %28 : vector<64x128xf32>
    %c0_20 = arith.constant 0 : index
    %c0_21 = arith.constant 0 : index
    %30 = vector.load %arg7[%c0_20, %c0_21] : memref<64x64xbf16, #tpu.memory_space<vmem>>, vector<64x64xbf16>
    %31 = arith.truncf %29 : vector<64x128xf32> to vector<64x128xbf16>
    %cst_22 = arith.constant dense<0.000000e+00> : vector<64x128xf32>
    %32 = tpu.matmul %30, %31, %cst_22 {dimension_numbers = #tpu.dot_dimension_numbers<[1], [0], [0], [1], [0, 0, 1, 1], [], []>} : vector<64x64xbf16>, vector<64x128xbf16>, vector<64x128xf32> -> vector<64x128xf32>
    %c0_23 = arith.constant 0 : index
    %c0_24 = arith.constant 0 : index
    %33 = vector.load %arg8[%c0_23, %c0_24] : memref<64x1xf32, #tpu.memory_space<vmem>>, vector<64x1xf32>
    %34 = vector.broadcast %33 : vector<64x1xf32> to vector<64x128xf32>
    %35 = arith.addf %32, %34 : vector<64x128xf32>
    %c0_25 = arith.constant 0 : index
    %c0_26 = arith.constant 0 : index
    %c0_27 = arith.constant 0 : index
    %36 = vector.load %arg17[%c0_25, %c0_26, %c0_27] : memref<1x64x1xf32, #tpu.memory_space<vmem>>, vector<1x64x1xf32>
    %37 = vector.shape_cast %36 : vector<1x64x1xf32> to vector<64x1xf32>
    %cst_28 = arith.constant 1.000000e+00 : f32
    %38 = vector.broadcast %cst_28 : f32 to vector<64x1xf32>
    %39 = arith.addf %38, %37 : vector<64x1xf32>
    %40 = vector.broadcast %39 : vector<64x1xf32> to vector<64x128xf32>
    %41 = arith.mulf %35, %40 : vector<64x128xf32>
    %c0_29 = arith.constant 0 : index
    %c0_30 = arith.constant 0 : index
    %c0_31 = arith.constant 0 : index
    %42 = vector.load %arg18[%c0_29, %c0_30, %c0_31] : memref<1x64x1xf32, #tpu.memory_space<vmem>>, vector<1x64x1xf32>
    %43 = vector.shape_cast %42 : vector<1x64x1xf32> to vector<64x1xf32>
    %44 = vector.broadcast %43 : vector<64x1xf32> to vector<64x128xf32>
    %45 = arith.addf %41, %44 : vector<64x128xf32>
    %46 = vector.extract_strided_slice %45 {offsets = [0, 0], sizes = [32, 128], strides = [1, 1]} : vector<64x128xf32> to vector<32x128xf32>
    %47 = vector.extract_strided_slice %45 {offsets = [32, 0], sizes = [32, 128], strides = [1, 1]} : vector<64x128xf32> to vector<32x128xf32>
    %48 = tpu.iota {dimensions = array<i32: 1>} : vector<32x128xi32>
    %c1_i32 = arith.constant 1 : i32
    %49 = vector.broadcast %c1_i32 : i32 to vector<32x128xi32>
    %50 = arith.cmpi sge, %48, %49 : vector<32x128xi32>
    %c1_i32_32 = arith.constant 1 : i32
    %51 = tpu.dynamic_rotate %46 by %c1_i32_32 dim 1 : vector<32x128xf32>, i32 -> vector<32x128xf32>
    %cst_33 = arith.constant 0.000000e+00 : f32
    %52 = vector.broadcast %cst_33 : f32 to vector<32x128xf32>
    %53 = arith.select %50, %51, %52 : vector<32x128xi1>, vector<32x128xf32>
    %c127_i32 = arith.constant 127 : i32
    %54 = vector.broadcast %c127_i32 : i32 to vector<32x128xi32>
    %55 = arith.cmpi slt, %48, %54 : vector<32x128xi32>
    %c127_i32_34 = arith.constant 127 : i32
    %56 = tpu.dynamic_rotate %46 by %c127_i32_34 dim 1 : vector<32x128xf32>, i32 -> vector<32x128xf32>
    %cst_35 = arith.constant 0.000000e+00 : f32
    %57 = vector.broadcast %cst_35 : f32 to vector<32x128xf32>
    %58 = arith.select %55, %56, %57 : vector<32x128xi1>, vector<32x128xf32>
    %c0_36 = arith.constant 0 : index
    %c0_37 = arith.constant 0 : index
    %59 = vector.load %arg9[%c0_36, %c0_37] : memref<32x3xf32, #tpu.memory_space<vmem>>, vector<32x3xf32>
    %60 = vector.extract_strided_slice %59 {offsets = [0, 0], sizes = [32, 1], strides = [1, 1]} : vector<32x3xf32> to vector<32x1xf32>
    %61 = vector.broadcast %60 : vector<32x1xf32> to vector<32x128xf32>
    %62 = arith.mulf %61, %53 : vector<32x128xf32>
    %63 = vector.extract_strided_slice %59 {offsets = [0, 1], sizes = [32, 1], strides = [1, 1]} : vector<32x3xf32> to vector<32x1xf32>
    %64 = vector.broadcast %63 : vector<32x1xf32> to vector<32x128xf32>
    %65 = arith.mulf %64, %46 : vector<32x128xf32>
    %66 = arith.addf %62, %65 : vector<32x128xf32>
    %67 = vector.extract_strided_slice %59 {offsets = [0, 2], sizes = [32, 1], strides = [1, 1]} : vector<32x3xf32> to vector<32x1xf32>
    %68 = vector.broadcast %67 : vector<32x1xf32> to vector<32x128xf32>
    %69 = arith.mulf %68, %58 : vector<32x128xf32>
    %70 = arith.addf %66, %69 : vector<32x128xf32>
    %c0_38 = arith.constant 0 : index
    %c0_39 = arith.constant 0 : index
    %71 = vector.load %arg10[%c0_38, %c0_39] : memref<32x1xf32, #tpu.memory_space<vmem>>, vector<32x1xf32>
    %72 = vector.broadcast %71 : vector<32x1xf32> to vector<32x128xf32>
    %73 = arith.addf %70, %72 : vector<32x128xf32>
    %c0_40 = arith.constant 0 : index
    %c0_41 = arith.constant 0 : index
    %c0_42 = arith.constant 0 : index
    %74 = vector.load %arg19[%c0_40, %c0_41, %c0_42] : memref<1x32x1xf32, #tpu.memory_space<vmem>>, vector<1x32x1xf32>
    %75 = vector.shape_cast %74 : vector<1x32x1xf32> to vector<32x1xf32>
    %cst_43 = arith.constant 1.000000e+00 : f32
    %76 = vector.broadcast %cst_43 : f32 to vector<32x1xf32>
    %77 = arith.addf %76, %75 : vector<32x1xf32>
    %78 = vector.broadcast %77 : vector<32x1xf32> to vector<32x128xf32>
    %79 = arith.mulf %73, %78 : vector<32x128xf32>
    %c0_44 = arith.constant 0 : index
    %c0_45 = arith.constant 0 : index
    %c0_46 = arith.constant 0 : index
    %80 = vector.load %arg20[%c0_44, %c0_45, %c0_46] : memref<1x32x1xf32, #tpu.memory_space<vmem>>, vector<1x32x1xf32>
    %81 = vector.shape_cast %80 : vector<1x32x1xf32> to vector<32x1xf32>
    %82 = vector.broadcast %81 : vector<32x1xf32> to vector<32x128xf32>
    %83 = arith.addf %79, %82 : vector<32x128xf32>
    %84 = arith.negf %83 : vector<32x128xf32>
    %85 = math.exp %84 : vector<32x128xf32>
    %cst_47 = arith.constant 1.000000e+00 : f32
    %86 = vector.broadcast %cst_47 : f32 to vector<32x128xf32>
    %87 = arith.addf %86, %85 : vector<32x128xf32>
    %88 = arith.divf %86, %87 : vector<32x128xf32>
    %89 = arith.mulf %83, %88 : vector<32x128xf32>
    %c0_48 = arith.constant 0 : index
    %c0_49 = arith.constant 0 : index
    %90 = vector.load %arg11[%c0_48, %c0_49] : memref<64x32xbf16, #tpu.memory_space<vmem>>, vector<64x32xbf16>
    %91 = arith.truncf %89 : vector<32x128xf32> to vector<32x128xbf16>
    %cst_50 = arith.constant dense<0.000000e+00> : vector<64x128xf32>
    %92 = tpu.matmul %90, %91, %cst_50 {dimension_numbers = #tpu.dot_dimension_numbers<[1], [0], [0], [1], [0, 0, 1, 1], [], []>} : vector<64x32xbf16>, vector<32x128xbf16>, vector<64x128xf32> -> vector<64x128xf32>
    %c0_51 = arith.constant 0 : index
    %c0_52 = arith.constant 0 : index
    %93 = vector.load %arg12[%c0_51, %c0_52] : memref<64x1xf32, #tpu.memory_space<vmem>>, vector<64x1xf32>
    %94 = vector.broadcast %93 : vector<64x1xf32> to vector<64x128xf32>
    %95 = arith.addf %92, %94 : vector<64x128xf32>
    %c0_53 = arith.constant 0 : index
    %c0_54 = arith.constant 0 : index
    %c0_55 = arith.constant 0 : index
    %96 = vector.load %arg21[%c0_53, %c0_54, %c0_55] : memref<1x64x1xf32, #tpu.memory_space<vmem>>, vector<1x64x1xf32>
    %97 = vector.shape_cast %96 : vector<1x64x1xf32> to vector<64x1xf32>
    %cst_56 = arith.constant 1.000000e+00 : f32
    %98 = vector.broadcast %cst_56 : f32 to vector<64x1xf32>
    %99 = arith.addf %98, %97 : vector<64x1xf32>
    %100 = vector.broadcast %99 : vector<64x1xf32> to vector<64x128xf32>
    %101 = arith.mulf %95, %100 : vector<64x128xf32>
    %c0_57 = arith.constant 0 : index
    %c0_58 = arith.constant 0 : index
    %c0_59 = arith.constant 0 : index
    %102 = vector.load %arg22[%c0_57, %c0_58, %c0_59] : memref<1x64x1xf32, #tpu.memory_space<vmem>>, vector<1x64x1xf32>
    %103 = vector.shape_cast %102 : vector<1x64x1xf32> to vector<64x1xf32>
    %104 = vector.broadcast %103 : vector<64x1xf32> to vector<64x128xf32>
    %105 = arith.addf %101, %104 : vector<64x128xf32>
    %106 = vector.extract_strided_slice %105 {offsets = [0, 0], sizes = [32, 128], strides = [1, 1]} : vector<64x128xf32> to vector<32x128xf32>
    %107 = vector.extract_strided_slice %105 {offsets = [32, 0], sizes = [32, 128], strides = [1, 1]} : vector<64x128xf32> to vector<32x128xf32>
    %108 = arith.negf %107 : vector<32x128xf32>
    %109 = math.exp %108 : vector<32x128xf32>
    %cst_60 = arith.constant 1.000000e+00 : f32
    %110 = vector.broadcast %cst_60 : f32 to vector<32x128xf32>
    %111 = arith.addf %110, %109 : vector<32x128xf32>
    %112 = arith.divf %110, %111 : vector<32x128xf32>
    %cst_61 = arith.constant 1.000000e+00 : f32
    %113 = vector.broadcast %cst_61 : f32 to vector<32x128xf32>
    %114 = arith.subf %113, %112 : vector<32x128xf32>
    %115 = arith.mulf %112, %106 : vector<32x128xf32>
    %c1_i32_62 = arith.constant 1 : i32
    %116 = vector.broadcast %c1_i32_62 : i32 to vector<32x128xi32>
    %117 = arith.cmpi sge, %48, %116 : vector<32x128xi32>
    %c1_i32_63 = arith.constant 1 : i32
    %118 = tpu.dynamic_rotate %114 by %c1_i32_63 dim 1 : vector<32x128xf32>, i32 -> vector<32x128xf32>
    %cst_64 = arith.constant 1.000000e+00 : f32
    %119 = vector.broadcast %cst_64 : f32 to vector<32x128xf32>
    %120 = arith.select %117, %118, %119 : vector<32x128xi1>, vector<32x128xf32>
    %c1_i32_65 = arith.constant 1 : i32
    %121 = vector.broadcast %c1_i32_65 : i32 to vector<32x128xi32>
    %122 = arith.cmpi sge, %48, %121 : vector<32x128xi32>
    %c1_i32_66 = arith.constant 1 : i32
    %123 = tpu.dynamic_rotate %115 by %c1_i32_66 dim 1 : vector<32x128xf32>, i32 -> vector<32x128xf32>
    %cst_67 = arith.constant 0.000000e+00 : f32
    %124 = vector.broadcast %cst_67 : f32 to vector<32x128xf32>
    %125 = arith.select %122, %123, %124 : vector<32x128xi1>, vector<32x128xf32>
    %126 = arith.mulf %114, %125 : vector<32x128xf32>
    %127 = arith.addf %126, %115 : vector<32x128xf32>
    %128 = arith.mulf %114, %120 : vector<32x128xf32>
    %c2_i32 = arith.constant 2 : i32
    %129 = vector.broadcast %c2_i32 : i32 to vector<32x128xi32>
    %130 = arith.cmpi sge, %48, %129 : vector<32x128xi32>
    %c2_i32_68 = arith.constant 2 : i32
    %131 = tpu.dynamic_rotate %128 by %c2_i32_68 dim 1 : vector<32x128xf32>, i32 -> vector<32x128xf32>
    %cst_69 = arith.constant 1.000000e+00 : f32
    %132 = vector.broadcast %cst_69 : f32 to vector<32x128xf32>
    %133 = arith.select %130, %131, %132 : vector<32x128xi1>, vector<32x128xf32>
    %c2_i32_70 = arith.constant 2 : i32
    %134 = vector.broadcast %c2_i32_70 : i32 to vector<32x128xi32>
    %135 = arith.cmpi sge, %48, %134 : vector<32x128xi32>
    %c2_i32_71 = arith.constant 2 : i32
    %136 = tpu.dynamic_rotate %127 by %c2_i32_71 dim 1 : vector<32x128xf32>, i32 -> vector<32x128xf32>
    %cst_72 = arith.constant 0.000000e+00 : f32
    %137 = vector.broadcast %cst_72 : f32 to vector<32x128xf32>
    %138 = arith.select %135, %136, %137 : vector<32x128xi1>, vector<32x128xf32>
    %139 = arith.mulf %128, %138 : vector<32x128xf32>
    %140 = arith.addf %139, %127 : vector<32x128xf32>
    %141 = arith.mulf %128, %133 : vector<32x128xf32>
    %c4_i32 = arith.constant 4 : i32
    %142 = vector.broadcast %c4_i32 : i32 to vector<32x128xi32>
    %143 = arith.cmpi sge, %48, %142 : vector<32x128xi32>
    %c4_i32_73 = arith.constant 4 : i32
    %144 = tpu.dynamic_rotate %141 by %c4_i32_73 dim 1 : vector<32x128xf32>, i32 -> vector<32x128xf32>
    %cst_74 = arith.constant 1.000000e+00 : f32
    %145 = vector.broadcast %cst_74 : f32 to vector<32x128xf32>
    %146 = arith.select %143, %144, %145 : vector<32x128xi1>, vector<32x128xf32>
    %c4_i32_75 = arith.constant 4 : i32
    %147 = vector.broadcast %c4_i32_75 : i32 to vector<32x128xi32>
    %148 = arith.cmpi sge, %48, %147 : vector<32x128xi32>
    %c4_i32_76 = arith.constant 4 : i32
    %149 = tpu.dynamic_rotate %140 by %c4_i32_76 dim 1 : vector<32x128xf32>, i32 -> vector<32x128xf32>
    %cst_77 = arith.constant 0.000000e+00 : f32
    %150 = vector.broadcast %cst_77 : f32 to vector<32x128xf32>
    %151 = arith.select %148, %149, %150 : vector<32x128xi1>, vector<32x128xf32>
    %152 = arith.mulf %141, %151 : vector<32x128xf32>
    %153 = arith.addf %152, %140 : vector<32x128xf32>
    %154 = arith.mulf %141, %146 : vector<32x128xf32>
    %c8_i32 = arith.constant 8 : i32
    %155 = vector.broadcast %c8_i32 : i32 to vector<32x128xi32>
    %156 = arith.cmpi sge, %48, %155 : vector<32x128xi32>
    %c8_i32_78 = arith.constant 8 : i32
    %157 = tpu.dynamic_rotate %154 by %c8_i32_78 dim 1 : vector<32x128xf32>, i32 -> vector<32x128xf32>
    %cst_79 = arith.constant 1.000000e+00 : f32
    %158 = vector.broadcast %cst_79 : f32 to vector<32x128xf32>
    %159 = arith.select %156, %157, %158 : vector<32x128xi1>, vector<32x128xf32>
    %c8_i32_80 = arith.constant 8 : i32
    %160 = vector.broadcast %c8_i32_80 : i32 to vector<32x128xi32>
    %161 = arith.cmpi sge, %48, %160 : vector<32x128xi32>
    %c8_i32_81 = arith.constant 8 : i32
    %162 = tpu.dynamic_rotate %153 by %c8_i32_81 dim 1 : vector<32x128xf32>, i32 -> vector<32x128xf32>
    %cst_82 = arith.constant 0.000000e+00 : f32
    %163 = vector.broadcast %cst_82 : f32 to vector<32x128xf32>
    %164 = arith.select %161, %162, %163 : vector<32x128xi1>, vector<32x128xf32>
    %165 = arith.mulf %154, %164 : vector<32x128xf32>
    %166 = arith.addf %165, %153 : vector<32x128xf32>
    %167 = arith.mulf %154, %159 : vector<32x128xf32>
    %c16_i32 = arith.constant 16 : i32
    %168 = vector.broadcast %c16_i32 : i32 to vector<32x128xi32>
    %169 = arith.cmpi sge, %48, %168 : vector<32x128xi32>
    %c16_i32_83 = arith.constant 16 : i32
    %170 = tpu.dynamic_rotate %167 by %c16_i32_83 dim 1 : vector<32x128xf32>, i32 -> vector<32x128xf32>
    %cst_84 = arith.constant 1.000000e+00 : f32
    %171 = vector.broadcast %cst_84 : f32 to vector<32x128xf32>
    %172 = arith.select %169, %170, %171 : vector<32x128xi1>, vector<32x128xf32>
    %c16_i32_85 = arith.constant 16 : i32
    %173 = vector.broadcast %c16_i32_85 : i32 to vector<32x128xi32>
    %174 = arith.cmpi sge, %48, %173 : vector<32x128xi32>
    %c16_i32_86 = arith.constant 16 : i32
    %175 = tpu.dynamic_rotate %166 by %c16_i32_86 dim 1 : vector<32x128xf32>, i32 -> vector<32x128xf32>
    %cst_87 = arith.constant 0.000000e+00 : f32
    %176 = vector.broadcast %cst_87 : f32 to vector<32x128xf32>
    %177 = arith.select %174, %175, %176 : vector<32x128xi1>, vector<32x128xf32>
    %178 = arith.mulf %167, %177 : vector<32x128xf32>
    %179 = arith.addf %178, %166 : vector<32x128xf32>
    %180 = arith.mulf %167, %172 : vector<32x128xf32>
    %c32_i32 = arith.constant 32 : i32
    %181 = vector.broadcast %c32_i32 : i32 to vector<32x128xi32>
    %182 = arith.cmpi sge, %48, %181 : vector<32x128xi32>
    %c32_i32_88 = arith.constant 32 : i32
    %183 = tpu.dynamic_rotate %180 by %c32_i32_88 dim 1 : vector<32x128xf32>, i32 -> vector<32x128xf32>
    %cst_89 = arith.constant 1.000000e+00 : f32
    %184 = vector.broadcast %cst_89 : f32 to vector<32x128xf32>
    %185 = arith.select %182, %183, %184 : vector<32x128xi1>, vector<32x128xf32>
    %c32_i32_90 = arith.constant 32 : i32
    %186 = vector.broadcast %c32_i32_90 : i32 to vector<32x128xi32>
    %187 = arith.cmpi sge, %48, %186 : vector<32x128xi32>
    %c32_i32_91 = arith.constant 32 : i32
    %188 = tpu.dynamic_rotate %179 by %c32_i32_91 dim 1 : vector<32x128xf32>, i32 -> vector<32x128xf32>
    %cst_92 = arith.constant 0.000000e+00 : f32
    %189 = vector.broadcast %cst_92 : f32 to vector<32x128xf32>
    %190 = arith.select %187, %188, %189 : vector<32x128xi1>, vector<32x128xf32>
    %191 = arith.mulf %180, %190 : vector<32x128xf32>
    %192 = arith.addf %191, %179 : vector<32x128xf32>
    %193 = arith.mulf %180, %185 : vector<32x128xf32>
    %c64_i32 = arith.constant 64 : i32
    %194 = vector.broadcast %c64_i32 : i32 to vector<32x128xi32>
    %195 = arith.cmpi sge, %48, %194 : vector<32x128xi32>
    %c64_i32_93 = arith.constant 64 : i32
    %196 = tpu.dynamic_rotate %192 by %c64_i32_93 dim 1 : vector<32x128xf32>, i32 -> vector<32x128xf32>
    %cst_94 = arith.constant 0.000000e+00 : f32
    %197 = vector.broadcast %cst_94 : f32 to vector<32x128xf32>
    %198 = arith.select %195, %196, %197 : vector<32x128xi1>, vector<32x128xf32>
    %199 = arith.mulf %193, %198 : vector<32x128xf32>
    %200 = arith.addf %199, %192 : vector<32x128xf32>
    %201 = arith.negf %47 : vector<32x128xf32>
    %202 = math.exp %201 : vector<32x128xf32>
    %cst_95 = arith.constant 1.000000e+00 : f32
    %203 = vector.broadcast %cst_95 : f32 to vector<32x128xf32>
    %204 = arith.addf %203, %202 : vector<32x128xf32>
    %205 = arith.divf %203, %204 : vector<32x128xf32>
    %206 = arith.mulf %47, %205 : vector<32x128xf32>
    %207 = arith.mulf %200, %206 : vector<32x128xf32>
    %c0_96 = arith.constant 0 : index
    %c0_97 = arith.constant 0 : index
    %208 = vector.load %arg13[%c0_96, %c0_97] : memref<32x32xbf16, #tpu.memory_space<vmem>>, vector<32x32xbf16>
    %209 = arith.truncf %207 : vector<32x128xf32> to vector<32x128xbf16>
    %cst_98 = arith.constant dense<0.000000e+00> : vector<32x128xf32>
    %210 = tpu.matmul %208, %209, %cst_98 {dimension_numbers = #tpu.dot_dimension_numbers<[1], [0], [0], [1], [0, 0, 1, 1], [], []>} : vector<32x32xbf16>, vector<32x128xbf16>, vector<32x128xf32> -> vector<32x128xf32>
    %c0_99 = arith.constant 0 : index
    %c0_100 = arith.constant 0 : index
    %211 = vector.load %arg14[%c0_99, %c0_100] : memref<32x1xf32, #tpu.memory_space<vmem>>, vector<32x1xf32>
    %212 = vector.broadcast %211 : vector<32x1xf32> to vector<32x128xf32>
    %213 = arith.addf %210, %212 : vector<32x128xf32>
    %c0_101 = arith.constant 0 : index
    %c0_102 = arith.constant 0 : index
    %c0_103 = arith.constant 0 : index
    %214 = vector.load %arg23[%c0_101, %c0_102, %c0_103] : memref<1x32x1xf32, #tpu.memory_space<vmem>>, vector<1x32x1xf32>
    %215 = vector.shape_cast %214 : vector<1x32x1xf32> to vector<32x1xf32>
    %cst_104 = arith.constant 1.000000e+00 : f32
    %216 = vector.broadcast %cst_104 : f32 to vector<32x1xf32>
    %217 = arith.addf %216, %215 : vector<32x1xf32>
    %218 = vector.broadcast %217 : vector<32x1xf32> to vector<32x128xf32>
    %219 = arith.mulf %213, %218 : vector<32x128xf32>
    %c0_105 = arith.constant 0 : index
    %c0_106 = arith.constant 0 : index
    %c0_107 = arith.constant 0 : index
    %220 = vector.load %arg24[%c0_105, %c0_106, %c0_107] : memref<1x32x1xf32, #tpu.memory_space<vmem>>, vector<1x32x1xf32>
    %221 = vector.shape_cast %220 : vector<1x32x1xf32> to vector<32x1xf32>
    %222 = vector.broadcast %221 : vector<32x1xf32> to vector<32x128xf32>
    %223 = arith.addf %219, %222 : vector<32x128xf32>
    %224 = vector.extract_strided_slice %223 {offsets = [0, 0], sizes = [16, 128], strides = [1, 1]} : vector<32x128xf32> to vector<16x128xf32>
    %225 = arith.addf %1, %224 : vector<16x128xf32>
    %c0_108 = arith.constant 0 : index
    %c0_109 = arith.constant 0 : index
    %c0_110 = arith.constant 0 : index
    %226 = vector.load %arg25[%c0_108, %c0_109, %c0_110] : memref<1x16x128xf32, #tpu.memory_space<vmem>>, vector<1x16x128xf32>
    %227 = vector.shape_cast %226 : vector<1x16x128xf32> to vector<16x128xf32>
    %228 = vector.shape_cast %225 : vector<16x128xf32> to vector<1x16x128xf32>
    tpu.vector_store %arg25[%c0_108, %c0_109, %c0_110], %228 {strides = array<i32>} : memref<1x16x128xf32, #tpu.memory_space<vmem>>, vector<1x16x128xf32>,
    %c0_111 = arith.constant 0 : index
    %c0_112 = arith.constant 0 : index
    %c0_113 = arith.constant 0 : index
    %229 = vector.load %arg3[%c0_111, %c0_112, %c0_113] : memref<1x16x128xf32, #tpu.memory_space<vmem>>, vector<1x16x128xf32>
    %230 = vector.shape_cast %229 : vector<1x16x128xf32> to vector<16x128xf32>
    %231 = vector.extract_strided_slice %223 {offsets = [16, 0], sizes = [16, 128], strides = [1, 1]} : vector<32x128xf32> to vector<16x128xf32>
    %232 = arith.addf %230, %231 : vector<16x128xf32>
    %c0_114 = arith.constant 0 : index
    %c0_115 = arith.constant 0 : index
    %c0_116 = arith.constant 0 : index
    %233 = vector.load %arg26[%c0_114, %c0_115, %c0_116] : memref<1x16x128xf32, #tpu.memory_space<vmem>>, vector<1x16x128xf32>
    %234 = vector.shape_cast %233 : vector<1x16x128xf32> to vector<16x128xf32>
    %235 = vector.shape_cast %232 : vector<16x128xf32> to vector<1x16x128xf32>
    tpu.vector_store %arg26[%c0_114, %c0_115, %c0_116], %235 {strides = array<i32>} : memref<1x16x128xf32, #tpu.memory_space<vmem>>, vector<1x16x128xf32>,
    return
  }
  func.func @transform_0(%arg0: i32) -> (i32, i32, i32) {
    %c0_i32 = arith.constant 0 : i32
    %c0_i32_0 = arith.constant 0 : i32
    %c0_i32_1 = arith.constant 0 : i32
    return %arg0, %c0_i32, %c0_i32_0 : i32, i32, i32
  }
  func.func @transform_1(%arg0: i32) -> (i32, i32, i32) {
    %c0_i32 = arith.constant 0 : i32
    %c0_i32_0 = arith.constant 0 : i32
    %c0_i32_1 = arith.constant 0 : i32
    return %arg0, %c0_i32, %c0_i32_0 : i32, i32, i32
  }
  func.func @transform_2(%arg0: i32) -> (i32, i32, i32) {
    %c0_i32 = arith.constant 0 : i32
    %c0_i32_0 = arith.constant 0 : i32
    %c0_i32_1 = arith.constant 0 : i32
    return %arg0, %c0_i32, %c0_i32_0 : i32, i32, i32
  }
  func.func @transform_3(%arg0: i32) -> (i32, i32) {
    %c0_i32 = arith.constant 0 : i32
    %c0_i32_0 = arith.constant 0 : i32
    %c0_i32_1 = arith.constant 0 : i32
    return %c0_i32, %c0_i32_0 : i32, i32
  }
  func.func @transform_4(%arg0: i32) -> (i32, i32) {
    %c0_i32 = arith.constant 0 : i32
    %c0_i32_0 = arith.constant 0 : i32
    %c0_i32_1 = arith.constant 0 : i32
    return %c0_i32, %c0_i32_0 : i32, i32
  }
  func.func @transform_5(%arg0: i32) -> (i32, i32) {
    %c0_i32 = arith.constant 0 : i32
    %c0_i32_0 = arith.constant 0 : i32
    %c0_i32_1 = arith.constant 0 : i32
    return %c0_i32, %c0_i32_0 : i32, i32
  }
  func.func @transform_6(%arg0: i32) -> (i32, i32) {
    %c0_i32 = arith.constant 0 : i32
    %c0_i32_0 = arith.constant 0 : i32
    %c0_i32_1 = arith.constant 0 : i32
    return %c0_i32, %c0_i32_0 : i32, i32
  }
  func.func @transform_7(%arg0: i32) -> (i32, i32) {
    %c0_i32 = arith.constant 0 : i32
    %c0_i32_0 = arith.constant 0 : i32
    %c0_i32_1 = arith.constant 0 : i32
    return %c0_i32, %c0_i32_0 : i32, i32
  }
  func.func @transform_8(%arg0: i32) -> (i32, i32) {
    %c0_i32 = arith.constant 0 : i32
    %c0_i32_0 = arith.constant 0 : i32
    %c0_i32_1 = arith.constant 0 : i32
    return %c0_i32, %c0_i32_0 : i32, i32
  }
  func.func @transform_9(%arg0: i32) -> (i32, i32) {
    %c0_i32 = arith.constant 0 : i32
    %c0_i32_0 = arith.constant 0 : i32
    %c0_i32_1 = arith.constant 0 : i32
    return %c0_i32, %c0_i32_0 : i32, i32
  }
  func.func @transform_10(%arg0: i32) -> (i32, i32) {
    %c0_i32 = arith.constant 0 : i32
    %c0_i32_0 = arith.constant 0 : i32
    %c0_i32_1 = arith.constant 0 : i32
    return %c0_i32, %c0_i32_0 : i32, i32
  }
  func.func @transform_11(%arg0: i32) -> (i32, i32) {
    %c0_i32 = arith.constant 0 : i32
    %c0_i32_0 = arith.constant 0 : i32
    %c0_i32_1 = arith.constant 0 : i32
    return %c0_i32, %c0_i32_0 : i32, i32
  }
  func.func @transform_12(%arg0: i32) -> (i32, i32) {
    %c0_i32 = arith.constant 0 : i32
    %c0_i32_0 = arith.constant 0 : i32
    %c0_i32_1 = arith.constant 0 : i32
    return %c0_i32, %c0_i32_0 : i32, i32
  }
  func.func @transform_13(%arg0: i32) -> (i32, i32) {
    %c0_i32 = arith.constant 0 : i32
    %c0_i32_0 = arith.constant 0 : i32
    %c0_i32_1 = arith.constant 0 : i32
    return %c0_i32, %c0_i32_0 : i32, i32
  }
  func.func @transform_14(%arg0: i32) -> (i32, i32, i32) {
    %c0_i32 = arith.constant 0 : i32
    %c0_i32_0 = arith.constant 0 : i32
    %c0_i32_1 = arith.constant 0 : i32
    return %arg0, %c0_i32, %c0_i32_0 : i32, i32, i32
  }
  func.func @transform_15(%arg0: i32) -> (i32, i32, i32) {
    %c0_i32 = arith.constant 0 : i32
    %c0_i32_0 = arith.constant 0 : i32
    %c0_i32_1 = arith.constant 0 : i32
    return %arg0, %c0_i32, %c0_i32_0 : i32, i32, i32
  }
  func.func @transform_16(%arg0: i32) -> (i32, i32, i32) {
    %c0_i32 = arith.constant 0 : i32
    %c0_i32_0 = arith.constant 0 : i32
    %c0_i32_1 = arith.constant 0 : i32
    return %arg0, %c0_i32, %c0_i32_0 : i32, i32, i32
  }
  func.func @transform_17(%arg0: i32) -> (i32, i32, i32) {
    %c0_i32 = arith.constant 0 : i32
    %c0_i32_0 = arith.constant 0 : i32
    %c0_i32_1 = arith.constant 0 : i32
    return %arg0, %c0_i32, %c0_i32_0 : i32, i32, i32
  }
  func.func @transform_18(%arg0: i32) -> (i32, i32, i32) {
    %c0_i32 = arith.constant 0 : i32
    %c0_i32_0 = arith.constant 0 : i32
    %c0_i32_1 = arith.constant 0 : i32
    return %arg0, %c0_i32, %c0_i32_0 : i32, i32, i32
  }
  func.func @transform_19(%arg0: i32) -> (i32, i32, i32) {
    %c0_i32 = arith.constant 0 : i32
    %c0_i32_0 = arith.constant 0 : i32
    %c0_i32_1 = arith.constant 0 : i32
    return %arg0, %c0_i32, %c0_i32_0 : i32, i32, i32
  }
  func.func @transform_20(%arg0: i32) -> (i32, i32, i32) {
    %c0_i32 = arith.constant 0 : i32
    %c0_i32_0 = arith.constant 0 : i32
    %c0_i32_1 = arith.constant 0 : i32
    return %arg0, %c0_i32, %c0_i32_0 : i32, i32, i32
  }
  func.func @transform_21(%arg0: i32) -> (i32, i32, i32) {
    %c0_i32 = arith.constant 0 : i32
    %c0_i32_0 = arith.constant 0 : i32
    %c0_i32_1 = arith.constant 0 : i32
    return %arg0, %c0_i32, %c0_i32_0 : i32, i32, i32
  }
  func.func @transform_22(%arg0: i32) -> (i32, i32, i32) {
    %c0_i32 = arith.constant 0 : i32
    %c0_i32_0 = arith.constant 0 : i32
    %c0_i32_1 = arith.constant 0 : i32
    return %arg0, %c0_i32, %c0_i32_0 : i32, i32, i32
  }
  func.func @transform_23(%arg0: i32) -> (i32, i32, i32) {
    %c0_i32 = arith.constant 0 : i32
    %c0_i32_0 = arith.constant 0 : i32
    %c0_i32_1 = arith.constant 0 : i32
    return %arg0, %c0_i32, %c0_i32_0 : i32, i32, i32
  }
  func.func @transform_24(%arg0: i32) -> (i32, i32, i32) {
    %c0_i32 = arith.constant 0 : i32
    %c0_i32_0 = arith.constant 0 : i32
    %c0_i32_1 = arith.constant 0 : i32
    return %arg0, %c0_i32, %c0_i32_0 : i32, i32, i32
  }
  func.func @transform_25(%arg0: i32) -> (i32, i32, i32) {
    %c0_i32 = arith.constant 0 : i32
    %c0_i32_0 = arith.constant 0 : i32
    %c0_i32_1 = arith.constant 0 : i32
    return %arg0, %c0_i32, %c0_i32_0 : i32, i32, i32
  }
}

module attributes {stable_mosaic.version = 11 : i64} {
  func.func @_pw_conv_kernel(%arg0: i32, %arg1: memref<1x16x128xf32, #tpu.memory_space<vmem>>, %arg2: memref<4x16xbf16, #tpu.memory_space<vmem>>, %arg3: memref<4x1xf32, #tpu.memory_space<vmem>>, %arg4: memref<1x4x1xf32, #tpu.memory_space<vmem>>, %arg5: memref<1x4x1xf32, #tpu.memory_space<vmem>>, %arg6: memref<1x4x128xf32, #tpu.memory_space<vmem>>) attributes {dimension_semantics = [#tpu.dimension_semantics<parallel>], iteration_bounds = array<i64: 2>, scalar_prefetch = 0 : i64, scratch_operands = 0 : i64, tpu.core_type = #tpu.core_type<tc>, window_params = [{transform_indices = @transform_0, window_bounds = array<i64: 1, 16, 128>}, {pipeline_mode = #tpu.pipeline_mode<synchronous>, transform_indices = @transform_1, window_bounds = array<i64: 4, 16>}, {pipeline_mode = #tpu.pipeline_mode<synchronous>, transform_indices = @transform_2, window_bounds = array<i64: 4, 1>}, {transform_indices = @transform_3, window_bounds = array<i64: 1, 4, 1>}, {transform_indices = @transform_4, window_bounds = array<i64: 1, 4, 1>}, {transform_indices = @transform_5, window_bounds = array<i64: 1, 4, 128>}]} {
    %c0 = arith.constant 0 : index
    %c0_0 = arith.constant 0 : index
    %c0_1 = arith.constant 0 : index
    %0 = vector.load %arg1[%c0, %c0_0, %c0_1] : memref<1x16x128xf32, #tpu.memory_space<vmem>>, vector<1x16x128xf32>
    %1 = vector.shape_cast %0 : vector<1x16x128xf32> to vector<16x128xf32>
    %2 = arith.truncf %1 : vector<16x128xf32> to vector<16x128xbf16>
    %c0_2 = arith.constant 0 : index
    %c0_3 = arith.constant 0 : index
    %3 = vector.load %arg2[%c0_2, %c0_3] : memref<4x16xbf16, #tpu.memory_space<vmem>>, vector<4x16xbf16>
    %cst = arith.constant dense<0.000000e+00> : vector<4x128xf32>
    %4 = tpu.matmul %3, %2, %cst {dimension_numbers = #tpu.dot_dimension_numbers<[1], [0], [0], [1], [0, 0, 1, 1], [], []>} : vector<4x16xbf16>, vector<16x128xbf16>, vector<4x128xf32> -> vector<4x128xf32>
    %c0_4 = arith.constant 0 : index
    %c0_5 = arith.constant 0 : index
    %5 = vector.load %arg3[%c0_4, %c0_5] : memref<4x1xf32, #tpu.memory_space<vmem>>, vector<4x1xf32>
    %6 = vector.broadcast %5 : vector<4x1xf32> to vector<4x128xf32>
    %7 = arith.addf %4, %6 : vector<4x128xf32>
    %c0_6 = arith.constant 0 : index
    %c0_7 = arith.constant 0 : index
    %c0_8 = arith.constant 0 : index
    %8 = vector.load %arg4[%c0_6, %c0_7, %c0_8] : memref<1x4x1xf32, #tpu.memory_space<vmem>>, vector<1x4x1xf32>
    %9 = vector.shape_cast %8 : vector<1x4x1xf32> to vector<4x1xf32>
    %cst_9 = arith.constant 1.000000e+00 : f32
    %10 = vector.broadcast %cst_9 : f32 to vector<4x1xf32>
    %11 = arith.addf %10, %9 : vector<4x1xf32>
    %12 = vector.broadcast %11 : vector<4x1xf32> to vector<4x128xf32>
    %13 = arith.mulf %7, %12 : vector<4x128xf32>
    %c0_10 = arith.constant 0 : index
    %c0_11 = arith.constant 0 : index
    %c0_12 = arith.constant 0 : index
    %14 = vector.load %arg5[%c0_10, %c0_11, %c0_12] : memref<1x4x1xf32, #tpu.memory_space<vmem>>, vector<1x4x1xf32>
    %15 = vector.shape_cast %14 : vector<1x4x1xf32> to vector<4x1xf32>
    %16 = vector.broadcast %15 : vector<4x1xf32> to vector<4x128xf32>
    %17 = arith.addf %13, %16 : vector<4x128xf32>
    %c0_13 = arith.constant 0 : index
    %c0_14 = arith.constant 0 : index
    %c0_15 = arith.constant 0 : index
    %18 = vector.load %arg6[%c0_13, %c0_14, %c0_15] : memref<1x4x128xf32, #tpu.memory_space<vmem>>, vector<1x4x128xf32>
    %19 = vector.shape_cast %18 : vector<1x4x128xf32> to vector<4x128xf32>
    %20 = vector.shape_cast %17 : vector<4x128xf32> to vector<1x4x128xf32>
    tpu.vector_store %arg6[%c0_13, %c0_14, %c0_15], %20 {strides = array<i32>} : memref<1x4x128xf32, #tpu.memory_space<vmem>>, vector<1x4x128xf32>,
    return
  }
  func.func @transform_0(%arg0: i32) -> (i32, i32, i32) {
    %c0_i32 = arith.constant 0 : i32
    %c0_i32_0 = arith.constant 0 : i32
    %c0_i32_1 = arith.constant 0 : i32
    return %arg0, %c0_i32, %c0_i32_0 : i32, i32, i32
  }
  func.func @transform_1(%arg0: i32) -> (i32, i32) {
    %c0_i32 = arith.constant 0 : i32
    %c0_i32_0 = arith.constant 0 : i32
    %c0_i32_1 = arith.constant 0 : i32
    return %c0_i32, %c0_i32_0 : i32, i32
  }
  func.func @transform_2(%arg0: i32) -> (i32, i32) {
    %c0_i32 = arith.constant 0 : i32
    %c0_i32_0 = arith.constant 0 : i32
    %c0_i32_1 = arith.constant 0 : i32
    return %c0_i32, %c0_i32_0 : i32, i32
  }
  func.func @transform_3(%arg0: i32) -> (i32, i32, i32) {
    %c0_i32 = arith.constant 0 : i32
    %c0_i32_0 = arith.constant 0 : i32
    %c0_i32_1 = arith.constant 0 : i32
    return %arg0, %c0_i32, %c0_i32_0 : i32, i32, i32
  }
  func.func @transform_4(%arg0: i32) -> (i32, i32, i32) {
    %c0_i32 = arith.constant 0 : i32
    %c0_i32_0 = arith.constant 0 : i32
    %c0_i32_1 = arith.constant 0 : i32
    return %arg0, %c0_i32, %c0_i32_0 : i32, i32, i32
  }
  func.func @transform_5(%arg0: i32) -> (i32, i32, i32) {
    %c0_i32 = arith.constant 0 : i32
    %c0_i32_0 = arith.constant 0 : i32
    %c0_i32_1 = arith.constant 0 : i32
    return %arg0, %c0_i32, %c0_i32_0 : i32, i32, i32
  }
}

</mosaic_0001>

<bundles_post_ra>
// kernel: denoiser_forward.4
= control target key start
LH: loop header
LB: loop body
LE: loop exit
PB: predicated region body
PF: predicated region fallthrough
CT: control target
= control target key end

     0   :  { %s526_s18 = smov 0   ;;  %s563_s0 = inlined_call_operand.vmem [shape: f32[2,4,128], index: 0, kind: input, shape index: {}]   ;;  %s564_s1 = inlined_call_operand.vmem [shape: bf16[16,4], index: 1, kind: input, shape index: {}]   ;;  %s565_s2 = inlined_call_operand.vmem [shape: f32[16,1], index: 2, kind: input, shape index: {}]   ;;  %s566_s3 = inlined_call_operand.vmem [shape: f32[2,16,1], index: 3, kind: input, shape index: {}]   ;;  %s567_s4 = inlined_call_operand.vmem [shape: f32[2,16,1], index: 4, kind: input, shape index: {}]   ;;  %s568_s5 = inlined_call_operand.vmem [shape: f32[2,16,128], index: 5, kind: output, shape index: {}]  }
   0x1 LB: > { %s444_s19 = sadd.s32 4294967295, %s491_s18   ;;  %p448_p0 = scmp.ge.s32.totalorder %s491_s18, 1  ;;  %s491_s18 = sphi %s526_s18, %s15_s18  }
   0x2   : > { %p206_p1 = scmp.lt.s32.totalorder %s491_s18, 3 }
   0x4   : > { %p207_p2 = pnand %p448_p0, %p206_p1 }
   0x5   : > { %p243_p3 = scmp.lt.s32.totalorder (!%p207_p2), %s444_s19, 1  ;;  %v493_v0 = vmov (!%p207_p2), 0.0   ;;  %vm494_vm0 = vmmov (!%p207_p2), 0   ;;  %v267_v1 = vld [vmem:[%s565_s2] sm:$0xff] (!%p207_p2)  ;;  %v495_v2 = vmov (!%p207_p2), 0   ;;  %v268_v3 = vld [vmem:[%s565_s2 + $0x8] sm:$0xff] (!%p207_p2) }
   0x6   : > { %210 = sbr.rel (%p207_p2) target bundleno = 244 (0xf4), region = 40  ;;  %465 = vmatprep.subr.bf16.mxu0 (!%p207_p2), %v493_v0  ;;  %467 = vmatprep.mubr.msk.bf16.mxu0 (!%p207_p2), %vm494_vm0, %v493_v0  ;;  %vm288_vm1 = vcmask (!%p207_p2), 1041408   ;;  %v484_v11 = vld [vmem:[%s564_s1] sm:$0xff] (!%p207_p2)   ;;  %vm284_vm2 = vcmask (!%p207_p2), 31744  }
   0x7   : > { %483 = vset.pattern.permute.xlu1 (!%p207_p2), %v495_v2  ;;  %482 = vset.pattern.permute.xlu0 (!%p207_p2), %v495_v2 }
   0x8   : > { %271 = vperm.xlu0 (!%p207_p2), %482, %v267_v1  }
   0xc   : > { %276 = vperm.xlu0 (!%p207_p2), %482, %v268_v3  }
   0xd   : > { %s570_s19 = smov (!%p243_p3, %s444_s19), 1 }
   0xe   : > { %s449_s22 = sshll.u32 %s570_s19, 2  ;;  %s537_s23 = sshll.u32 %s570_s19, 4 }
   0xf   : > { %s246_s28 = scalar_lea.vmem %s563_s0, %s449_s22  ;;  %s251_s6 = scalar_lea.vmem %s566_s3, %s537_s23 }
  0x10   : > { %v263_v4 = vld [vmem:[%s246_s28] sm:$0xf]  ;;  %v334_v6 = vld [vmem:[%s251_s6 + $0x8] sm:$0xff]  ;;  %s256_s9 = scalar_lea.vmem %s567_s4, %s537_s23  ;;  %s261_s14 = scalar_lea.vmem %s568_s5, %s537_s23 }
  0x11   : > { %v333_v5 = vld [vmem:[%s251_s6] sm:$0xff]  ;;  %v264_v7 = vpack.c.bf16 %v263_v4, %v263_v4  ;;  %v336_v12 = vadd.f32 1.0, %v334_v6  ;;  %v350_v13 = vld [vmem:[%s256_s9 + $0x8] sm:$0xff] }
  0x12   : > { %v335_v8 = vadd.f32 1.0, %v333_v5  ;;  %v349_v9 = vld [vmem:[%s256_s9] sm:$0xff] }
  0x13   : > { %v290_v10 = vsel %vm288_vm1, %v264_v7, 0  ;;  %353 = vperm.xlu0 %482, %v349_v9  }
  0x14   : > { %339 = vperm.xlu1 %483, %v335_v8   ;;  %466 = vmatpush3.bf16.msra.mxu0 %v290_v10 }
  0x17   : > { %468 = vmatmul.mubr.msk.bf16.vlgmr.msra.gmra.mrb[0].mxu0 %vm284_vm2, %v484_v11 }
  0x18   : > { %344 = vperm.xlu1 %483, %v336_v12  }
  0x1c   : > { %358 = vperm.xlu1 %483, %v350_v13  }
  0x87   : > { %v272_v14 = vpop.permute.xlu0 %271 }
  0x8b   : > { %v277_v16 = vpop.permute.xlu0 %276 }
  0x92   : > { %v354_v25 = vpop.permute.xlu0 %353 }
  0x93   : > { %v340_v15 = vpop.permute.xlu1 %339 }
  0x97   : > { %v345_v17 = vpop.permute.xlu1 %344 }
  0x9b   : > { %v359_v28 = vpop.permute.xlu1 %358 }
  0xea   : > { %v326_v18 = vpop.f32.mrb[0].mxu0 }
  0xeb   : > { %v327_v19 = vadd.f32 %v326_v18, %v272_v14  ;;  %v469_v20 = vpop.f32.mrb[1].mxu0 }
  0xec   : > { %v329_v21 = vpop.f32.mrb[2].mxu0 }
  0xed   : > { %v347_v22 = vmul.f32 %v340_v15, %v327_v19  ;;  %v330_v23 = vadd.f32 %v329_v21, %v277_v16  ;;  %v470_v24 = vpop.f32.mrb[3].mxu0 }
  0xef   : > { %v361_v26 = vadd.f32 %v354_v25, %v347_v22  ;;  %v348_v27 = vmul.f32 %v345_v17, %v330_v23 }
  0xf1   : > { %363 = vst [vmem:[%s261_s14] sm:$0xff] %v361_v26  ;;  %v362_v29 = vadd.f32 %v359_v28, %v348_v27 }
  0xf3   : > { %364 = vst [vmem:[%s261_s14 + $0x8] sm:$0xff] %v362_v29 }
  0xf4 PF: > { %s15_s18 = sadd.s32 1, %s491_s18  }
  0xf5   : > { %p12_p4 = scmp.ge.s32.totalorder %s15_s18, 4  }
  0xf7   :  { %14 = sbr.rel (!%p12_p4) target bundleno = 1 (0x1), region = 76 }

// kernel: denoiser_forward.7
= control target key start
LH: loop header
LB: loop body
LE: loop exit
PB: predicated region body
PF: predicated region fallthrough
CT: control target
= control target key end

     0   :  { %10 = vsyncpa [#allocation3], 0  ;;  %s702_s0 = inlined_call_operand.vmem [shape: f32[2,16,128], index: 0, kind: input, shape index: {}]   ;;  %s703_s1 = inlined_call_operand.vmem [shape: bf16[4,16], index: 1, kind: input, shape index: {}]   ;;  %s704_s2 = inlined_call_operand.vmem [shape: f32[4,1], index: 2, kind: input, shape index: {}]   ;;  %s705_s3 = inlined_call_operand.vmem [shape: f32[2,4,1], index: 3, kind: input, shape index: {}, may-alias: {3,4}]   ;;  %s706_s4 = inlined_call_operand.vmem [shape: f32[2,4,1], index: 4, kind: input, shape index: {}, may-alias: {3,4}]   ;;  %s707_s5 = inlined_call_operand.hbm [shape: f32[2,4,128], index: 5, kind: output, shape index: {}]  }
   0x1   :  { %12 = vsyncpa [#allocation3 + $0x1], 0  ;;  %s590_s18 = smov 0   ;;  %s592_s19 = smov 0  }
   0x2   :  { %s594_s20 = smov 0   ;;  %s596_s21 = smov 0  }
   0x3 LB: > { %s611_s22 = sadd.s32 4294967295, %s554_s21   ;;  %s425_s23 = sadd.s32 4294967294, %s554_s21   ;;  %s554_s21 = sphi %s596_s21, %s713_s21   ;;  %s550_s20 = sphi %s594_s20, %s712_s20   ;;  %s546_s19 = sphi %s592_s19, %s711_s19   ;;  %s542_s18 = sphi %s590_s18, %s710_s18  }
   0x4   : > { %s615_s24 = sadd.s32 1, %s554_s21   ;;  %s145_s25 = sadd.s32 1, %s550_s20 }
   0x5   : > { %s142_s26 = ssub.s32 %s554_s21, %s615_s24  ;;  %p155_p0 = scmp.ne.s32.totalorder %s550_s20, %s546_s19 }
   0x6   : > { %p143_p1 = scmp.eq.s32.totalorder %s142_s26, 0  ;;  %p156_p2 = scmp.eq.s32.totalorder %s611_s22, 1 }
   0x7   : > { %p161_p3 = scmp.ne.s32.totalorder %s546_s19, %s542_s18  ;;  %p162_p4 = scmp.eq.s32.totalorder %s425_s23, 1 }
   0x8   : > { %s626_s27 = scalar_select %p143_p1, %s550_s20, %s145_s25  }
   0x9   : > { %p628_p5 = por %p156_p2, %p155_p0  ;;  %p632_p6 = por %p162_p4, %p161_p3 }
   0xa   : > { %p428_p7 = scmp.ge.s32.totalorder %s554_s21, 1  ;;  %p208_p8 = scmp.lt.s32.totalorder %s554_s21, 3 }
   0xc   : > { %p209_p9 = pnand %p428_p7, %p208_p8 }
   0xd   : > { %p244_p10 = scmp.lt.s32.totalorder (!%p209_p9), %s611_s22, 1  ;;  %v556_v0 = vmov (!%p209_p9), 0.0   ;;  %vm557_vm0 = vmmov (!%p209_p9), 0   ;;  %v262_v1 = vld [vmem:[%s704_s2] sm:$0xf] (!%p209_p9)  ;;  %v558_v2 = vmov (!%p209_p9), 0  }
   0xe   : > { %212 = sbr.rel (%p209_p9) target bundleno = 263 (0x107), region = 40  ;;  %442 = vmatprep.subr.bf16.mxu0 (!%p209_p9), %v556_v0  ;;  %444 = vmatprep.mubr.msk.bf16.mxu0 (!%p209_p9), %vm557_vm0, %v556_v0  ;;  %v261_v9 = vld [vmem:[%s703_s1] sm:$0x3] (!%p209_p9)  ;;  %vm268_vm1 = vcmask (!%p209_p9), 130048   ;;  %s241_s30 = sand.u32 (!%p209_p9), 1, %s546_s19  }
   0xf   : > { %490 = vset.pattern.permute.xlu0 (!%p209_p9), %v558_v2  ;;  %491 = vset.pattern.permute.xlu1 (!%p209_p9), %v558_v2  ;;  %s429_s6 = sshll.u32 (!%p209_p9), %s241_s30, 2  ;;  %s329_s13 = scalar_lea.sflag (!%p209_p9), [#allocation3], %s241_s30 }
  0x10   : > { %265 = vperm.xlu0 (!%p209_p9), %490, %v262_v1  }
  0x15   : > { %s245_s7 = scalar_select %p244_p10, %s611_s22, 1 }
  0x17   : > { %s439_s8 = sshll.u32 %s245_s7, 4  ;;  %s432_s9 = sshll.u32 %s245_s7, 2 }
  0x18   : > { %s248_s12 = scalar_lea.vmem %s702_s0, %s439_s8  ;;  %s252_s15 = scalar_lea.vmem %s705_s3, %s432_s9 }
  0x19   : > { %v258_v3 = vld [vmem:[%s248_s12] sm:$0xff]  ;;  %v259_v4 = vld [vmem:[%s248_s12 + $0x8] sm:$0xff]  ;;  %s256_s23 = scalar_lea.vmem %s706_s4, %s432_s9  ;;  %s436_s7 = sshll.u32 %s611_s22, 6 }
  0x1a   : > { %v312_v5 = vld [vmem:[%s252_s15] sm:$0xf]  ;;  %v260_v6 = vpack.c.bf16 %v259_v4, %v258_v3  ;;  %s243_s8 = scalar_lea.vmem [#allocation2], %s429_s6  ;;  %s660_s12 = scalar_lea.hbm %s707_s5, %s436_s7 }
  0x1b   : > { %v313_v7 = vadd.f32 1.0, %v312_v5  ;;  %v320_v8 = vld [vmem:[%s256_s23] sm:$0xf]  ;;  %s342_s9 = sshll.u32 %s243_s8, 4  ;;  %s559_s22 = smov [#allocation2]   ;;  %s662_s9 = int_to_ptr.vmem [resolvable:$true] %s342_s9 }
  0x1c   : > { %323 = vperm.xlu1 %491, %v320_v8   ;;  %443 = vmatpush3.bf16.msra.mxu0 %v260_v6  ;;  %s492_s14 = scalar_lea.vmem %s662_s9, 64  ;;  %s496_s15 = sshll.u32 %s559_s22, 4  ;;  %s497_s15 = int_to_ptr.vmem [resolvable:$false] %s496_s15 }
  0x1d   : > { %316 = vperm.xlu0 %490, %v313_v7   ;;  %p493_p11 = scmp.ne.s32.totalorder %s662_s9, %s492_s14  ;;  %s498_s16 = scalar_lea.vmem %s497_s15, 128 }
  0x1e   : > { %p499_p0 = scmp.lt.s32.totalorder %s662_s9, %s497_s15  ;;  %p500_p1 = scmp.lt.s32.totalorder %s498_s16, %s492_s14 }
  0x1f   : > { %445 = vmatmul.mubr.msk.bf16.vlgmr.msra.gmra.mrb[0].mxu0 %vm268_vm1, %v261_v9  ;;  %p494_p12 = pnand %p493_p11, %p628_p5 }
  0x20   : > { %p501_p2 = por %p500_p1, %p499_p0 }
  0x21   : > { %p495_p13 = pneg %p494_p12 }
  0x23   : > { %p502_p3 = pnand %p501_p2, %p495_p13 }
  0x8f   : > { %v266_v10 = vpop.permute.xlu0 %265 }
  0x9b   : > { %v324_v14 = vpop.permute.xlu1 %323 }
  0x9c   : > { %v317_v15 = vpop.permute.xlu0 %316 }
  0xf2   : > { %v306_v11 = vpop.f32.mrb[0].mxu0 }
  0xf3   : > { %v307_v12 = vadd.f32 %v306_v11, %v266_v10  ;;  %v446_v13 = vpop.f32.mrb[1].mxu0 }
  0xf4   : > { %v309_v16 = vpop.f32.mrb[2].mxu0 }
  0xf5   : > { %v447_v17 = vpop.f32.mrb[3].mxu0  ;;  %v319_v18 = vmul.f32 %v317_v15, %v307_v12 }
  0xf7   : > { %v326_v19 = vadd.f32 %v324_v14, %v319_v18 }
  0xf9   : > { %327 = vst [vmem:[%s243_s8] sm:$0xf] %v326_v19 }
  0xfa   : > { %505 = shalt.err (!%p502_p3)
}
  0xfb   : > { %s506_s17 = scalar_lea.hbm %s660_s12, 64  ;;  %s510_s26 = scalar_lea.hbm %s707_s5, 128 }
  0xfc   : > { %p507_p4 = scmp.ne.s32.totalorder %s660_s12, %s506_s17  ;;  %p511_p9 = scmp.lt.u32.totalorder %s660_s12, %s707_s5 }
  0xfd   : > { %p512_p10 = scmp.lt.u32.totalorder %s510_s26, %s506_s17  ;;  %p514_p12 = scmp.lt.u32.totalorder %s506_s17, %s660_s12 }
  0xfe   : > { %p508_p7 = pnand %p507_p4, %p628_p5 }
  0xff   : > { %p513_p11 = por %p512_p10, %p511_p9 }
 0x100   : > { %p509_p8 = pneg %p508_p7 }
 0x101   : > { %p515_p13 = por %p514_p12, %p513_p11 }
 0x103   : > { %p516_p0 = pnand %p515_p13, %p509_p8 }
 0x105   : > { %519 = shalt.err (!%p516_p0)
}
 0x106   : > { %448 = dma.vmem_to_hbm [thread:$0]  (%p628_p5), %s662_s9, 64, %s660_s12, %s329_s13  }
 0x107 PF: > { %p454_p1 = scmp.ge.s32.totalorder %s554_s21, 2  ;;  %s354_s7 = sand.u32 1, %s542_s18  }
 0x108   : > { %s355_s8 = scalar_lea.sflag [#allocation3], %s354_s7 }
 0x109   : > { %p451_p2 = pnand %p454_p1, %p632_p6 }
 0x10b   : > { %537 = dma.done.wait (!%p451_p2), %s355_s8, 64  }
 0x10c   : > { %539 = vsyncadd (!%p451_p2), %s355_s8, 4294967232  ;;  %p15_p3 = scmp.ge.s32.totalorder %s615_s24, 4   ;;  %s710_s18 = smov %s546_s19 }
 0x10d   : > { %s711_s19 = smov %s550_s20  ;;  %s712_s20 = smov %s626_s27 }
 0x10e   : > { %s713_s21 = smov %s615_s24  ;;  %17 = sbr.rel (!%p15_p3) target bundleno = 3 (0x3), region = 81 }
 0x115   :  { %360 = vsyncpa [#allocation3], 1 }
 0x116   :  { %362 = vsyncpa [#allocation3 + $0x1], 1 }

// kernel: denoiser_forward.5
= control target key start
LH: loop header
LB: loop body
LE: loop exit
PB: predicated region body
PF: predicated region fallthrough
CT: control target
= control target key end

     0   :  { %s3424_s29 = smov 0   ;;  %s4045_s0 = inlined_call_operand.vmem [shape: f32[2,16,128], index: 0, kind: input, shape index: {}]   ;;  %s4046_s1 = inlined_call_operand.vmem [shape: f32[2,4,128], index: 1, kind: input, shape index: {}]   ;;  %s4047_s2 = inlined_call_operand.vmem [shape: f32[2,16,128], index: 2, kind: input, shape index: {}]   ;;  %s4048_s3 = inlined_call_operand.vmem [shape: bf16[64,16], index: 3, kind: input, shape index: {}]   ;;  %s4049_s4 = inlined_call_operand.vmem [shape: bf16[64,4], index: 4, kind: input, shape index: {}]   ;;  %s4050_s5 = inlined_call_operand.vmem [shape: f32[64,1], index: 5, kind: input, shape index: {}]   ;;  %s4051_s6 = inlined_call_operand.vmem [shape: bf16[64,64], index: 6, kind: input, shape index: {}]   ;;  %s4052_s7 = inlined_call_operand.vmem [shape: f32[64,1], index: 7, kind: input, shape index: {}]   ;;  %s4053_s8 = inlined_call_operand.vmem [shape: f32[32,3], index: 8, kind: input, shape index: {}]   ;;  %s4054_s9 = inlined_call_operand.vmem [shape: f32[32,1], index: 9, kind: input, shape index: {}]   ;;  %s4055_s10 = inlined_call_operand.vmem [shape: bf16[64,32], index: 10, kind: input, shape index: {}]   ;;  %s4056_s11 = inlined_call_operand.vmem [shape: f32[64,1], index: 11, kind: input, shape index: {}]   ;;  %s4057_s12 = inlined_call_operand.vmem [shape: bf16[32,32], index: 12, kind: input, shape index: {}]   ;;  %s4058_s13 = inlined_call_operand.vmem [shape: f32[32,1], index: 13, kind: input, shape index: {}]   ;;  %s4059_s14 = inlined_call_operand.vmem [shape: f32[2,64,1], index: 14, kind: input, shape index: {}]   ;;  %s4060_s15 = inlined_call_operand.vmem [shape: f32[2,64,1], index: 15, kind: input, shape index: {}]   ;;  %s4061_s16 = inlined_call_operand.vmem [shape: f32[2,64,1], index: 16, kind: input, shape index: {}]   ;;  %s4062_s17 = inlined_call_operand.vmem [shape: f32[2,64,1], index: 17, kind: input, shape index: {}]   ;;  %s4063_s18 = inlined_call_operand.vmem [shape: f32[2,32,1], index: 18, kind: input, shape index: {}]   ;;  %s4064_s19 = inlined_call_operand.vmem [shape: f32[2,32,1], index: 19, kind: input, shape index: {}]   ;;  %s4065_s20 = inlined_call_operand.vmem [shape: f32[2,64,1], index: 20, kind: input, shape index: {}]   ;;  %s4066_s21 = inlined_call_operand.vmem [shape: f32[2,64,1], index: 21, kind: input, shape index: {}]   ;;  %s4067_s22 = inlined_call_operand.vmem [shape: f32[2,32,1], index: 22, kind: input, shape index: {}]   ;;  %s4068_s23 = inlined_call_operand.vmem [shape: f32[2,32,1], index: 23, kind: input, shape index: {}]   ;;  %s4069_s24 = inlined_call_operand.vmem [shape: f32[2,16,128], index: 24, kind: output, shape index: {0}]   ;;  %s4070_s25 = inlined_call_operand.vmem [shape: f32[2,16,128], index: 25, kind: output, shape index: {1}]  }
   0x1   :  { %4085 = sst [smem:[#allocation3_spill]] %s4045_s0 }
   0x2   :  { %4086 = sst [smem:[#allocation4_spill]] %s4046_s1 }
   0x3   :  { %4087 = sst [smem:[#allocation5_spill]] %s4047_s2 }
   0x4   :  { %4088 = sst [smem:[#allocation6_spill]] %s4048_s3 }
   0x5   :  { %4089 = sst [smem:[#allocation7_spill]] %s4049_s4 }
   0x6   :  { %4090 = sst [smem:[#allocation8_spill]] %s4050_s5 }
   0x7   :  { %4091 = sst [smem:[#allocation9_spill]] %s4051_s6 }
   0x8   :  { %4092 = sst [smem:[#allocation10_spill]] %s4052_s7 }
   0x9   :  { %4093 = sst [smem:[#allocation11_spill]] %s4053_s8 }
   0xa   :  { %4094 = sst [smem:[#allocation12_spill]] %s4054_s9 }
   0xb   :  { %4095 = sst [smem:[#allocation13_spill]] %s4059_s14 }
   0xc   :  { %4096 = sst [smem:[#allocation14_spill]] %s4060_s15 }
   0xd   :  { %4097 = sst [smem:[#allocation15_spill]] %s4061_s16 }
   0xe LB: > { %4098 = sst [smem:[#allocation2_spill]] %s3281_s29  ;;  %s2946_s2 = sadd.s32 4294967295, %s3281_s29   ;;  %s3281_s29 = sphi %s3424_s29, %s36_s29  }
   0xf   : > { %p2950_p0 = scmp.ge.s32.totalorder %s3281_s29, 1  ;;  %p809_p1 = scmp.lt.s32.totalorder %s3281_s29, 3 }
  0x11   : > { %p810_p2 = pnand %p2950_p0, %p809_p1 }
  0x12   : > { %p941_p3 = scmp.lt.s32.totalorder (!%p810_p2), %s2946_s2, 1  ;;  %s4099_s7 = sld [smem:[#allocation7_spill]] (!%p810_p2)  ;;  %vm1057_vm0 = vcmask (!%p810_p2), 31744   ;;  %v3283_v3 = vmov (!%p810_p2), 0   ;;  %vm1070_vm1 = vcmask (!%p810_p2), 1041408   ;;  %vm1159_vm2 = vcmask (!%p810_p2), 130048  }
  0x13   : > { %813 = sbr.rel (%p810_p2) target bundleno = 2055 (0x807), region = 116  ;;  %s4100_s1 = sld [smem:[#allocation8_spill]] (!%p810_p2)  ;;  %3165 = vset.pattern.permute.xlu1 (!%p810_p2), %v3283_v3  ;;  %3164 = vset.pattern.permute.xlu0 (!%p810_p2), %v3283_v3  ;;  %vm1549_vm3 = vcmask (!%p810_p2), 523264   ;;  %vm2045_vm4 = vcmask (!%p810_p2), 261120  }
  0x14   : > { %s4101_s0 = sld [smem:[#allocation4_spill]] (!%p810_p2)  ;;  %s4102_s14 = sld [smem:[#allocation13_spill]] (!%p810_p2) }
  0x15   : > { %s4103_s5 = sld [smem:[#allocation3_spill]] (!%p810_p2)  ;;  %s4104_s15 = sld [smem:[#allocation14_spill]] (!%p810_p2) }
  0x16   : > { %s4106_s16 = sld [smem:[#allocation15_spill]] (!%p810_p2)  ;;  %s4108_s29 = sld [smem:[#allocation11_spill]] (!%p810_p2) }
  0x17   : > { %s4083_s9 = smov (!%p810_p2), 1  }
  0x18   : > { %v3175_v0 = vld [vmem:[%s4099_s7] sm:$0xff] (!%p810_p2)   ;;  %v3176_v8 = vld [vmem:[%s4099_s7 + $0x8] sm:$0xff] (!%p810_p2)   ;;  %v3177_v16 = vld [vmem:[%s4099_s7 + $0x10] sm:$0xff] (!%p810_p2)  }
  0x19   : > { %v1240_v1 = vld [vmem:[%s4100_s1 + $0x18] sm:$0xff] (!%p810_p2)  ;;  %v1237_v2 = vld [vmem:[%s4100_s1] sm:$0xff] (!%p810_p2)  ;;  %3082 = vmatprep.mubr.msk.bf16.mxu0 (!%p810_p2), %vm1057_vm0, %v3175_v0  ;;  %v1238_v10 = vld [vmem:[%s4100_s1 + $0x8] sm:$0xff] (!%p810_p2) }
  0x1a   : > { %s4117_s2 = smov (!%p941_p3, %s2946_s2), 1  ;;  %1262 = vperm.xlu1 %3165, %v1240_v1   ;;  %1247 = vperm.xlu0 %3164, %v1237_v2   ;;  %v1239_v17 = vld [vmem:[%s4100_s1 + $0x10] sm:$0xff]  ;;  %v3178_v22 = vld [vmem:[%s4099_s7 + $0x18] sm:$0xff]   ;;  %v1242_v26 = vld [vmem:[%s4100_s1 + $0x28] sm:$0xff]  ;;  %v3284_v1 = vmov 1  }
  0x1b   : > { %s2953_s4 = sshll.u32 %s4117_s2, 2  ;;  %s3447_s28 = sshll.u32 %s4117_s2, 6  ;;  %v1241_v27 = vld [vmem:[%s4100_s1 + $0x20] sm:$0xff]  ;;  %v1244_v37 = vld [vmem:[%s4100_s1 + $0x38] sm:$0xff]  ;;  %v1243_v38 = vld [vmem:[%s4100_s1 + $0x30] sm:$0xff] }
  0x1c   : > { %s949_s6 = scalar_lea.vmem %s4101_s0, %s2953_s4  ;;  %s3457_s26 = scalar_lea.vmem %s4102_s14, %s3447_s28  ;;  %v1776_v63 = vld [vmem:[%s4108_s29 + $0x8] sm:$0xff] }
  0x1d   : > { %v1018_v4 = vld [vmem:[%s949_s6] sm:$0xf]  ;;  %s3461_s8 = sshll.u32 %s4117_s2, 4  ;;  %v1294_v6 = vld [vmem:[%s3457_s26 + $0x8] sm:$0xff]  ;;  %s3488_s30 = scalar_lea.vmem %s4104_s15, %s3447_s28  ;;  %v1296_v19 = vld [vmem:[%s3457_s26 + $0x18] sm:$0xff] }
  0x1e   : > { %v1293_v5 = vld [vmem:[%s3457_s26] sm:$0xff]  ;;  %v1036_v7 = vpack.c.bf16 %v1018_v4, %v1018_v4  ;;  %s3471_s0 = scalar_lea.vmem %s4103_s5, %s3461_s8  ;;  %v1302_v15 = vadd.f32 1.0, %v1294_v6  ;;  %1252 = vperm.xlu0 %3164, %v1238_v10   ;;  %v1358_v18 = vld [vmem:[%s3488_s30 + $0x8] sm:$0xff]  ;;  %v1295_v21 = vld [vmem:[%s3457_s26 + $0x10] sm:$0xff]  ;;  %v1304_v23 = vadd.f32 1.0, %v1296_v19  ;;  %s4105_s4 = sld [smem:[#allocation6_spill]] }
  0x1f   : > { %v1301_v9 = vadd.f32 1.0, %v1293_v5  ;;  %v1016_v11 = vld [vmem:[%s3471_s0] sm:$0xff]  ;;  %v1017_v12 = vld [vmem:[%s3471_s0 + $0x8] sm:$0xff]  ;;  %v1303_v25 = vadd.f32 1.0, %v1295_v21  ;;  %v1360_v30 = vld [vmem:[%s3488_s30 + $0x18] sm:$0xff]  ;;  %s3541_s14 = scalar_lea.vmem %s4106_s16, %s3447_s28  ;;  %s3559_s7 = scalar_lea.vmem %s4062_s17, %s3447_s28  ;;  %v3285_v5 = vmov 2  }
  0x20   : > { %3144 = vmatprep.subr.msk.bf16.mxu0 %vm1070_vm1, %v1036_v7  ;;  %v1072_v13 = vsel %vm1070_vm1, %v1036_v7, 0  ;;  %v1027_v14 = vpack.c.bf16 %v1017_v12, %v1016_v11  ;;  %v1357_v20 = vld [vmem:[%s3488_s30] sm:$0xff]  ;;  %v1298_v31 = vld [vmem:[%s3457_s26 + $0x28] sm:$0xff]  ;;  %v1359_v32 = vld [vmem:[%s3488_s30 + $0x10] sm:$0xff]  ;;  %s4109_s3 = smov %s4108_s29  ;;  %s4110_s5 = sld [smem:[#allocation9_spill]] }
  0x21   : > { %1311 = vperm.xlu1 %3165, %v1301_v9   ;;  %3081 = vmatpush3.bf16.msra.mxu0 %v1072_v13  ;;  %v1297_v33 = vld [vmem:[%s3457_s26 + $0x20] sm:$0xff]  ;;  %v1306_v34 = vadd.f32 1.0, %v1298_v31  ;;  %v1362_v39 = vld [vmem:[%s3488_s30 + $0x28] sm:$0xff]  ;;  %v1300_v40 = vld [vmem:[%s3457_s26 + $0x38] sm:$0xff]  ;;  %s3588_s1 = sshll.u32 %s4117_s2, 5  ;;  %s4111_s29 = sld [smem:[#allocation12_spill]] }
  0x22   : > { %3090 = vmatprep.subr.bf16.mxu0 %v1027_v14  ;;  %1257 = vperm.xlu0 %3164, %v1239_v17   ;;  %v1305_v35 = vadd.f32 1.0, %v1297_v33  ;;  %v1361_v41 = vld [vmem:[%s3488_s30 + $0x20] sm:$0xff]  ;;  %v1299_v42 = vld [vmem:[%s3457_s26 + $0x30] sm:$0xff]  ;;  %v1308_v43 = vadd.f32 1.0, %v1300_v40  ;;  %v1364_v45 = vld [vmem:[%s3488_s30 + $0x38] sm:$0xff]  ;;  %s4107_s26 = sld [smem:[#allocation10_spill]]  ;;  %s3594_s6 = scalar_lea.vmem %s4063_s18, %s3588_s1 }
  0x23   : > { %v1307_v44 = vadd.f32 1.0, %v1299_v42  ;;  %v1363_v46 = vld [vmem:[%s3488_s30 + $0x30] sm:$0xff]  ;;  %v1628_v48 = vld [vmem:[%s3541_s14 + $0x8] sm:$0xff]  ;;  %v1627_v50 = vld [vmem:[%s3541_s14] sm:$0xff]  ;;  %s3608_s16 = scalar_lea.vmem %s4064_s19, %s3588_s1  ;;  %s3287_s2 = smov 127  }
  0x24   : > { %3083 = vmatmul.mubr.msk.bf16.vlgmr.msra.gmra.mrb[0].mxu0 %vm1057_vm0, %v3176_v8  ;;  %v3179_v24 = vld [vmem:[%s4105_s4] sm:$0xff]   ;;  %v3180_v28 = vld [vmem:[%s4105_s4 + $0x8] sm:$0xff]   ;;  %v3181_v29 = vld [vmem:[%s4105_s4 + $0x10] sm:$0xff]   ;;  %v1636_v51 = vadd.f32 1.0, %v1628_v48  ;;  %v1635_v52 = vadd.f32 1.0, %v1627_v50  ;;  %s3289_s30 = smov 4  }
  0x25   : > { %1316 = vperm.xlu1 %3165, %v1302_v15   ;;  %3086 = vmatprep.mubr.msk.bf16.mxu0 %vm1057_vm0, %v3177_v16  ;;  %v3182_v36 = vld [vmem:[%s4105_s4 + $0x18] sm:$0xff]   ;;  %v1692_v55 = vld [vmem:[%s3559_s7 + $0x8] sm:$0xff]  ;;  %v1691_v57 = vld [vmem:[%s3559_s7] sm:$0xff]  ;;  %s3688_s4 = scalar_lea.vmem %s4066_s21, %s3447_s28  ;;  %s3290_s15 = smov 8  }
  0x26   : > { %3091 = vmatpush3.bf16.msra.mxu0 %v1027_v14  ;;  %1367 = vperm.xlu0 %3164, %v1357_v20   ;;  %v1630_v56 = vld [vmem:[%s3541_s14 + $0x18] sm:$0xff]  ;;  %v1629_v58 = vld [vmem:[%s3541_s14 + $0x10] sm:$0xff]  ;;  %v3183_v0 = vld [vmem:[%s4110_s5] sm:$0xff]  }
  0x27   : > { %v1638_v59 = vadd.f32 1.0, %v1630_v56  ;;  %v1637_v60 = vadd.f32 1.0, %v1629_v58  ;;  %v1694_v61 = vld [vmem:[%s3559_s7 + $0x18] sm:$0xff]  ;;  %v1693_v62 = vld [vmem:[%s3559_s7 + $0x10] sm:$0xff]  ;;  %3108 = vmatprep.mubr.msk.bf16.mxu1 %vm1549_vm3, %v3183_v0  ;;  %v1775_v2 = vld [vmem:[%s4109_s3] sm:$0xff]  ;;  %s4112_s27 = smov %s4111_s29 }
  0x28   : > { %v1482_v47 = vld [vmem:[%s4107_s26 + $0x8] sm:$0xff]  ;;  %v1481_v49 = vld [vmem:[%s4107_s26] sm:$0xff]  ;;  %v1484_v53 = vld [vmem:[%s4107_s26 + $0x18] sm:$0xff] }
  0x29   : > { %1372 = vperm.xlu1 %3165, %v1358_v18   ;;  %v1483_v54 = vld [vmem:[%s4107_s26 + $0x10] sm:$0xff]  ;;  %v1778_v6 = vld [vmem:[%s4109_s3 + $0x18] sm:$0xff]  ;;  %v1879_v7 = vld [vmem:[%s3594_s6] sm:$0xff] }
  0x2a   : > { %1321 = vperm.xlu0 %3164, %v1303_v25   ;;  %v1777_v4 = vld [vmem:[%s4109_s3 + $0x10] sm:$0xff]  ;;  %v1883_v10 = vadd.f32 1.0, %v1879_v7  ;;  %v1854_v12 = vld [vmem:[%s4111_s29 + $0x18] sm:$0xff]  ;;  %v1851_v14 = vld [vmem:[%s4112_s27] sm:$0xff]  ;;  %s3668_s3 = scalar_lea.vmem %s4065_s20, %s3447_s28 }
  0x2b   : > { %v1912_v15 = vld [vmem:[%s3608_s16 + $0x8] sm:$0xff]  ;;  %v1911_v25 = vld [vmem:[%s3608_s16] sm:$0xff] }
  0x2c   : > { %3087 = vmatmul.mubr.msk.bf16.gmra.mrb[4].mxu0 %vm1057_vm0, %v3178_v22  ;;  %v1852_v18 = vld [vmem:[%s4112_s27 + $0x8] sm:$0xff] }
  0x2d   : > { %1326 = vperm.xlu1 %3165, %v1304_v23   ;;  %3092 = vmatprep.mubr.msk.bf16.mxu0 %vm1159_vm2, %v3179_v24  ;;  %v1880_v19 = vld [vmem:[%s3594_s6 + $0x8] sm:$0xff]  ;;  %v1853_v23 = vld [vmem:[%s4112_s27 + $0x10] sm:$0xff] }
  0x2e   : > { %1267 = vperm.xlu0 %3164, %v1241_v27   ;;  %v1884_v20 = vadd.f32 1.0, %v1880_v19 }
  0x31   : > { %1272 = vperm.xlu1 %3165, %v1242_v26  }
  0x32   : > { %1377 = vperm.xlu0 %3164, %v1359_v32  }
  0x34   : > { %3093 = vmatmul.mubr.msk.bf16.vlgmr.msra.gmra.mrb[0].mxu0 %vm1159_vm2, %v3180_v28 }
  0x35   : > { %1382 = vperm.xlu1 %3165, %v1360_v30   ;;  %3096 = vmatprep.mubr.msk.bf16.mxu0 %vm1159_vm2, %v3181_v29 }
  0x36   : > { %1331 = vperm.xlu0 %3164, %v1305_v35  }
  0x39   : > { %1336 = vperm.xlu1 %3165, %v1306_v34  }
  0x3a   : > { %1277 = vperm.xlu0 %3164, %v1243_v38  }
  0x3c   : > { %3097 = vmatmul.mubr.msk.bf16.gmra.mrb[4].mxu0 %vm1159_vm2, %v3182_v36 }
  0x3d   : > { %1282 = vperm.xlu1 %3165, %v1244_v37  }
  0x3e   : > { %1387 = vperm.xlu0 %3164, %v1361_v41  }
  0x41   : > { %1392 = vperm.xlu1 %3165, %v1362_v39  }
  0x42   : > { %1341 = vperm.xlu0 %3164, %v1307_v44  }
  0x45   : > { %1346 = vperm.xlu1 %3165, %v1308_v43  }
  0x46   : > { %1397 = vperm.xlu0 %3164, %v1363_v46  }
  0x49   : > { %1402 = vperm.xlu1 %3165, %v1364_v45  }
  0x4a   : > { %1491 = vperm.xlu0 %3164, %v1481_v49  }
  0x4d   : > { %1496 = vperm.xlu1 %3165, %v1482_v47  }
  0x4e   : > { %1645 = vperm.xlu0 %3164, %v1635_v52  }
  0x51   : > { %1650 = vperm.xlu1 %3165, %v1636_v51  }
  0x52   : > { %1501 = vperm.xlu0 %3164, %v1483_v54  }
  0x55   : > { %1506 = vperm.xlu1 %3165, %v1484_v53  }
  0x56   : > { %1701 = vperm.xlu0 %3164, %v1691_v57  }
  0x59   : > { %1706 = vperm.xlu1 %3165, %v1692_v55  }
  0x5a   : > { %1655 = vperm.xlu0 %3164, %v1637_v60  }
  0x5d   : > { %1660 = vperm.xlu1 %3165, %v1638_v59  }
  0x5e   : > { %1711 = vperm.xlu0 %3164, %v1693_v62  }
  0x61   : > { %1716 = vperm.xlu1 %3165, %v1694_v61  }
  0x62   : > { %3166 = vset.pattern.permute.xlu0 %v3284_v1 }
  0x63   : > { %1804 = vperm.xlu0 %3166, %v1775_v2  }
  0x65   : > { %1786 = vperm.xlu1 %3165, %v1776_v63  }
  0x67   : > { %1812 = vperm.xlu0 %3166, %v1777_v4  }
  0x69   : > { %3167 = vset.pattern.permute.xlu1 %v3284_v1 }
  0x6a   : > { %1808 = vperm.xlu1 %3167, %v1776_v63  }
  0x6b   : > { %3170 = vset.pattern.permute.xlu0 %v3285_v5 }
  0x6c   : > { %1832 = vperm.xlu0 %3170, %v1776_v63  }
  0x6e   : > { %3168 = vset.pattern.permute.xlu1 %v3285_v5 }
  0x6f   : > { %1828 = vperm.xlu1 %3168, %v1775_v2  }
  0x70   : > { %1840 = vperm.xlu0 %3170, %v1778_v6  }
  0x73   : > { %3169 = vset.pattern.permute.xlu1 %v3283_v3 }
  0x74   : > { %1791 = vperm.xlu1 %3169, %v1777_v4   ;;  %3173 = vset.pattern.permute.xlu0 %v3283_v3 }
  0x75   : > { %1781 = vperm.xlu0 %3173, %v1775_v2  }
  0x78   : > { %1796 = vperm.xlu1 %3169, %v1778_v6  }
  0x79   : > { %1889 = vperm.xlu0 %3173, %v1883_v10  }
  0x7c   : > { %3171 = vset.pattern.permute.xlu1 %v3284_v1 }
  0x7d   : > { %1816 = vperm.xlu1 %3171, %v1778_v6   ;;  %1872 = vperm.xlu0 %3173, %v1854_v12  }
  0x81   : > { %3172 = vset.pattern.permute.xlu1 %v3285_v5  ;;  %1922 = vperm.xlu0 %3173, %v1912_v15  }
  0x82   : > { %1836 = vperm.xlu1 %3172, %v1777_v4  }
  0x86   : > { %3174 = vset.pattern.permute.xlu1 %v3283_v3 }
  0x87   : > { %1857 = vperm.xlu1 %3174, %v1851_v14  }
  0x8b   : > { %1862 = vperm.xlu1 %3174, %v1852_v18  }
  0x8f   : > { %1894 = vperm.xlu1 %3174, %v1884_v20  }
  0x93   : > { %1867 = vperm.xlu1 %3174, %v1853_v23  }
  0x97   : > { %1917 = vperm.xlu1 %3174, %v1911_v25  }
  0x99   : > { %v1248_v8 = vpop.permute.xlu0 %1247  ;;  %v1263_v9 = vpop.permute.xlu1 %1262 }
  0x9d   : > { %v1253_v11 = vpop.permute.xlu0 %1252 }
  0xa0   : > { %v1312_v13 = vpop.permute.xlu1 %1311 }
  0xa1   : > { %v1258_v16 = vpop.permute.xlu0 %1257 }
  0xa4   : > { %v1317_v17 = vpop.permute.xlu1 %1316 }
  0xa5   : > { %v1368_v21 = vpop.permute.xlu0 %1367 }
  0xa8   : > { %v1373_v22 = vpop.permute.xlu1 %1372 }
  0xa9   : > { %v1322_v24 = vpop.permute.xlu0 %1321 }
  0xac   : > { %v1327_v3 = vpop.permute.xlu1 %1326 }
  0xad   : > { %v1268_v26 = vpop.permute.xlu0 %1267 }
  0xb0   : > { %v1273_v27 = vpop.permute.xlu1 %1272 }
  0xb1   : > { %v1378_v28 = vpop.permute.xlu0 %1377 }
  0xb4   : > { %v1383_v29 = vpop.permute.xlu1 %1382 }
  0xb5   : > { %v1332_v30 = vpop.permute.xlu0 %1331 }
  0xb8   : > { %v1337_v31 = vpop.permute.xlu1 %1336 }
  0xb9   : > { %v1278_v32 = vpop.permute.xlu0 %1277 }
  0xbc   : > { %v1283_v33 = vpop.permute.xlu1 %1282 }
  0xbd   : > { %v1388_v34 = vpop.permute.xlu0 %1387 }
  0xc0   : > { %v1393_v38 = vpop.permute.xlu1 %1392 }
  0xc1   : > { %v1342_v48 = vpop.permute.xlu0 %1341 }
  0xc4   : > { %v1347_v53 = vpop.permute.xlu1 %1346 }
  0xc5   : > { %v1398_v2 = vpop.permute.xlu0 %1397 }
 0x107   : > { %v3094_v35 = vpop.f32.mrb[0].mxu0 }
 0x108   : > { %v1287_v36 = vadd.f32 %v3094_v35, %v1258_v16  ;;  %v1206_v37 = vpop.f32.mrb[1].mxu0 }
 0x109   : > { %v1285_v39 = vadd.f32 %v1248_v8, %v1206_v37  ;;  %v3095_v40 = vpop.f32.mrb[2].mxu0  ;;  %v1403_v8 = vpop.permute.xlu1 %1402 }
 0x10a   : > { %v1351_v41 = vmul.f32 %v1322_v24, %v1287_v36  ;;  %v1288_v42 = vadd.f32 %v3095_v40, %v1263_v9  ;;  %v1209_v43 = vpop.f32.mrb[3].mxu0 }
 0x10b   : > { %v1349_v44 = vmul.f32 %v1312_v13, %v1285_v39  ;;  %v1286_v45 = vadd.f32 %v1253_v11, %v1209_v43 }
 0x10c   : > { %v3620_v46 = vadd.f32 %v1378_v28, %v1351_v41  ;;  %v1352_v47 = vmul.f32 %v1327_v3, %v1288_v42 }
 0x10d   : > { %v3622_v49 = vadd.f32 %v1368_v21, %v1349_v44  ;;  %v1350_v50 = vmul.f32 %v1317_v17, %v1286_v45 }
 0x10e   : > { %v2998_v51 = vmul.f32 -1.442695, %v3620_v46  ;;  %v3625_v52 = vadd.f32 %v1383_v29, %v1352_v47 }
 0x10f   : > { %v2996_v54 = vmul.f32 -1.442695, %v3622_v49  ;;  %v3628_v55 = vadd.f32 %v1373_v22, %v1350_v50  ;;  %v3098_v56 = vpop.f32.mrb[4].mxu0 }
 0x110   : > { %3193 = vpow2.f32 %v2998_v51  ;;  %v2999_v57 = vmul.f32 -1.442695, %v3625_v52  ;;  %v1291_v58 = vadd.f32 %v3098_v56, %v1278_v32  ;;  %v1222_v59 = vpop.f32.mrb[5].mxu0 }
 0x111   : > { %3195 = vpow2.f32 %v2996_v54  ;;  %v2997_v60 = vmul.f32 -1.442695, %v3628_v55  ;;  %v1289_v61 = vadd.f32 %v1268_v26, %v1222_v59  ;;  %v3099_v62 = vpop.f32.mrb[6].mxu0  ;;  %v1497_v54 = vpop.permute.xlu1 %1496 }
 0x112   : > { %3197 = vpow2.f32 %v2999_v57  ;;  %v1355_v63 = vmul.f32 %v1342_v48, %v1291_v58  ;;  %v1292_v0 = vadd.f32 %v3099_v62, %v1283_v33  ;;  %v1225_v1 = vpop.f32.mrb[7].mxu0 }
 0x113   : > { %3199 = vpow2.f32 %v2997_v60  ;;  %v1353_v4 = vmul.f32 %v1332_v30, %v1289_v61  ;;  %v1290_v5 = vadd.f32 %v1273_v27, %v1225_v1 }
 0x114   : > { %v1411_v6 = vadd.f32 %v1398_v2, %v1355_v63  ;;  %v1356_v7 = vmul.f32 %v1347_v53, %v1292_v0  ;;  %v1492_v53 = vpop.permute.xlu0 %1491 }
 0x115   : > { %v1409_v9 = vadd.f32 %v1388_v34, %v1353_v4  ;;  %v1354_v10 = vmul.f32 %v1337_v31, %v1290_v5  ;;  %v1651_v56 = vpop.permute.xlu1 %1650 }
 0x116   : > { %v3002_v11 = vmul.f32 -1.442695, %v1411_v6  ;;  %v1412_v12 = vadd.f32 %v1403_v8, %v1356_v7 }
 0x117   : > { %v3000_v13 = vmul.f32 -1.442695, %v1409_v9  ;;  %v1410_v14 = vadd.f32 %v1393_v38, %v1354_v10 }
 0x118   : > { %3201 = vpow2.f32 %v3002_v11  ;;  %v3003_v15 = vmul.f32 -1.442695, %v1412_v12 }
 0x119   : > { %3203 = vpow2.f32 %v3000_v13  ;;  %v3001_v16 = vmul.f32 -1.442695, %v1410_v14  ;;  %v1507_v58 = vpop.permute.xlu1 %1506 }
 0x11a   : > { %v3194_v17 = vpop.eup %3193  ;;  %3205 = vpow2.f32 %v3003_v15 }
 0x11b   : > { %v3196_v18 = vpop.eup %3195  ;;  %v1439_v19 = vadd.f32 1.0, %v3194_v17  ;;  %3207 = vpow2.f32 %v3001_v16  ;;  %v1881_v17 = vld [vmem:[%s3594_s6 + $0x10] sm:$0xff] }
 0x11c   : > { %v3198_v20 = vpop.eup %3197  ;;  %v1437_v21 = vadd.f32 1.0, %v3196_v18 }
 0x11d   : > { %v3200_v22 = vpop.eup %3199  ;;  %3209 = vrcp.f32 %v1439_v19  ;;  %v1440_v23 = vadd.f32 1.0, %v3198_v20  ;;  %v1707_v60 = vpop.permute.xlu1 %1706  ;;  %v1882_v19 = vld [vmem:[%s3594_s6 + $0x18] sm:$0xff]  ;;  %v1885_v20 = vadd.f32 1.0, %v1881_v17  ;;  %s1004_s6 = scalar_lea.vmem %s4068_s23, %s3588_s1 }
 0x11e   : > { %3211 = vrcp.f32 %v1437_v21  ;;  %v1438_v24 = vadd.f32 1.0, %v3200_v22  ;;  %v1886_v21 = vadd.f32 1.0, %v1882_v19  ;;  %v1913_v22 = vld [vmem:[%s3608_s16 + $0x10] sm:$0xff]  ;;  %v1747_v19 = vlaneseq }
 0x11f   : > { %3213 = vrcp.f32 %v1440_v23  ;;  %v1914_v23 = vld [vmem:[%s3608_s16 + $0x18] sm:$0xff]  ;;  %s3288_s16 = smov 2  }
 0x120   : > { %3215 = vrcp.f32 %v1438_v24  ;;  %v1981_v24 = vld [vmem:[%s4056_s11 + $0x20] sm:$0xff] }
 0x121   : > { %v1661_v4 = vpop.permute.xlu1 %1660 }
 0x122   : > { %v3202_v3 = vpop.eup %3201 }
 0x123   : > { %v3204_v25 = vpop.eup %3203  ;;  %v1443_v26 = vadd.f32 1.0, %v3202_v3  ;;  %v2127_v3 = vld [vmem:[%s3668_s3 + $0x20] sm:$0xff] }
 0x124   : > { %v3206_v27 = vpop.eup %3205  ;;  %v1441_v28 = vadd.f32 1.0, %v3204_v25  ;;  %v1982_v25 = vld [vmem:[%s4056_s11 + $0x28] sm:$0xff] }
 0x125   : > { %v3208_v29 = vpop.eup %3207  ;;  %3217 = vrcp.f32 %v1443_v26  ;;  %v1444_v30 = vadd.f32 1.0, %v3206_v27  ;;  %v1717_v13 = vpop.permute.xlu1 %1716  ;;  %v2128_v26 = vld [vmem:[%s3668_s3 + $0x28] sm:$0xff]  ;;  %v2135_v27 = vadd.f32 1.0, %v2127_v3 }
 0x126   : > { %3219 = vrcp.f32 %v1441_v28  ;;  %v1442_v31 = vadd.f32 1.0, %v3208_v29  ;;  %v2136_v28 = vadd.f32 1.0, %v2128_v26  ;;  %v1983_v29 = vld [vmem:[%s4056_s11 + $0x30] sm:$0xff] }
 0x127   : > { %v3210_v32 = vpop.eup %3209  ;;  %3221 = vrcp.f32 %v1444_v30  ;;  %v1984_v30 = vld [vmem:[%s4056_s11 + $0x38] sm:$0xff] }
 0x128   : > { %v3212_v33 = vpop.eup %3211  ;;  %3223 = vrcp.f32 %v1442_v31  ;;  %v1463_v36 = vmul.f32 %v3210_v32, %v3620_v46  ;;  %v2191_v31 = vld [vmem:[%s3688_s4 + $0x20] sm:$0xff]  ;;  %v2129_v32 = vld [vmem:[%s3668_s3 + $0x30] sm:$0xff] }
 0x129   : > { %v3214_v34 = vpop.eup %3213  ;;  %v1461_v38 = vmul.f32 %v3212_v33, %v3622_v49  ;;  %v3184_v49 = vld [vmem:[%s4110_s5 + $0x8] sm:$0xff]  }
 0x12a   : > { %v3216_v35 = vpop.eup %3215  ;;  %v1464_v37 = vmul.f32 %v3214_v34, %v3625_v52  ;;  %v2192_v33 = vld [vmem:[%s3688_s4 + $0x28] sm:$0xff]  ;;  %v2130_v34 = vld [vmem:[%s3668_s3 + $0x38] sm:$0xff] }
 0x12b   : > { %v1462_v39 = vmul.f32 %v3216_v35, %v3628_v55  ;;  %v1646_v55 = vpop.permute.xlu0 %1645  ;;  %v2137_v35 = vadd.f32 1.0, %v2129_v32 }
 0x12c   : > { %v1478_v40 = vpack.c.bf16 %v1464_v37, %v1463_v36  ;;  %v2138_v36 = vadd.f32 1.0, %v2130_v34  ;;  %v2193_v37 = vld [vmem:[%s3688_s4 + $0x30] sm:$0xff] }
 0x12d   : > { %v1477_v41 = vpack.c.bf16 %v1462_v39, %v1461_v38  ;;  %v2194_v38 = vld [vmem:[%s3688_s4 + $0x38] sm:$0xff]  ;;  %v3185_v39 = vld [vmem:[%s4110_s5 + $0x10] sm:$0xff]  }
 0x12f   : > { %v3218_v42 = vpop.eup %3217  ;;  %3100 = vmatprep.subr.bf16.mxu1 %v1477_v41  ;;  %v1502_v57 = vpop.permute.xlu0 %1501 }
 0x130   : > { %v3220_v43 = vpop.eup %3219  ;;  %3101 = vmatpush3.bf16.msra.mxu1 %v1477_v41  ;;  %v1467_v47 = vmul.f32 %v3218_v42, %v1411_v6  ;;  %v1977_v41 = vld [vmem:[%s4056_s11] sm:$0xff] }
 0x131   : > { %v3222_v44 = vpop.eup %3221  ;;  %3102 = vmatprep.subr.bf16.mxu1 %v1478_v40  ;;  %v1465_v50 = vmul.f32 %v3220_v43, %v1409_v9  ;;  %v2123_v42 = vld [vmem:[%s3668_s3] sm:$0xff]  ;;  %v1978_v43 = vld [vmem:[%s4056_s11 + $0x8] sm:$0xff] }
 0x132   : > { %v3224_v45 = vpop.eup %3223  ;;  %v1468_v48 = vmul.f32 %v3222_v44, %v1412_v12  ;;  %v2124_v44 = vld [vmem:[%s3668_s3 + $0x8] sm:$0xff] }
 0x133   : > { %v1466_v51 = vmul.f32 %v3224_v45, %v1410_v14  ;;  %v1702_v59 = vpop.permute.xlu0 %1701  ;;  %v3712_v45 = vpop.permute.xlu1 %1786 }
 0x134   : > { %3103 = vmatpush3.bf16.msra.mxu1 %v1478_v40  ;;  %v1480_v46 = vpack.c.bf16 %v1468_v48, %v1467_v47  ;;  %v3186_v40 = vld [vmem:[%s4110_s5 + $0x18] sm:$0xff]   ;;  %v2131_v47 = vadd.f32 1.0, %v2123_v42  ;;  %v2132_v48 = vadd.f32 1.0, %v2124_v44 }
 0x135   : > { %v1479_v52 = vpack.c.bf16 %v1466_v51, %v1465_v50  ;;  %v1979_v51 = vld [vmem:[%s4056_s11 + $0x10] sm:$0xff] }
 0x137   : > { %3104 = vmatprep.subr.bf16.mxu1 %v1479_v52  ;;  %v1656_v61 = vpop.permute.xlu0 %1655  ;;  %v3714_v50 = vpop.permute.xlu1 %1808 }
 0x138   : > { %3105 = vmatpush3.bf16.msra.mxu1 %v1479_v52  ;;  %v3187_v52 = vld [vmem:[%s4055_s10] sm:$0xff]  }
 0x139   : > { %3106 = vmatprep.subr.bf16.mxu1 %v1480_v46 }
 0x13b   : > { %v1712_v8 = vpop.permute.xlu0 %1711 }
 0x13c   : > { %3107 = vmatpush3.bf16.msra.mxu1 %v1480_v46  ;;  %v1980_v46 = vld [vmem:[%s4056_s11 + $0x18] sm:$0xff] }
 0x13f   : > { %3109 = vmatmul.mubr.msk.bf16.vlgmr.msra.gmra.mrb[0].mxu1 %vm1549_vm3, %v3184_v49  ;;  %v2187_v49 = vld [vmem:[%s3688_s4] sm:$0xff] }
 0x140   : > { %3112 = vmatprep.mubr.msk.bf16.mxu1 %vm1549_vm3, %v3185_v39 }
 0x147   : > { %3113 = vmatmul.mubr.msk.bf16.gmra.mrb[4].mxu1 %vm1549_vm3, %v3186_v40 }
 0x148   : > { %3120 = vmatprep.mubr.msk.bf16.mxu1 %vm2045_vm4, %v3187_v52 }
 0x212   : > { %v3110_v62 = vpop.f32.mrb[0].mxu1 }
 0x213   : > { %v1605_v63 = vadd.f32 %v3110_v62, %v1502_v57  ;;  %v1596_v0 = vpop.f32.mrb[1].mxu1 }
 0x214   : > { %v1597_v1 = vadd.f32 %v1596_v0, %v1492_v53  ;;  %v3111_v2 = vpop.f32.mrb[2].mxu1  ;;  %v2125_v53 = vld [vmem:[%s3668_s3 + $0x10] sm:$0xff] }
 0x215   : > { %v1685_v5 = vmul.f32 %v1656_v61, %v1605_v63  ;;  %v1608_v6 = vadd.f32 %v3111_v2, %v1507_v58  ;;  %v1599_v7 = vpop.f32.mrb[3].mxu1  ;;  %v2133_v57 = vadd.f32 1.0, %v2125_v53  ;;  %v2190_v61 = vld [vmem:[%s3688_s4 + $0x18] sm:$0xff]  ;;  %v1805_v63 = vpop.permute.xlu0 %1804 }
 0x216   : > { %v1683_v9 = vmul.f32 %v1646_v55, %v1597_v1  ;;  %v1600_v14 = vadd.f32 %v1599_v7, %v1497_v54  ;;  %v1829_v54 = vpop.permute.xlu1 %1828  ;;  %v2188_v55 = vld [vmem:[%s3688_s4 + $0x8] sm:$0xff] }
 0x217   : > { %v3640_v10 = vadd.f32 %v1712_v8, %v1685_v5  ;;  %v1686_v12 = vmul.f32 %v1661_v4, %v1608_v6 }
 0x218   : > { %v3642_v11 = vadd.f32 %v1702_v59, %v1683_v9  ;;  %v1684_v16 = vmul.f32 %v1651_v56, %v1600_v14  ;;  %v2126_v56 = vld [vmem:[%s3668_s3 + $0x18] sm:$0xff]  ;;  %s3291_s3 = smov 16  }
 0x219   : > { %1754 = vrot.lane.b32.xlu1 %v3640_v10, %s4083_s9  ;;  %v3647_v15 = vadd.f32 %v1717_v13, %v1686_v12  ;;  %v2134_v58 = vadd.f32 1.0, %v2126_v56  ;;  %v1813_v1 = vpop.permute.xlu0 %1812 }
 0x21a   : > { %1763 = vrot.lane.b32.xlu0 %v3642_v11, %s3287_s2  ;;  %v3656_v18 = vadd.f32 %v1707_v60, %v1684_v16  ;;  %v1792_v59 = vpop.permute.xlu1 %1791  ;;  %v2189_v60 = vld [vmem:[%s3688_s4 + $0x10] sm:$0xff]  ;;  %s3292_s4 = smov 32  }
 0x21d   : > { %1767 = vrot.lane.b32.xlu1 %v3640_v10, %s3287_s2  ;;  %v1833_v4 = vpop.permute.xlu0 %1832 }
 0x21e   : > { %1756 = vrot.lane.b32.xlu0 %v3647_v15, %s4083_s9  ;;  %v1797_v62 = vpop.permute.xlu1 %1796 }
 0x221   : > { %1750 = vrot.lane.b32.xlu1 %v3642_v11, %s4083_s9  ;;  %v1841_v6 = vpop.permute.xlu0 %1840 }
 0x222   : > { %1769 = vrot.lane.b32.xlu0 %v3647_v15, %s3287_s2  ;;  %v1817_v0 = vpop.permute.xlu1 %1816 }
 0x223   : > { %v1822_v53 = vmul.f32 %v1817_v0, %v3647_v15 }
 0x225   : > { %1765 = vrot.lane.b32.xlu1 %v3656_v18, %s3287_s2  ;;  %v1782_v8 = vpop.permute.xlu0 %1781  ;;  %s4113_s2 = smov 1  }
 0x226   : > { %1752 = vrot.lane.b32.xlu0 %v3656_v18, %s4083_s9  ;;  %v1837_v2 = vpop.permute.xlu1 %1836  ;;  %s999_s9 = scalar_lea.vmem %s4067_s22, %s3588_s1 }
 0x229   : > { %1899 = vperm.xlu1 %3174, %v1885_v20   ;;  %v1890_v12 = vpop.permute.xlu0 %1889 }
 0x22a   : > { %1904 = vperm.xlu0 %3173, %v1886_v21   ;;  %v1858_v5 = vpop.permute.xlu1 %1857 }
 0x22d   : > { %1927 = vperm.xlu1 %3174, %v1913_v22   ;;  %v1873_v14 = vpop.permute.xlu0 %1872  ;;  %v3732_v22 = vand.u32 127, %v1747_v19 }
 0x22e   : > { %1932 = vperm.xlu0 %3173, %v1914_v23   ;;  %v1863_v7 = vpop.permute.xlu1 %1862 }
 0x22f   : > { %vm1762_vm5 = vcmp.lt.s32.totalorder %v3732_v22, 127  ;;  %vm1749_vm6 = vcmp.ge.s32.totalorder %v3732_v22, 1  ;;  %vm2311_vm7 = vcmp.ge.s32.totalorder %v3732_v22, 2  ;;  %vm2348_vm8 = vcmp.ge.s32.totalorder %v3732_v22, 4 }
 0x230   : > { %vm2385_vm9 = vcmp.ge.s32.totalorder %v3732_v22, 8  ;;  %vm2422_vm10 = vcmp.ge.s32.totalorder %v3732_v22, 16  ;;  %vm2459_vm11 = vcmp.ge.s32.totalorder %v3732_v22, 32  ;;  %vm2496_vm12 = vcmp.ge.s32.totalorder %v3732_v22, 64  ;;  %v3192_v22 = vld [vmem:[%s4057_s12 + $0x8] sm:$0xff]  }
 0x231   : > { %2007 = vperm.xlu1 %3174, %v1981_v24   ;;  %v1923_v17 = vpop.permute.xlu0 %1922 }
 0x232   : > { %2012 = vperm.xlu0 %3173, %v1982_v25   ;;  %v1895_v9 = vpop.permute.xlu1 %1894 }
 0x235   : > { %2161 = vperm.xlu1 %3174, %v2135_v27  }
 0x236   : > { %2166 = vperm.xlu0 %3173, %v2136_v28   ;;  %v1868_v13 = vpop.permute.xlu1 %1867  ;;  %v1819_v28 = vmul.f32 %v1805_v63, %v3642_v11 }
 0x239   : > { %2017 = vperm.xlu1 %3174, %v1983_v29  }
 0x23a   : > { %2022 = vperm.xlu0 %3173, %v1984_v30   ;;  %v1918_v16 = vpop.permute.xlu1 %1917 }
 0x23d   : > { %2217 = vperm.xlu1 %3174, %v2191_v31  }
 0x23e   : > { %2222 = vperm.xlu0 %3173, %v2192_v33  }
 0x241   : > { %2171 = vperm.xlu1 %3174, %v2137_v35  }
 0x242   : > { %2176 = vperm.xlu0 %3173, %v2138_v36  }
 0x245   : > { %2227 = vperm.xlu1 %3174, %v2193_v37   ;;  %v1820_v37 = vmul.f32 %v3714_v50, %v3656_v18 }
 0x246   : > { %2232 = vperm.xlu0 %3173, %v2194_v38  }
 0x249   : > { %1987 = vperm.xlu1 %3174, %v1977_v41  }
 0x24a   : > { %1992 = vperm.xlu0 %3173, %v1978_v43  }
 0x24d   : > { %2141 = vperm.xlu1 %3174, %v2131_v47  }
 0x24e   : > { %2146 = vperm.xlu0 %3173, %v2132_v48  }
 0x251   : > { %1997 = vperm.xlu1 %3174, %v1979_v51  }
 0x252   : > { %2002 = vperm.xlu0 %3173, %v1980_v46   ;;  %v1821_v46 = vmul.f32 %v1813_v1, %v3640_v10 }
 0x255   : > { %2197 = vperm.xlu1 %3174, %v2187_v49  }
 0x256   : > { %2202 = vperm.xlu0 %3173, %v2188_v55  }
 0x259   : > { %2151 = vperm.xlu1 %3174, %v2133_v57  }
 0x25a   : > { %2156 = vperm.xlu0 %3173, %v2134_v58  }
 0x25d   : > { %2207 = vperm.xlu1 %3174, %v2189_v60  }
 0x25e   : > { %2212 = vperm.xlu0 %3173, %v2190_v61  }
 0x28b   : > { %v1755_v20 = vpop.permute.xlu1 %1754 }
 0x28c   : > { %v1764_v21 = vpop.permute.xlu0 %1763  ;;  %v1760_v11 = vsel %vm1749_vm6, %v1755_v20, 0.0 }
 0x28d   : > { %v1771_v25 = vsel %vm1762_vm5, %v1764_v21, 0.0  ;;  %v1801_v48 = vmul.f32 %v1792_v59, %v1760_v11 }
 0x28e   : > { %v1843_v30 = vmul.f32 %v1829_v54, %v1771_v25 }
 0x28f   : > { %v1768_v23 = vpop.permute.xlu1 %1767  ;;  %v1825_v56 = vadd.f32 %v1821_v46, %v1801_v48 }
 0x290   : > { %v1757_v24 = vpop.permute.xlu0 %1756  ;;  %v1773_v44 = vsel %vm1762_vm5, %v1768_v23, 0.0 }
 0x291   : > { %v1761_v42 = vsel %vm1749_vm6, %v1757_v24, 0.0  ;;  %v1845_v52 = vmul.f32 %v1837_v2, %v1773_v44 }
 0x293   : > { %v1751_v3 = vpop.permute.xlu1 %1750  ;;  %v1849_v60 = vadd.f32 %v1845_v52, %v1825_v56 }
 0x294   : > { %v1758_v26 = vsel %vm1749_vm6, %v1751_v3, 0.0  ;;  %v1770_v27 = vpop.permute.xlu0 %1769 }
 0x295   : > { %v1799_v29 = vmul.f32 %v1782_v8, %v1758_v26  ;;  %v1774_v18 = vsel %vm1762_vm5, %v1770_v27, 0.0 }
 0x296   : > { %v1846_v54 = vmul.f32 %v1841_v6, %v1774_v18 }
 0x297   : > { %v1823_v31 = vadd.f32 %v1819_v28, %v1799_v29  ;;  %v1766_v32 = vpop.permute.xlu1 %1765 }
 0x298   : > { %v1753_v33 = vpop.permute.xlu0 %1752  ;;  %v1772_v35 = vsel %vm1762_vm5, %v1766_v32, 0.0  ;;  %v3189_v32 = vld [vmem:[%s4055_s10 + $0x10] sm:$0xff]  }
 0x299   : > { %v1847_v34 = vadd.f32 %v1843_v30, %v1823_v31  ;;  %v1759_v36 = vsel %vm1749_vm6, %v1753_v33, 0.0  ;;  %v1844_v40 = vmul.f32 %v1833_v4, %v1772_v35  ;;  %v1877_v4 = vadd.f32 %v1868_v13, %v1849_v60  ;;  %v3188_v31 = vld [vmem:[%s4055_s10 + $0x8] sm:$0xff]   ;;  %v3190_v33 = vld [vmem:[%s4055_s10 + $0x18] sm:$0xff]  }
 0x29a   : > { %v1800_v38 = vmul.f32 %v3712_v45, %v1759_v36  ;;  %v1802_v45 = vmul.f32 %v1797_v62, %v1761_v42 }
 0x29b   : > { %v1875_v39 = vadd.f32 %v1858_v5, %v1847_v34  ;;  %v3770_v34 = vpop.f32.mrb[4].mxu1 }
 0x29c   : > { %v1824_v41 = vadd.f32 %v1820_v37, %v1800_v38  ;;  %v1826_v57 = vadd.f32 %v1822_v53, %v1802_v45  ;;  %v3772_v35 = vpop.f32.mrb[5].mxu1 }
 0x29d   : > { %v1907_v43 = vmul.f32 %v1890_v12, %v1875_v39  ;;  %v3774_v36 = vpop.f32.mrb[6].mxu1 }
 0x29e   : > { %v1848_v47 = vadd.f32 %v1844_v40, %v1824_v41  ;;  %v1850_v59 = vadd.f32 %v1846_v54, %v1826_v57  ;;  %v3776_v37 = vpop.f32.mrb[7].mxu1 }
 0x29f   : > { %v1935_v50 = vadd.f32 %v1918_v16, %v1907_v43 }
 0x2a0   : > { %v1876_v51 = vadd.f32 %v1863_v7, %v1848_v47  ;;  %v1878_v5 = vadd.f32 %v1873_v14, %v1850_v59 }
 0x2a1   : > { %v3012_v49 = vmul.f32 -1.442695, %v1935_v50 }
 0x2a2   : > { %v1908_v55 = vmul.f32 %v1895_v9, %v1876_v51 }
 0x2a3   : > { %3225 = vpow2.f32 %v3012_v49 }
 0x2a4   : > { %v1936_v58 = vadd.f32 %v1923_v17, %v1908_v55 }
 0x2a6   : > { %v3013_v61 = vmul.f32 -1.442695, %v1936_v58 }
 0x2a8   : > { %v1900_v63 = vpop.permute.xlu1 %1899  ;;  %3227 = vpow2.f32 %v3013_v61 }
 0x2a9   : > { %v1905_v62 = vpop.permute.xlu0 %1904  ;;  %v1909_v7 = vmul.f32 %v1900_v63, %v1877_v4 }
 0x2aa   : > { %v1910_v10 = vmul.f32 %v1905_v62, %v1878_v5 }
 0x2ac   : > { %v1928_v1 = vpop.permute.xlu1 %1927 }
 0x2ad   : > { %v3226_v2 = vpop.eup %3225  ;;  %v1937_v8 = vadd.f32 %v1928_v1, %v1909_v7  ;;  %v1933_v15 = vpop.permute.xlu0 %1932 }
 0x2ae   : > { %v1938_v0 = vadd.f32 %v1933_v15, %v1910_v10  ;;  %v1951_v9 = vadd.f32 1.0, %v3226_v2 }
 0x2af   : > { %v3014_v6 = vmul.f32 -1.442695, %v1937_v8 }
 0x2b0   : > { %v3015_v12 = vmul.f32 -1.442695, %v1938_v0  ;;  %v2008_v38 = vpop.permute.xlu1 %2007 }
 0x2b1   : > { %3229 = vpow2.f32 %v3014_v6  ;;  %v2013_v39 = vpop.permute.xlu0 %2012 }
 0x2b2   : > { %v3228_v16 = vpop.eup %3227  ;;  %3231 = vpow2.f32 %v3015_v12 }
 0x2b3   : > { %v1952_v17 = vadd.f32 1.0, %v3228_v16  ;;  %3233 = vrcp.f32 %v1951_v9 }
 0x2b4   : > { %v2162_v11 = vpop.permute.xlu1 %2161 }
 0x2b5   : > { %3235 = vrcp.f32 %v1952_v17  ;;  %v2167_v40 = vpop.permute.xlu0 %2166 }
 0x2b8   : > { %v2018_v41 = vpop.permute.xlu1 %2017 }
 0x2b9   : > { %v2023_v42 = vpop.permute.xlu0 %2022 }
 0x2bb   : > { %v3230_v19 = vpop.eup %3229 }
 0x2bc   : > { %v3232_v13 = vpop.eup %3231  ;;  %v1953_v20 = vadd.f32 1.0, %v3230_v19  ;;  %v2218_v43 = vpop.permute.xlu1 %2217 }
 0x2bd   : > { %v3234_v14 = vpop.eup %3233  ;;  %v1954_v21 = vadd.f32 1.0, %v3232_v13  ;;  %v2223_v44 = vpop.permute.xlu0 %2222 }
 0x2be   : > { %3237 = vrcp.f32 %v1953_v20  ;;  %v1963_v24 = vmul.f32 %v3234_v14, %v1935_v50 }
 0x2bf   : > { %v3236_v23 = vpop.eup %3235  ;;  %3239 = vrcp.f32 %v1954_v21 }
 0x2c0   : > { %v1964_v3 = vmul.f32 %v3236_v23, %v1936_v58  ;;  %v2172_v47 = vpop.permute.xlu1 %2171 }
 0x2c1   : > { %v2177_v48 = vpop.permute.xlu0 %2176 }
 0x2c2   : > { %v1975_v25 = vpack.c.bf16 %v1964_v3, %v1963_v24 }
 0x2c4   : > { %3116 = vmatprep.subr.bf16.mxu1 %v1975_v25  ;;  %v2228_v45 = vpop.permute.xlu1 %2227 }
 0x2c5   : > { %3117 = vmatpush3.bf16.msra.mxu1 %v1975_v25  ;;  %v2233_v52 = vpop.permute.xlu0 %2232 }
 0x2c8   : > { %v3238_v26 = vpop.eup %3237  ;;  %v1988_v49 = vpop.permute.xlu1 %1987 }
 0x2c9   : > { %v3240_v27 = vpop.eup %3239  ;;  %v1965_v28 = vmul.f32 %v3238_v26, %v1937_v8  ;;  %v1993_v56 = vpop.permute.xlu0 %1992 }
 0x2ca   : > { %v1966_v29 = vmul.f32 %v3240_v27, %v1938_v0 }
 0x2cc   : > { %v1976_v30 = vpack.c.bf16 %v1966_v29, %v1965_v28  ;;  %v2142_v7 = vpop.permute.xlu1 %2141 }
 0x2cd   : > { %v2147_v15 = vpop.permute.xlu0 %2146 }
 0x2ce   : > { %3118 = vmatprep.subr.bf16.mxu1 %v1976_v30 }
 0x2cf   : > { %3119 = vmatpush3.bf16.msra.mxu1 %v1976_v30 }
 0x2d0   : > { %v1998_v16 = vpop.permute.xlu1 %1997 }
 0x2d1   : > { %v2003_v17 = vpop.permute.xlu0 %2002 }
 0x2d2   : > { %3121 = vmatmul.mubr.msk.bf16.vlgmr.msra.gmra.mrb[8].mxu1 %vm2045_vm4, %v3188_v31 }
 0x2d3   : > { %3124 = vmatprep.mubr.msk.bf16.mxu1 %vm2045_vm4, %v3189_v32 }
 0x2d4   : > { %v2198_v19 = vpop.permute.xlu1 %2197 }
 0x2d5   : > { %v2203_v14 = vpop.permute.xlu0 %2202 }
 0x2d8   : > { %v2152_v28 = vpop.permute.xlu1 %2151 }
 0x2d9   : > { %v2157_v31 = vpop.permute.xlu0 %2156 }
 0x2da   : > { %3125 = vmatmul.mubr.msk.bf16.gmra.mrb[12].mxu1 %vm2045_vm4, %v3190_v33 }
 0x3a5   : > { %v3122_v18 = vpop.f32.mrb[8].mxu1 }
 0x3a6   : > { %v2092_v50 = vpop.f32.mrb[9].mxu1  ;;  %v2101_v26 = vadd.f32 %v3122_v18, %v1998_v16 }
 0x3a7   : > { %v3123_v51 = vpop.f32.mrb[10].mxu1  ;;  %v2093_v29 = vadd.f32 %v2092_v50, %v1988_v49 }
 0x3a8   : > { %v2095_v46 = vpop.f32.mrb[11].mxu1  ;;  %v2104_v30 = vadd.f32 %v3123_v51, %v2003_v17  ;;  %v2181_v33 = vmul.f32 %v2152_v28, %v2101_v26 }
 0x3a9   : > { %v2096_v32 = vadd.f32 %v2095_v46, %v1993_v56 }
 0x3ad   : > { %v3126_v53 = vpop.f32.mrb[12].mxu1 }
 0x3ae   : > { %v2117_v54 = vadd.f32 %v3126_v53, %v2018_v41  ;;  %v2108_v55 = vpop.f32.mrb[13].mxu1 }
 0x3af   : > { %v2109_v57 = vadd.f32 %v2108_v55, %v2008_v38  ;;  %v3127_v58 = vpop.f32.mrb[14].mxu1  ;;  %v2179_v38 = vmul.f32 %v2142_v7, %v2093_v29 }
 0x3b0   : > { %v2185_v60 = vmul.f32 %v2172_v47, %v2117_v54  ;;  %v2120_v59 = vadd.f32 %v3127_v58, %v2023_v42  ;;  %v2111_v61 = vpop.f32.mrb[15].mxu1 }
 0x3b1   : > { %v2183_v63 = vmul.f32 %v2162_v11, %v2109_v57  ;;  %v2112_v4 = vadd.f32 %v2111_v61, %v2013_v39  ;;  %v2182_v39 = vmul.f32 %v2157_v31, %v2104_v30  ;;  %v2208_v11 = vpop.permute.xlu1 %2207 }
 0x3b2   : > { %v2241_v62 = vadd.f32 %v2228_v45, %v2185_v60  ;;  %v2186_v5 = vmul.f32 %v2177_v48, %v2120_v59  ;;  %v2237_v41 = vadd.f32 %v2208_v11, %v2181_v33 }
 0x3b3   : > { %v2239_v10 = vadd.f32 %v2218_v43, %v2183_v63  ;;  %v2184_v1 = vmul.f32 %v2167_v40, %v2112_v4  ;;  %v2180_v40 = vmul.f32 %v2147_v15, %v2096_v32  ;;  %v2213_v43 = vpop.permute.xlu0 %2212 }
 0x3b4   : > { %v3026_v2 = vmul.f32 -1.442695, %v2241_v62  ;;  %v2242_v8 = vadd.f32 %v2233_v52, %v2186_v5  ;;  %v2238_v48 = vadd.f32 %v2213_v43, %v2182_v39 }
 0x3b5   : > { %v3024_v0 = vmul.f32 -1.442695, %v2239_v10  ;;  %v2240_v6 = vadd.f32 %v2223_v44, %v2184_v1  ;;  %v2235_v44 = vadd.f32 %v2198_v19, %v2179_v38  ;;  %v2236_v52 = vadd.f32 %v2203_v14, %v2180_v40 }
 0x3b6   : > { %3241 = vpow2.f32 %v3026_v2  ;;  %v3027_v9 = vmul.f32 -1.442695, %v2242_v8 }
 0x3b7   : > { %3243 = vpow2.f32 %v3024_v0  ;;  %v3025_v12 = vmul.f32 -1.442695, %v2240_v6 }
 0x3b8   : > { %3245 = vpow2.f32 %v3027_v9 }
 0x3b9   : > { %3247 = vpow2.f32 %v3025_v12 }
 0x3c0   : > { %v3242_v13 = vpop.eup %3241 }
 0x3c1   : > { %v3244_v20 = vpop.eup %3243  ;;  %v2257_v21 = vadd.f32 1.0, %v3242_v13 }
 0x3c2   : > { %v3246_v23 = vpop.eup %3245  ;;  %v2255_v24 = vadd.f32 1.0, %v3244_v20 }
 0x3c3   : > { %v3248_v3 = vpop.eup %3247  ;;  %3249 = vrcp.f32 %v2257_v21  ;;  %v2258_v25 = vadd.f32 1.0, %v3246_v23 }
 0x3c4   : > { %3251 = vrcp.f32 %v2255_v24  ;;  %v2256_v27 = vadd.f32 1.0, %v3248_v3 }
 0x3c5   : > { %3253 = vrcp.f32 %v2258_v25 }
 0x3c6   : > { %3255 = vrcp.f32 %v2256_v27 }
 0x3cd   : > { %v3250_v42 = vpop.eup %3249 }
 0x3ce   : > { %v3252_v47 = vpop.eup %3251  ;;  %v2273_v18 = vmul.f32 %v3250_v42, %v2237_v41  ;;  %v2269_v55 = vsub.f32 1.0, %v3250_v42 }
 0x3cf   : > { %v3254_v45 = vpop.eup %3253  ;;  %v2271_v50 = vmul.f32 %v3252_v47, %v2235_v44  ;;  %v2267_v53 = vsub.f32 1.0, %v3252_v47 }
 0x3d0   : > { %v3256_v49 = vpop.eup %3255  ;;  %v2274_v51 = vmul.f32 %v3254_v45, %v2238_v48  ;;  %v2270_v54 = vsub.f32 1.0, %v3254_v45 }
 0x3d1   : > { %2287 = vrot.lane.b32.xlu1 %v2271_v50, %s4113_s2  ;;  %v2272_v46 = vmul.f32 %v3256_v49, %v2236_v52  ;;  %v2268_v56 = vsub.f32 1.0, %v3256_v49 }
 0x3d3   : > { %2289 = vrot.lane.b32.xlu0 %v2272_v46, %s4113_s2 }
 0x3d5   : > { %2291 = vrot.lane.b32.xlu1 %v2273_v18, %s4113_s2 }
 0x3d7   : > { %2293 = vrot.lane.b32.xlu0 %v2274_v51, %s4113_s2 }
 0x3d9   : > { %2275 = vrot.lane.b32.xlu1 %v2267_v53, %s4113_s2 }
 0x3db   : > { %2281 = vrot.lane.b32.xlu0 %v2270_v54, %s4113_s2 }
 0x3dd   : > { %2279 = vrot.lane.b32.xlu1 %v2269_v55, %s4113_s2 }
 0x3df   : > { %2277 = vrot.lane.b32.xlu0 %v2268_v56, %s4113_s2  ;;  %s4114_s2 = sld [smem:[#allocation5_spill]] }
 0x443   : > { %v2288_v57 = vpop.permute.xlu1 %2287 }
 0x444   : > { %v2295_v58 = vsel %vm1749_vm6, %v2288_v57, 0.0 }
 0x445   : > { %v2299_v60 = vmul.f32 %v2295_v58, %v2267_v53  ;;  %v2290_v59 = vpop.permute.xlu0 %2289 }
 0x446   : > { %v2296_v61 = vsel %vm1749_vm6, %v2290_v59, 0.0 }
 0x447   : > { %v2303_v63 = vadd.f32 %v2299_v60, %v2271_v50  ;;  %v2300_v4 = vmul.f32 %v2296_v61, %v2268_v56  ;;  %v2292_v62 = vpop.permute.xlu1 %2291 }
 0x448   : > { %v2297_v5 = vsel %vm1749_vm6, %v2292_v62, 0.0 }
 0x449   : > { %v2304_v7 = vadd.f32 %v2300_v4, %v2272_v46  ;;  %v2301_v10 = vmul.f32 %v2297_v5, %v2269_v55  ;;  %v2294_v1 = vpop.permute.xlu0 %2293  ;;  %2324 = vrot.lane.b32.xlu1 %v2303_v63, %s3288_s16 }
 0x44a   : > { %v2298_v2 = vsel %vm1749_vm6, %v2294_v1, 0.0 }
 0x44b   : > { %v2305_v8 = vadd.f32 %v2301_v10, %v2273_v18  ;;  %v2302_v15 = vmul.f32 %v2298_v2, %v2270_v54  ;;  %2326 = vrot.lane.b32.xlu0 %v2304_v7, %s3288_s16  ;;  %v2276_v0 = vpop.permute.xlu1 %2275 }
 0x44c   : > { %v2283_v6 = vsel %vm1749_vm6, %v2276_v0, 1.0 }
 0x44d   : > { %v2306_v9 = vadd.f32 %v2302_v15, %v2274_v51  ;;  %v2282_v12 = vpop.permute.xlu0 %2281  ;;  %2328 = vrot.lane.b32.xlu1 %v2305_v8, %s3288_s16  ;;  %v2307_v16 = vmul.f32 %v2283_v6, %v2267_v53 }
 0x44e   : > { %v2286_v23 = vsel %vm1749_vm6, %v2282_v12, 1.0 }
 0x44f   : > { %2330 = vrot.lane.b32.xlu0 %v2306_v9, %s3288_s16  ;;  %v2280_v17 = vpop.permute.xlu1 %2279  ;;  %v2310_v24 = vmul.f32 %v2286_v23, %v2270_v54 }
 0x450   : > { %v2285_v19 = vsel %vm1749_vm6, %v2280_v17, 1.0 }
 0x451   : > { %v2278_v13 = vpop.permute.xlu0 %2277  ;;  %2312 = vrot.lane.b32.xlu1 %v2307_v16, %s3288_s16  ;;  %v2309_v14 = vmul.f32 %v2285_v19, %v2269_v55 }
 0x452   : > { %v2284_v20 = vsel %vm1749_vm6, %v2278_v13, 1.0 }
 0x453   : > { %v2308_v21 = vmul.f32 %v2284_v20, %v2268_v56 }
 0x455   : > { %2314 = vrot.lane.b32.xlu0 %v2308_v21, %s3288_s16  ;;  %2316 = vrot.lane.b32.xlu1 %v2309_v14, %s3288_s16 }
 0x459   : > { %2318 = vrot.lane.b32.xlu0 %v2310_v24, %s3288_s16  ;;  %s954_s16 = scalar_lea.vmem %s4114_s2, %s3461_s8 }
 0x4bb   : > { %v2325_v3 = vpop.permute.xlu1 %2324 }
 0x4bc   : > { %v2332_v25 = vsel %vm2311_vm7, %v2325_v3, 0.0 }
 0x4bd   : > { %v2336_v26 = vmul.f32 %v2332_v25, %v2307_v16  ;;  %v2327_v27 = vpop.permute.xlu0 %2326 }
 0x4be   : > { %v2333_v28 = vsel %vm2311_vm7, %v2327_v27, 0.0 }
 0x4bf   : > { %v2340_v29 = vadd.f32 %v2336_v26, %v2303_v63  ;;  %v2337_v30 = vmul.f32 %v2333_v28, %v2308_v21  ;;  %v2329_v31 = vpop.permute.xlu1 %2328 }
 0x4c0   : > { %v2334_v32 = vsel %vm2311_vm7, %v2329_v31, 0.0 }
 0x4c1   : > { %v2341_v33 = vadd.f32 %v2337_v30, %v2304_v7  ;;  %v2338_v38 = vmul.f32 %v2334_v32, %v2309_v14  ;;  %v2331_v39 = vpop.permute.xlu0 %2330  ;;  %2361 = vrot.lane.b32.xlu1 %v2340_v29, %s3289_s30 }
 0x4c2   : > { %v2335_v11 = vsel %vm2311_vm7, %v2331_v39, 0.0 }
 0x4c3   : > { %v2342_v40 = vadd.f32 %v2338_v38, %v2305_v8  ;;  %v2339_v41 = vmul.f32 %v2335_v11, %v2310_v24  ;;  %2363 = vrot.lane.b32.xlu0 %v2341_v33, %s3289_s30  ;;  %v2313_v42 = vpop.permute.xlu1 %2312 }
 0x4c4   : > { %v2320_v43 = vsel %vm2311_vm7, %v2313_v42, 1.0 }
 0x4c5   : > { %v2343_v44 = vadd.f32 %v2339_v41, %v2306_v9  ;;  %2365 = vrot.lane.b32.xlu1 %v2342_v40, %s3289_s30  ;;  %v2344_v47 = vmul.f32 %v2320_v43, %v2307_v16 }
 0x4c7   : > { %2367 = vrot.lane.b32.xlu0 %v2343_v44, %s3289_s30  ;;  %v2315_v48 = vpop.permute.xlu0 %2314  ;;  %v2317_v18 = vpop.permute.xlu1 %2316 }
 0x4c8   : > { %v2321_v45 = vsel %vm2311_vm7, %v2315_v48, 1.0  ;;  %v2322_v52 = vsel %vm2311_vm7, %v2317_v18, 1.0 }
 0x4c9   : > { %v2345_v50 = vmul.f32 %v2321_v45, %v2308_v21  ;;  %2349 = vrot.lane.b32.xlu1 %v2344_v47, %s3289_s30  ;;  %v2346_v49 = vmul.f32 %v2322_v52, %v2309_v14 }
 0x4cb   : > { %2351 = vrot.lane.b32.xlu0 %v2345_v50, %s3289_s30  ;;  %v2319_v51 = vpop.permute.xlu0 %2318 }
 0x4cc   : > { %v2323_v46 = vsel %vm2311_vm7, %v2319_v51, 1.0 }
 0x4cd   : > { %v2347_v53 = vmul.f32 %v2323_v46, %v2310_v24  ;;  %2353 = vrot.lane.b32.xlu1 %v2346_v49, %s3289_s30 }
 0x4cf   : > { %2355 = vrot.lane.b32.xlu0 %v2347_v53, %s3289_s30 }
 0x533   : > { %v2362_v54 = vpop.permute.xlu1 %2361 }
 0x534   : > { %v2369_v55 = vsel %vm2348_vm8, %v2362_v54, 0.0 }
 0x535   : > { %v2373_v56 = vmul.f32 %v2369_v55, %v2344_v47  ;;  %v2364_v57 = vpop.permute.xlu0 %2363 }
 0x536   : > { %v2370_v58 = vsel %vm2348_vm8, %v2364_v57, 0.0 }
 0x537   : > { %v2377_v60 = vadd.f32 %v2373_v56, %v2340_v29  ;;  %v2374_v59 = vmul.f32 %v2370_v58, %v2345_v50  ;;  %v2366_v61 = vpop.permute.xlu1 %2365 }
 0x538   : > { %v2371_v63 = vsel %vm2348_vm8, %v2366_v61, 0.0 }
 0x539   : > { %v2378_v4 = vadd.f32 %v2374_v59, %v2341_v33  ;;  %v2375_v62 = vmul.f32 %v2371_v63, %v2346_v49  ;;  %v2368_v5 = vpop.permute.xlu0 %2367  ;;  %2398 = vrot.lane.b32.xlu1 %v2377_v60, %s3290_s15 }
 0x53a   : > { %v2372_v7 = vsel %vm2348_vm8, %v2368_v5, 0.0 }
 0x53b   : > { %v2379_v10 = vadd.f32 %v2375_v62, %v2342_v40  ;;  %v2376_v1 = vmul.f32 %v2372_v7, %v2347_v53  ;;  %2400 = vrot.lane.b32.xlu0 %v2378_v4, %s3290_s15  ;;  %v2350_v2 = vpop.permute.xlu1 %2349 }
 0x53c   : > { %v2357_v8 = vsel %vm2348_vm8, %v2350_v2, 1.0  ;;  %v1486_v2 = vld [vmem:[%s4107_s26 + $0x28] sm:$0xff] }
 0x53d   : > { %v2380_v15 = vadd.f32 %v2376_v1, %v2343_v44  ;;  %v2352_v0 = vpop.permute.xlu0 %2351  ;;  %2402 = vrot.lane.b32.xlu1 %v2379_v10, %s3290_s15  ;;  %v2381_v9 = vmul.f32 %v2357_v8, %v2344_v47  ;;  %v1631_v1 = vld [vmem:[%s3541_s14 + $0x20] sm:$0xff]  ;;  %v1632_v8 = vld [vmem:[%s3541_s14 + $0x28] sm:$0xff] }
 0x53e   : > { %v2358_v6 = vsel %vm2348_vm8, %v2352_v0, 1.0  ;;  %v1640_v0 = vadd.f32 1.0, %v1632_v8 }
 0x53f   : > { %2404 = vrot.lane.b32.xlu0 %v2380_v15, %s3290_s15  ;;  %v2354_v12 = vpop.permute.xlu1 %2353  ;;  %v2382_v17 = vmul.f32 %v2358_v6, %v2345_v50  ;;  %v1487_v6 = vld [vmem:[%s4107_s26 + $0x30] sm:$0xff] }
 0x540   : > { %v2359_v16 = vsel %vm2348_vm8, %v2354_v12, 1.0  ;;  %v1695_v12 = vld [vmem:[%s3559_s7 + $0x20] sm:$0xff] }
 0x541   : > { %v2356_v19 = vpop.permute.xlu0 %2355  ;;  %2386 = vrot.lane.b32.xlu1 %v2381_v9, %s3290_s15  ;;  %v2383_v20 = vmul.f32 %v2359_v16, %v2346_v49  ;;  %v1633_v16 = vld [vmem:[%s3541_s14 + $0x30] sm:$0xff] }
 0x542   : > { %v2360_v13 = vsel %vm2348_vm8, %v2356_v19, 1.0  ;;  %v1634_v19 = vld [vmem:[%s3541_s14 + $0x38] sm:$0xff]  ;;  %s3293_s14 = smov 64  }
 0x543   : > { %2388 = vrot.lane.b32.xlu0 %v2382_v17, %s3290_s15  ;;  %v2384_v14 = vmul.f32 %v2360_v13, %v2347_v53  ;;  %v1641_v13 = vadd.f32 1.0, %v1633_v16 }
 0x545   : > { %2390 = vrot.lane.b32.xlu1 %v2383_v20, %s3290_s15 }
 0x547   : > { %2392 = vrot.lane.b32.xlu0 %v2384_v14, %s3290_s15 }
 0x5ab   : > { %v2399_v21 = vpop.permute.xlu1 %2398 }
 0x5ac   : > { %v2406_v23 = vsel %vm2385_vm9, %v2399_v21, 0.0 }
 0x5ad   : > { %v2410_v24 = vmul.f32 %v2406_v23, %v2381_v9  ;;  %v2401_v3 = vpop.permute.xlu0 %2400  ;;  %v1697_v23 = vld [vmem:[%s3559_s7 + $0x30] sm:$0xff] }
 0x5ae   : > { %v2407_v25 = vsel %vm2385_vm9, %v2401_v3, 0.0  ;;  %v1698_v3 = vld [vmem:[%s3559_s7 + $0x38] sm:$0xff] }
 0x5af   : > { %v2414_v26 = vadd.f32 %v2410_v24, %v2377_v60  ;;  %v2411_v27 = vmul.f32 %v2407_v25, %v2382_v17  ;;  %v2403_v28 = vpop.permute.xlu1 %2402 }
 0x5b0   : > { %v2408_v29 = vsel %vm2385_vm9, %v2403_v28, 0.0 }
 0x5b1   : > { %v2415_v30 = vadd.f32 %v2411_v27, %v2378_v4  ;;  %v2412_v31 = vmul.f32 %v2408_v29, %v2383_v20  ;;  %v2405_v32 = vpop.permute.xlu0 %2404  ;;  %2435 = vrot.lane.b32.xlu1 %v2414_v26, %s3291_s3 }
 0x5b2   : > { %v2409_v33 = vsel %vm2385_vm9, %v2405_v32, 0.0 }
 0x5b3   : > { %v2416_v38 = vadd.f32 %v2412_v31, %v2379_v10  ;;  %v2413_v39 = vmul.f32 %v2409_v33, %v2384_v14  ;;  %2437 = vrot.lane.b32.xlu0 %v2415_v30, %s3291_s3  ;;  %v2387_v11 = vpop.permute.xlu1 %2386  ;;  %v1485_v10 = vld [vmem:[%s4107_s26 + $0x20] sm:$0xff] }
 0x5b4   : > { %v2394_v40 = vsel %vm2385_vm9, %v2387_v11, 1.0 }
 0x5b5   : > { %v2417_v41 = vadd.f32 %v2413_v39, %v2380_v15  ;;  %v2389_v42 = vpop.permute.xlu0 %2388  ;;  %2439 = vrot.lane.b32.xlu1 %v2416_v38, %s3291_s3  ;;  %v3849_v44 = vmul.f32 %v2394_v40, %v2381_v9  ;;  %v1639_v15 = vadd.f32 1.0, %v1631_v1  ;;  %v1488_v9 = vld [vmem:[%s4107_s26 + $0x38] sm:$0xff] }
 0x5b6   : > { %v2395_v43 = vsel %vm2385_vm9, %v2389_v42, 1.0  ;;  %v2679_v1 = vld [vmem:[%s1004_s6 + $0x18] sm:$0xff] }
 0x5b7   : > { %2441 = vrot.lane.b32.xlu0 %v2417_v41, %s3291_s3  ;;  %v2391_v47 = vpop.permute.xlu1 %2390  ;;  %v3853_v18 = vmul.f32 %v2395_v43, %v2382_v17  ;;  %v1696_v17 = vld [vmem:[%s3559_s7 + $0x28] sm:$0xff]  ;;  %s1014_s7 = scalar_lea.vmem %s4070_s25, %s3461_s8 }
 0x5b8   : > { %v2396_v48 = vsel %vm2385_vm9, %v2391_v47, 1.0 }
 0x5b9   : > { %v2393_v45 = vpop.permute.xlu0 %2392  ;;  %2423 = vrot.lane.b32.xlu1 %v3849_v44, %s3291_s3  ;;  %v3858_v50 = vmul.f32 %v2396_v48, %v2383_v20 }
 0x5ba   : > { %v2397_v52 = vsel %vm2385_vm9, %v2393_v45, 1.0 }
 0x5bb   : > { %2425 = vrot.lane.b32.xlu0 %v3853_v18, %s3291_s3  ;;  %v3861_v49 = vmul.f32 %v2397_v52, %v2384_v14  ;;  %v1642_v14 = vadd.f32 1.0, %v1634_v19 }
 0x5bd   : > { %2427 = vrot.lane.b32.xlu1 %v3858_v50, %s3291_s3 }
 0x5bf   : > { %2429 = vrot.lane.b32.xlu0 %v3861_v49, %s3291_s3 }
 0x623   : > { %v2436_v51 = vpop.permute.xlu1 %2435 }
 0x624   : > { %v2443_v46 = vsel %vm2422_vm10, %v2436_v51, 0.0  ;;  %v3191_v51 = vld [vmem:[%s4057_s12] sm:$0xff]  }
 0x625   : > { %v2447_v53 = vmul.f32 %v2443_v46, %v3849_v44  ;;  %v2438_v54 = vpop.permute.xlu0 %2437  ;;  %3132 = vmatprep.mubr.msk.bf16.mxu0 %vm2045_vm4, %v3191_v51 }
 0x626   : > { %v2444_v55 = vsel %vm2422_vm10, %v2438_v54, 0.0  ;;  %v2556_v54 = vld [vmem:[%s4058_s13 + $0x8] sm:$0xff] }
 0x627   : > { %v3871_v56 = vadd.f32 %v2447_v53, %v2414_v26  ;;  %v2448_v57 = vmul.f32 %v2444_v55, %v3853_v18  ;;  %v2440_v58 = vpop.permute.xlu1 %2439  ;;  %v2555_v53 = vld [vmem:[%s4058_s13] sm:$0xff]  ;;  %v2557_v55 = vld [vmem:[%s4058_s13 + $0x10] sm:$0xff] }
 0x628   : > { %v2445_v60 = vsel %vm2422_vm10, %v2440_v58, 0.0  ;;  %v2645_v58 = vld [vmem:[%s999_s9 + $0x8] sm:$0xff] }
 0x629   : > { %v3876_v59 = vadd.f32 %v2448_v57, %v2415_v30  ;;  %v2449_v61 = vmul.f32 %v2445_v60, %v3858_v50  ;;  %v2442_v63 = vpop.permute.xlu0 %2441  ;;  %2472 = vrot.lane.b32.xlu1 %v3871_v56, %s3292_s4  ;;  %v2558_v57 = vld [vmem:[%s4058_s13 + $0x18] sm:$0xff] }
 0x62a   : > { %v2446_v4 = vsel %vm2422_vm10, %v2442_v63, 0.0  ;;  %v2647_v63 = vld [vmem:[%s999_s9 + $0x18] sm:$0xff] }
 0x62b   : > { %v3883_v62 = vadd.f32 %v2449_v61, %v2416_v38  ;;  %v2450_v5 = vmul.f32 %v2446_v4, %v3861_v49  ;;  %2474 = vrot.lane.b32.xlu0 %v3876_v59, %s3292_s4  ;;  %v2424_v20 = vpop.permute.xlu1 %2423  ;;  %v2649_v61 = vadd.f32 1.0, %v2645_v58 }
 0x62c   : > { %v2431_v24 = vsel %vm2422_vm10, %v2424_v20, 1.0 }
 0x62d   : > { %v3888_v7 = vadd.f32 %v2450_v5, %v2417_v41  ;;  %2476 = vrot.lane.b32.xlu1 %v3883_v62, %s3292_s4  ;;  %v2426_v21 = vpop.permute.xlu0 %2425  ;;  %v3919_v27 = vmul.f32 %v2431_v24, %v3849_v44  ;;  %v2676_v5 = vld [vmem:[%s1004_s6] sm:$0xff] }
 0x62e   : > { %v2432_v26 = vsel %vm2422_vm10, %v2426_v21, 1.0 }
 0x62f   : > { %2478 = vrot.lane.b32.xlu0 %v3888_v7, %s3292_s4  ;;  %v2428_v25 = vpop.permute.xlu1 %2427  ;;  %v3924_v30 = vmul.f32 %v2432_v26, %v3853_v18 }
 0x630   : > { %v2433_v29 = vsel %vm2422_vm10, %v2428_v25, 1.0 }
 0x631   : > { %1511 = vperm.xlu1 %3174, %v1485_v10   ;;  %v2430_v28 = vpop.permute.xlu0 %2429  ;;  %v3931_v32 = vmul.f32 %v2433_v29, %v3858_v50  ;;  %v2678_v10 = vld [vmem:[%s1004_s6 + $0x10] sm:$0xff] }
 0x632   : > { %v2434_v31 = vsel %vm2422_vm10, %v2430_v28, 1.0 }
 0x633   : > { %1516 = vperm.xlu0 %3173, %v1486_v2   ;;  %v3936_v33 = vmul.f32 %v2434_v31, %v3861_v49 }
 0x635   : > { %1665 = vperm.xlu1 %3174, %v1639_v15  }
 0x637   : > { %1670 = vperm.xlu0 %3173, %v1640_v0  }
 0x639   : > { %1521 = vperm.xlu1 %3174, %v1487_v6  }
 0x63b   : > { %1526 = vperm.xlu0 %3173, %v1488_v9  }
 0x63d   : > { %1721 = vperm.xlu1 %3174, %v1695_v12  }
 0x63f   : > { %1726 = vperm.xlu0 %3173, %v1696_v17  }
 0x641   : > { %1675 = vperm.xlu1 %3174, %v1641_v13  }
 0x643   : > { %1680 = vperm.xlu0 %3173, %v1642_v14  }
 0x645   : > { %1731 = vperm.xlu1 %3174, %v1697_v23  }
 0x647   : > { %1736 = vperm.xlu0 %3173, %v1698_v3  }
 0x649   : > { %2460 = vrot.lane.b32.xlu1 %v3919_v27, %s3292_s4 }
 0x64b   : > { %2462 = vrot.lane.b32.xlu0 %v3924_v30, %s3292_s4 }
 0x64d   : > { %2464 = vrot.lane.b32.xlu1 %v3931_v32, %s3292_s4 }
 0x64f   : > { %2466 = vrot.lane.b32.xlu0 %v3936_v33, %s3292_s4  ;;  %s1009_s4 = scalar_lea.vmem %s4069_s24, %s3461_s8 }
 0x69b   : > { %v2473_v38 = vpop.permute.xlu1 %2472 }
 0x69c   : > { %v2480_v39 = vsel %vm2459_vm11, %v2473_v38, 0.0 }
 0x69d   : > { %v2484_v11 = vmul.f32 %v2480_v39, %v3919_v27  ;;  %v2475_v40 = vpop.permute.xlu0 %2474 }
 0x69e   : > { %v2481_v41 = vsel %vm2459_vm11, %v2475_v40, 0.0 }
 0x69f   : > { %v3949_v42 = vadd.f32 %v2484_v11, %v3871_v56  ;;  %v2485_v43 = vmul.f32 %v2481_v41, %v3924_v30  ;;  %v2477_v44 = vpop.permute.xlu1 %2476  ;;  %v2644_v56 = vld [vmem:[%s999_s9] sm:$0xff] }
 0x6a0   : > { %v2482_v47 = vsel %vm2459_vm11, %v2477_v44, 0.0  ;;  %v2648_v60 = vadd.f32 1.0, %v2644_v56 }
 0x6a1   : > { %v3955_v48 = vadd.f32 %v2485_v43, %v3876_v59  ;;  %v2486_v18 = vmul.f32 %v2482_v47, %v3931_v32  ;;  %v2479_v45 = vpop.permute.xlu0 %2478  ;;  %2497 = vrot.lane.b32.xlu1 %v3949_v42, %s3293_s14  ;;  %v2646_v59 = vld [vmem:[%s999_s9 + $0x10] sm:$0xff] }
 0x6a2   : > { %v2483_v52 = vsel %vm2459_vm11, %v2479_v45, 0.0  ;;  %v2650_v4 = vadd.f32 1.0, %v2646_v59 }
 0x6a3   : > { %v3962_v50 = vadd.f32 %v2486_v18, %v3883_v62  ;;  %v2487_v49 = vmul.f32 %v2483_v52, %v3936_v33  ;;  %2499 = vrot.lane.b32.xlu0 %v3955_v48, %s3293_s14  ;;  %v2651_v62 = vadd.f32 1.0, %v2647_v63 }
 0x6a5   : > { %v3970_v46 = vadd.f32 %v2487_v49, %v3888_v7  ;;  %2501 = vrot.lane.b32.xlu1 %v3962_v50, %s3293_s14  ;;  %v2677_v7 = vld [vmem:[%s1004_s6 + $0x8] sm:$0xff] }
 0x6a7   : > { %2503 = vrot.lane.b32.xlu0 %v3970_v46, %s3293_s14 }
 0x6a9   : > { %2561 = vperm.xlu1 %3174, %v2555_v53  }
 0x6ab   : > { %2566 = vperm.xlu0 %3173, %v2556_v54  }
 0x6ad   : > { %2571 = vperm.xlu1 %3174, %v2557_v55  }
 0x6af   : > { %2576 = vperm.xlu0 %3173, %v2558_v57  }
 0x6b0   : > { %v1512_v2 = vpop.permute.xlu1 %1511 }
 0x6b1   : > { %2654 = vperm.xlu1 %3174, %v2648_v60   ;;  %v1613_v19 = vadd.f32 %v3772_v35, %v1512_v2 }
 0x6b2   : > { %v1517_v8 = vpop.permute.xlu0 %1516 }
 0x6b3   : > { %2659 = vperm.xlu0 %3173, %v2649_v61   ;;  %v1616_v20 = vadd.f32 %v3776_v37, %v1517_v8 }
 0x6b4   : > { %v1666_v15 = vpop.permute.xlu1 %1665 }
 0x6b5   : > { %2664 = vperm.xlu1 %3174, %v2650_v4   ;;  %v1687_v14 = vmul.f32 %v1666_v15, %v1613_v19 }
 0x6b6   : > { %v1671_v0 = vpop.permute.xlu0 %1670 }
 0x6b7   : > { %2669 = vperm.xlu0 %3173, %v2651_v62   ;;  %v1688_v21 = vmul.f32 %v1671_v0, %v1616_v20 }
 0x6b8   : > { %v1522_v6 = vpop.permute.xlu1 %1521 }
 0x6b9   : > { %2682 = vperm.xlu1 %3174, %v2676_v5   ;;  %v1621_v23 = vadd.f32 %v3770_v34, %v1522_v6 }
 0x6ba   : > { %v1527_v9 = vpop.permute.xlu0 %1526 }
 0x6bb   : > { %2687 = vperm.xlu0 %3173, %v2677_v7   ;;  %v1624_v25 = vadd.f32 %v3774_v36, %v1527_v9 }
 0x6bc   : > { %v1722_v12 = vpop.permute.xlu1 %1721 }
 0x6bd   : > { %2692 = vperm.xlu1 %3174, %v2678_v10   ;;  %v1743_v24 = vadd.f32 %v1722_v12, %v1687_v14 }
 0x6be   : > { %v1727_v16 = vpop.permute.xlu0 %1726 }
 0x6bf   : > { %2697 = vperm.xlu0 %3173, %v2679_v1   ;;  %v1744_v26 = vadd.f32 %v1727_v16, %v1688_v21  ;;  %v3028_v31 = vmul.f32 -1.442695, %v1743_v24 }
 0x6c0   : > { %v1676_v17 = vpop.permute.xlu1 %1675 }
 0x6c1   : > { %v1689_v28 = vmul.f32 %v1676_v17, %v1621_v23  ;;  %v3029_v11 = vmul.f32 -1.442695, %v1744_v26  ;;  %3257 = vpow2.f32 %v3028_v31 }
 0x6c2   : > { %v1681_v13 = vpop.permute.xlu0 %1680 }
 0x6c3   : > { %v1690_v38 = vmul.f32 %v1681_v13, %v1624_v25  ;;  %3259 = vpow2.f32 %v3029_v11 }
 0x6c4   : > { %v1732_v3 = vpop.permute.xlu1 %1731 }
 0x6c5   : > { %v1745_v39 = vadd.f32 %v1732_v3, %v1689_v28 }
 0x6c6   : > { %v1737_v29 = vpop.permute.xlu0 %1736 }
 0x6c7   : > { %v1746_v40 = vadd.f32 %v1737_v29, %v1690_v38  ;;  %v3030_v35 = vmul.f32 -1.442695, %v1745_v39 }
 0x6c8   : > { %v2461_v18 = vpop.permute.xlu1 %2460 }
 0x6c9   : > { %v3031_v37 = vmul.f32 -1.442695, %v1746_v40  ;;  %3261 = vpow2.f32 %v3030_v35  ;;  %v2468_v53 = vsel %vm2459_vm11, %v2461_v18, 1.0  ;;  %v2708_v18 = vld [vmem:[%s954_s16] sm:$0xff] }
 0x6ca   : > { %v2463_v52 = vpop.permute.xlu0 %2462  ;;  %v2492_v56 = vmul.f32 %v2468_v53, %v3919_v27 }
 0x6cb   : > { %3263 = vpow2.f32 %v3031_v37  ;;  %v3258_v41 = vpop.eup %3257  ;;  %v2469_v55 = vsel %vm2459_vm11, %v2463_v52, 1.0 }
 0x6cc   : > { %v2529_v43 = vadd.f32 1.0, %v3258_v41  ;;  %v2465_v51 = vpop.permute.xlu1 %2464  ;;  %v2493_v61 = vmul.f32 %v2469_v55, %v3924_v30  ;;  %v2709_v55 = vld [vmem:[%s954_s16 + $0x8] sm:$0xff] }
 0x6cd   : > { %v3260_v34 = vpop.eup %3259  ;;  %v2470_v60 = vsel %vm2459_vm11, %v2465_v51, 1.0 }
 0x6ce   : > { %v2530_v47 = vadd.f32 1.0, %v3260_v34  ;;  %3265 = vrcp.f32 %v2529_v43  ;;  %v2467_v54 = vpop.permute.xlu0 %2466  ;;  %v2494_v10 = vmul.f32 %v2470_v60, %v3931_v32  ;;  %v3273_v60 = vld [vmem:[%s3471_s0] sm:$0xff] }
 0x6cf   : > { %v2471_v63 = vsel %vm2459_vm11, %v2467_v54, 1.0 }
 0x6d0   : > { %3267 = vrcp.f32 %v2530_v47  ;;  %v2495_v0 = vmul.f32 %v2471_v63, %v3936_v33 }
 0x6d3   : > { %v3262_v44 = vpop.eup %3261 }
 0x6d4   : > { %v2531_v45 = vadd.f32 1.0, %v3262_v44 }
 0x6d5   : > { %v3264_v36 = vpop.eup %3263 }
 0x6d6   : > { %v2532_v49 = vadd.f32 1.0, %v3264_v36  ;;  %3269 = vrcp.f32 %v2531_v45 }
 0x6d8   : > { %3271 = vrcp.f32 %v2532_v49  ;;  %v3266_v58 = vpop.eup %3265 }
 0x6d9   : > { %v2541_v27 = vmul.f32 %v3266_v58, %v1743_v24 }
 0x6da   : > { %v3268_v5 = vpop.eup %3267 }
 0x6db   : > { %v2542_v6 = vmul.f32 %v3268_v5, %v1744_v26 }
 0x6e0   : > { %v3270_v15 = vpop.eup %3269 }
 0x6e1   : > { %v2543_v13 = vmul.f32 %v3270_v15, %v1745_v39 }
 0x6e2   : > { %v3272_v19 = vpop.eup %3271 }
 0x6e3   : > { %v2544_v21 = vmul.f32 %v3272_v19, %v1746_v40 }
 0x713   : > { %v2498_v57 = vpop.permute.xlu1 %2497 }
 0x714   : > { %v2505_v59 = vsel %vm2496_vm12, %v2498_v57, 0.0 }
 0x715   : > { %v2509_v4 = vmul.f32 %v2505_v59, %v2492_v56  ;;  %v2500_v62 = vpop.permute.xlu0 %2499 }
 0x716   : > { %v2506_v7 = vsel %vm2496_vm12, %v2500_v62, 0.0 }
 0x717   : > { %v2513_v1 = vadd.f32 %v2509_v4, %v3949_v42  ;;  %v2510_v2 = vmul.f32 %v2506_v7, %v2493_v61  ;;  %v2502_v8 = vpop.permute.xlu1 %2501  ;;  %v3274_v4 = vld [vmem:[%s3471_s0 + $0x8] sm:$0xff] }
 0x718   : > { %v2507_v30 = vsel %vm2496_vm12, %v2502_v8, 0.0 }
 0x719   : > { %v2545_v9 = vmul.f32 %v2541_v27, %v2513_v1  ;;  %v2514_v12 = vadd.f32 %v2510_v2, %v3955_v48  ;;  %v2511_v16 = vmul.f32 %v2507_v30, %v2494_v10  ;;  %v2504_v17 = vpop.permute.xlu0 %2503 }
 0x71a   : > { %v2508_v32 = vsel %vm2496_vm12, %v2504_v17, 0.0 }
 0x71b   : > { %v2546_v42 = vmul.f32 %v2542_v6, %v2514_v12  ;;  %v2515_v20 = vadd.f32 %v2511_v16, %v3962_v50  ;;  %v2512_v14 = vmul.f32 %v2508_v32, %v2495_v0 }
 0x71d   : > { %v2547_v33 = vmul.f32 %v2543_v13, %v2515_v20  ;;  %v2516_v23 = vadd.f32 %v2512_v14, %v3970_v46  ;;  %v2553_v24 = vpack.c.bf16 %v2546_v42, %v2545_v9 }
 0x71f   : > { %v2548_v3 = vmul.f32 %v2544_v21, %v2516_v23  ;;  %3128 = vmatprep.subr.bf16.mxu0 %v2553_v24 }
 0x720   : > { %3129 = vmatpush3.bf16.msra.mxu0 %v2553_v24 }
 0x721   : > { %v2554_v48 = vpack.c.bf16 %v2548_v3, %v2547_v33 }
 0x723   : > { %3130 = vmatprep.subr.bf16.mxu0 %v2554_v48 }
 0x724   : > { %3131 = vmatpush3.bf16.msra.mxu0 %v2554_v48 }
 0x727   : > { %3133 = vmatmul.mubr.msk.bf16.vlgmr.msra.gmra.mrb[8].mxu0 %vm2045_vm4, %v3192_v22 }
 0x728   : > { %v2562_v50 = vpop.permute.xlu1 %2561 }
 0x72a   : > { %v2567_v25 = vpop.permute.xlu0 %2566 }
 0x72c   : > { %v2572_v26 = vpop.permute.xlu1 %2571 }
 0x72e   : > { %v2577_v28 = vpop.permute.xlu0 %2576 }
 0x730   : > { %v2655_v29 = vpop.permute.xlu1 %2654 }
 0x732   : > { %v2660_v46 = vpop.permute.xlu0 %2659 }
 0x734   : > { %v2665_v31 = vpop.permute.xlu1 %2664 }
 0x736   : > { %v2670_v38 = vpop.permute.xlu0 %2669 }
 0x738   : > { %v2683_v39 = vpop.permute.xlu1 %2682 }
 0x73a   : > { %v2688_v11 = vpop.permute.xlu0 %2687 }
 0x73c   : > { %v2693_v36 = vpop.permute.xlu1 %2692 }
 0x73e   : > { %v2698_v53 = vpop.permute.xlu0 %2697 }
 0x7fa   : > { %v3134_v40 = vpop.f32.mrb[8].mxu0 }
 0x7fb   : > { %v2638_v35 = vadd.f32 %v3134_v40, %v2572_v26  ;;  %v2629_v37 = vpop.f32.mrb[9].mxu0 }
 0x7fc   : > { %v2630_v41 = vadd.f32 %v2629_v37, %v2562_v50  ;;  %v3135_v34 = vpop.f32.mrb[10].mxu0 }
 0x7fd   : > { %v2674_v43 = vmul.f32 %v2665_v31, %v2638_v35  ;;  %v2641_v44 = vadd.f32 %v3135_v34, %v2577_v28  ;;  %v2632_v47 = vpop.f32.mrb[11].mxu0 }
 0x7fe   : > { %v2672_v45 = vmul.f32 %v2655_v29, %v2630_v41  ;;  %v2633_v52 = vadd.f32 %v2632_v47, %v2567_v25 }
 0x7ff   : > { %v2702_v49 = vadd.f32 %v2693_v36, %v2674_v43  ;;  %v2675_v51 = vmul.f32 %v2670_v38, %v2641_v44 }
 0x800   : > { %v2700_v54 = vadd.f32 %v2683_v39, %v2672_v45  ;;  %v2673_v56 = vmul.f32 %v2660_v46, %v2633_v52 }
 0x801   : > { %v2710_v57 = vadd.f32 %v2708_v18, %v2702_v49  ;;  %v2703_v58 = vadd.f32 %v2698_v53, %v2675_v51 }
 0x802   : > { %v2704_v59 = vadd.f32 %v3273_v60, %v2700_v54  ;;  %v2701_v61 = vadd.f32 %v2688_v11, %v2673_v56 }
 0x803   : > { %2712 = vst [vmem:[%s1014_s7] sm:$0xff] %v2710_v57  ;;  %v2711_v63 = vadd.f32 %v2709_v55, %v2703_v58 }
 0x804   : > { %2706 = vst [vmem:[%s1009_s4] sm:$0xff] %v2704_v59  ;;  %v2705_v62 = vadd.f32 %v3274_v4, %v2701_v61 }
 0x805   : > { %2713 = vst [vmem:[%s1014_s7 + $0x8] sm:$0xff] %v2711_v63 }
 0x806   : > { %2707 = vst [vmem:[%s1009_s4 + $0x8] sm:$0xff] %v2705_v62 }
 0x807 PF: > { %s4115_s6 = sld [smem:[#allocation2_spill]] }
 0x80d   : > { %s36_s29 = sadd.s32 1, %s4115_s6  }
 0x80e   : > { %p33_p4 = scmp.ge.s32.totalorder %s36_s29, 4  }
 0x810   :  { %35 = sbr.rel (!%p33_p4) target bundleno = 14 (0xe), region = 194 }

// kernel: denoiser_forward.6
= control target key start
LH: loop header
LB: loop body
LE: loop exit
PB: predicated region body
PF: predicated region fallthrough
CT: control target
= control target key end

     0   :  { %s4253_s0 = inlined_call_operand.vmem [shape: f32[2,16,128], index: 0, kind: input, shape index: {}]   ;;  %s4254_s1 = inlined_call_operand.vmem [shape: f32[2,4,128], index: 1, kind: input, shape index: {}]   ;;  %s4255_s2 = inlined_call_operand.vmem [shape: f32[2,16,128], index: 2, kind: input, shape index: {}]   ;;  %s4256_s3 = inlined_call_operand.vmem [shape: bf16[64,16], index: 3, kind: input, shape index: {}]   ;;  %s4257_s4 = inlined_call_operand.vmem [shape: bf16[64,4], index: 4, kind: input, shape index: {}]   ;;  %s4258_s5 = inlined_call_operand.vmem [shape: f32[64,1], index: 5, kind: input, shape index: {}]   ;;  %s4259_s6 = inlined_call_operand.vmem [shape: bf16[64,64], index: 6, kind: input, shape index: {}]   ;;  %s4260_s7 = inlined_call_operand.vmem [shape: f32[64,1], index: 7, kind: input, shape index: {}]   ;;  %s4261_s8 = inlined_call_operand.vmem [shape: f32[32,3], index: 8, kind: input, shape index: {}]   ;;  %s4262_s9 = inlined_call_operand.vmem [shape: f32[32,1], index: 9, kind: input, shape index: {}]   ;;  %s4263_s10 = inlined_call_operand.vmem [shape: bf16[64,32], index: 10, kind: input, shape index: {}]   ;;  %s4264_s11 = inlined_call_operand.vmem [shape: f32[64,1], index: 11, kind: input, shape index: {}]   ;;  %s4265_s12 = inlined_call_operand.vmem [shape: bf16[32,32], index: 12, kind: input, shape index: {}]   ;;  %s4266_s13 = inlined_call_operand.vmem [shape: f32[32,1], index: 13, kind: input, shape index: {}]   ;;  %s4267_s14 = inlined_call_operand.vmem [shape: f32[2,64,1], index: 14, kind: input, shape index: {}]   ;;  %s4268_s15 = inlined_call_operand.vmem [shape: f32[2,64,1], index: 15, kind: input, shape index: {}]   ;;  %s4269_s16 = inlined_call_operand.vmem [shape: f32[2,64,1], index: 16, kind: input, shape index: {}]   ;;  %s4270_s17 = inlined_call_operand.vmem [shape: f32[2,64,1], index: 17, kind: input, shape index: {}]   ;;  %s4271_s18 = inlined_call_operand.vmem [shape: f32[2,32,1], index: 18, kind: input, shape index: {}]   ;;  %s4272_s19 = inlined_call_operand.vmem [shape: f32[2,32,1], index: 19, kind: input, shape index: {}]   ;;  %s4273_s20 = inlined_call_operand.vmem [shape: f32[2,64,1], index: 20, kind: input, shape index: {}]   ;;  %s4274_s21 = inlined_call_operand.vmem [shape: f32[2,64,1], index: 21, kind: input, shape index: {}]   ;;  %s4275_s22 = inlined_call_operand.vmem [shape: f32[2,32,1], index: 22, kind: input, shape index: {}]   ;;  %s4276_s23 = inlined_call_operand.vmem [shape: f32[2,32,1], index: 23, kind: input, shape index: {}]   ;;  %s4277_s24 = inlined_call_operand.hbm [shape: f32[2,16,128], index: 24, kind: output, shape index: {0}]   ;;  %s4278_s25 = inlined_call_operand.vmem [shape: f32[2,16,128], index: 25, kind: output, shape index: {1}]  }
   0x1   :  { %4300 = sst [smem:[#allocation12_spill]] %s4253_s0 }
   0x2   :  { %4301 = sst [smem:[#allocation13_spill]] %s4254_s1 }
   0x3   :  { %4302 = sst [smem:[#allocation14_spill]] %s4255_s2 }
   0x4   :  { %4303 = sst [smem:[#allocation15_spill]] %s4256_s3 }
   0x5   :  { %4304 = sst [smem:[#allocation16_spill]] %s4257_s4 }
   0x6   :  { %4305 = sst [smem:[#allocation17_spill]] %s4258_s5 }
   0x7   :  { %4306 = sst [smem:[#allocation18_spill]] %s4259_s6 }
   0x8   :  { %4307 = sst [smem:[#allocation19_spill]] %s4260_s7 }
   0x9   :  { %4308 = sst [smem:[#allocation20_spill]] %s4261_s8 }
   0xa   :  { %4309 = sst [smem:[#allocation21_spill]] %s4262_s9 }
   0xb   :  { %4310 = sst [smem:[#allocation22_spill]] %s4267_s14 }
   0xc   :  { %4311 = sst [smem:[#allocation23_spill]] %s4268_s15 }
   0xd   :  { %4312 = sst [smem:[#allocation24_spill]] %s4269_s16 }
   0xe   :  { %4313 = sst [smem:[#allocation25_spill]] %s4270_s17 }
   0xf   :  { %4314 = sst [smem:[#allocation26_spill]] %s4271_s18 }
  0x10   :  { %4315 = sst [smem:[#allocation27_spill]] %s4277_s24 }
  0x11   :  { %4316 = sst [smem:[#allocation28_spill]] %s4278_s25 }
  0x12   :  { %31 = vsyncpa [#allocation3], 0 }
  0x13   :  { %33 = vsyncpa [#allocation3 + $0x1], 0  ;;  %s3534_s29 = smov 0   ;;  %s3536_s2 = smov 0  }
  0x14   :  { %s3538_s6 = smov 0   ;;  %s3540_s30 = smov 0  }
  0x15 LB: > { %4317 = sst [smem:[#allocation5_spill]] %s3377_s29  ;;  %s3555_s7 = sadd.s32 4294967295, %s3389_s30   ;;  %s3389_s30 = sphi %s3540_s30, %s4351_s30   ;;  %s3385_s6 = sphi %s3538_s6, %s4353_s6   ;;  %s3381_s2 = sphi %s3536_s2, %s4355_s2   ;;  %s3377_s29 = sphi %s3534_s29, %s4354_s29  }
  0x16   : > { %4318 = sst [smem:[#allocation6_spill]] %s3385_s6  ;;  %s2965_s3 = sadd.s32 4294967294, %s3389_s30  }
  0x17   : > { %4319 = sst [smem:[#allocation7_spill]] %s3389_s30  ;;  %s3559_s26 = sadd.s32 1, %s3389_s30  }
  0x18   : > { %4320 = sst [smem:[#allocation8_spill]] %s3559_s26  ;;  %s615_s1 = sadd.s32 1, %s3385_s6 }
  0x19   : > { %s612_s8 = ssub.s32 %s3389_s30, %s3559_s26  ;;  %p625_p0 = scmp.ne.s32.totalorder %s3385_s6, %s3381_s2 }
  0x1a   : > { %p613_p1 = scmp.eq.s32.totalorder %s612_s8, 0  ;;  %p626_p2 = scmp.eq.s32.totalorder %s3555_s7, 1 }
  0x1b   : > { %p631_p3 = scmp.ne.s32.totalorder %s3381_s2, %s3377_s29  ;;  %p632_p4 = scmp.eq.s32.totalorder %s2965_s3, 1 }
  0x1c   : > { %s3570_s27 = scalar_select %p613_p1, %s3385_s6, %s615_s1  }
  0x1d   : > { %p3572_p5 = por %p626_p2, %p625_p0  ;;  %p3576_p6 = por %p632_p4, %p631_p3 }
  0x1e   : > { %4321 = sst [smem:[#allocation9_spill]] %s3570_s27  ;;  %p2968_p7 = scmp.ge.s32.totalorder %s3389_s30, 1 }
  0x1f   : > { %s4322_s4 = scalar_select %p3572_p5, 1, 0 }
  0x20   : > { %s4324_s28 = scalar_select %p3576_p6, 1, 0 }
  0x21   : > { %4323 = sst [smem:[#allocation10_spill]] %s4322_s4  ;;  %p812_p8 = scmp.lt.s32.totalorder %s3389_s30, 3 }
  0x22   : > { %4325 = sst [smem:[#allocation11_spill]] %s4324_s28 }
  0x23   : > { %p813_p9 = pnand %p2968_p7, %p812_p8 }
  0x24   : > { %p944_p10 = scmp.lt.s32.totalorder (!%p813_p9), %s3555_s7, 1  ;;  %s4326_s0 = sld [smem:[#allocation16_spill]] (!%p813_p9)  ;;  %vm1055_vm0 = vcmask (!%p813_p9), 31744   ;;  %v3391_v3 = vmov (!%p813_p9), 0   ;;  %vm1068_vm1 = vcmask (!%p813_p9), 1041408   ;;  %vm1157_vm2 = vcmask (!%p813_p9), 130048  }
  0x25   : > { %816 = sbr.rel (%p813_p9) target bundleno = 2088 (0x828), region = 116  ;;  %s4327_s27 = sld [smem:[#allocation17_spill]] (!%p813_p9)  ;;  %3217 = vset.pattern.permute.xlu1 (!%p813_p9), %v3391_v3  ;;  %3216 = vset.pattern.permute.xlu0 (!%p813_p9), %v3391_v3  ;;  %vm1547_vm3 = vcmask (!%p813_p9), 523264   ;;  %vm2043_vm4 = vcmask (!%p813_p9), 261120  }
  0x26   : > { %s4328_s28 = sld [smem:[#allocation13_spill]] (!%p813_p9)  ;;  %s4329_s14 = sld [smem:[#allocation22_spill]] (!%p813_p9) }
  0x27   : > { %s4331_s15 = sld [smem:[#allocation23_spill]] (!%p813_p9)  ;;  %s4333_s16 = sld [smem:[#allocation24_spill]] (!%p813_p9) }
  0x28   : > { %s4335_s17 = sld [smem:[#allocation25_spill]] (!%p813_p9)  ;;  %s4336_s25 = sld [smem:[#allocation20_spill]] (!%p813_p9) }
  0x29   : > { %s4337_s30 = sld [smem:[#allocation18_spill]] (!%p813_p9)  ;;  %s4340_s4 = sld [smem:[#allocation21_spill]] (!%p813_p9) }
  0x2a   : > { %v3227_v0 = vld [vmem:[%s4326_s0] sm:$0xff] (!%p813_p9)   ;;  %v3228_v8 = vld [vmem:[%s4326_s0 + $0x8] sm:$0xff] (!%p813_p9)   ;;  %v3229_v16 = vld [vmem:[%s4326_s0 + $0x10] sm:$0xff] (!%p813_p9)   ;;  %s4339_s18 = sld [smem:[#allocation26_spill]] (!%p813_p9)  ;;  %s4299_s6 = smov (!%p813_p9), 8  }
  0x2b   : > { %v1238_v1 = vld [vmem:[%s4327_s27 + $0x18] sm:$0xff] (!%p813_p9)  ;;  %v1235_v2 = vld [vmem:[%s4327_s27] sm:$0xff] (!%p813_p9)  ;;  %3102 = vmatprep.mubr.msk.bf16.mxu0 (!%p813_p9), %vm1055_vm0, %v3227_v0  ;;  %v1236_v10 = vld [vmem:[%s4327_s27 + $0x8] sm:$0xff] (!%p813_p9) }
  0x2c   : > { %s3587_s3 = scalar_select %p944_p10, %s3555_s7, 1  ;;  %1260 = vperm.xlu1 %3217, %v1238_v1   ;;  %1245 = vperm.xlu0 %3216, %v1235_v2   ;;  %v1237_v17 = vld [vmem:[%s4327_s27 + $0x10] sm:$0xff]  ;;  %v3230_v22 = vld [vmem:[%s4326_s0 + $0x18] sm:$0xff]   ;;  %v1240_v26 = vld [vmem:[%s4327_s27 + $0x28] sm:$0xff]  ;;  %v3392_v1 = vmov 1  }
  0x2d   : > { %v1239_v27 = vld [vmem:[%s4327_s27 + $0x20] sm:$0xff]  ;;  %v1242_v37 = vld [vmem:[%s4327_s27 + $0x38] sm:$0xff]  ;;  %v1241_v38 = vld [vmem:[%s4327_s27 + $0x30] sm:$0xff] }
  0x2e   : > { %s2972_s9 = sshll.u32 %s3587_s3, 2  ;;  %s3599_s5 = sshll.u32 %s3587_s3, 6  ;;  %v1774_v63 = vld [vmem:[%s4336_s25 + $0x8] sm:$0xff]  ;;  %v1773_v2 = vld [vmem:[%s4336_s25] sm:$0xff] }
  0x2f   : > { %s952_s29 = scalar_lea.vmem %s4328_s28, %s2972_s9  ;;  %s3609_s26 = scalar_lea.vmem %s4329_s14, %s3599_s5  ;;  %v3235_v0 = vld [vmem:[%s4337_s30] sm:$0xff]  }
  0x30   : > { %v1016_v4 = vld [vmem:[%s952_s29] sm:$0xf]  ;;  %s3613_s24 = sshll.u32 %s3587_s3, 4  ;;  %v1292_v6 = vld [vmem:[%s3609_s26 + $0x8] sm:$0xff]  ;;  %s4330_s9 = sld [smem:[#allocation12_spill]]  ;;  %1250 = vperm.xlu0 %3216, %v1236_v10   ;;  %v1294_v19 = vld [vmem:[%s3609_s26 + $0x18] sm:$0xff]  ;;  %3128 = vmatprep.mubr.msk.bf16.mxu1 %vm1547_vm3, %v3235_v0 }
  0x31   : > { %v1291_v5 = vld [vmem:[%s3609_s26] sm:$0xff]  ;;  %v1034_v7 = vpack.c.bf16 %v1016_v4, %v1016_v4  ;;  %v1300_v15 = vadd.f32 1.0, %v1292_v6  ;;  %s3640_s8 = scalar_lea.vmem %s4331_s15, %s3599_s5  ;;  %v1293_v21 = vld [vmem:[%s3609_s26 + $0x10] sm:$0xff]  ;;  %v1302_v23 = vadd.f32 1.0, %v1294_v19  ;;  %s4332_s28 = sld [smem:[#allocation15_spill]]  ;;  %v1296_v31 = vld [vmem:[%s3609_s26 + $0x28] sm:$0xff] }
  0x32   : > { %v1299_v9 = vadd.f32 1.0, %v1291_v5  ;;  %v1356_v18 = vld [vmem:[%s3640_s8 + $0x8] sm:$0xff]  ;;  %v1355_v20 = vld [vmem:[%s3640_s8] sm:$0xff]  ;;  %v1301_v25 = vadd.f32 1.0, %v1293_v21  ;;  %v1358_v30 = vld [vmem:[%s3640_s8 + $0x18] sm:$0xff]  ;;  %v1304_v34 = vadd.f32 1.0, %v1296_v31  ;;  %s3693_s14 = scalar_lea.vmem %s4333_s16, %s3599_s5  ;;  %s3711_s0 = scalar_lea.vmem %s4335_s17, %s3599_s5 }
  0x33   : > { %3164 = vmatprep.subr.msk.bf16.mxu0 %vm1068_vm1, %v1034_v7  ;;  %v1070_v13 = vsel %vm1068_vm1, %v1034_v7, 0  ;;  %v1357_v32 = vld [vmem:[%s3640_s8 + $0x10] sm:$0xff]  ;;  %v1295_v33 = vld [vmem:[%s3609_s26 + $0x20] sm:$0xff]  ;;  %v1360_v39 = vld [vmem:[%s3640_s8 + $0x28] sm:$0xff]  ;;  %v3393_v5 = vmov 2   ;;  %s3740_s15 = sshll.u32 %s3587_s3, 5  ;;  %s3820_s16 = scalar_lea.vmem %s4273_s20, %s3599_s5 }
  0x34   : > { %1309 = vperm.xlu1 %3217, %v1299_v9   ;;  %3101 = vmatpush3.bf16.msra.mxu0 %v1070_v13  ;;  %v1303_v35 = vadd.f32 1.0, %v1295_v33  ;;  %v1298_v40 = vld [vmem:[%s3609_s26 + $0x38] sm:$0xff]  ;;  %v1359_v41 = vld [vmem:[%s3640_s8 + $0x20] sm:$0xff]  ;;  %v1297_v42 = vld [vmem:[%s3609_s26 + $0x30] sm:$0xff]  ;;  %s4334_s26 = sld [smem:[#allocation19_spill]]  ;;  %s3746_s29 = scalar_lea.vmem %s4339_s18, %s3740_s15 }
  0x35   : > { %1255 = vperm.xlu0 %3216, %v1237_v17   ;;  %v1306_v43 = vadd.f32 1.0, %v1298_v40  ;;  %v1305_v44 = vadd.f32 1.0, %v1297_v42  ;;  %v1362_v45 = vld [vmem:[%s3640_s8 + $0x38] sm:$0xff]  ;;  %v1361_v46 = vld [vmem:[%s3640_s8 + $0x30] sm:$0xff]  ;;  %v1626_v48 = vld [vmem:[%s3693_s14 + $0x8] sm:$0xff]  ;;  %s3760_s18 = scalar_lea.vmem %s4272_s19, %s3740_s15  ;;  %s4296_s3 = smov 1  }
  0x36   : > { %s3623_s1 = scalar_lea.vmem %s4330_s9, %s3613_s24  ;;  %v1625_v50 = vld [vmem:[%s3693_s14] sm:$0xff]  ;;  %v1634_v51 = vadd.f32 1.0, %v1626_v48  ;;  %v1690_v55 = vld [vmem:[%s3711_s0 + $0x8] sm:$0xff]  ;;  %v1628_v56 = vld [vmem:[%s3693_s14 + $0x18] sm:$0xff]  ;;  %s4338_s9 = smov %s4337_s30 }
  0x37   : > { %v1014_v11 = vld [vmem:[%s3623_s1] sm:$0xff]  ;;  %v1015_v12 = vld [vmem:[%s3623_s1 + $0x8] sm:$0xff]  ;;  %3103 = vmatmul.mubr.msk.bf16.vlgmr.msra.gmra.mrb[0].mxu0 %vm1055_vm0, %v3228_v8  ;;  %v3233_v29 = vld [vmem:[%s4332_s28 + $0x10] sm:$0xff]   ;;  %v1633_v52 = vadd.f32 1.0, %v1625_v50  ;;  %v1636_v59 = vadd.f32 1.0, %v1628_v56  ;;  %s3395_s8 = smov 127  }
  0x38   : > { %v1025_v14 = vpack.c.bf16 %v1015_v12, %v1014_v11  ;;  %1314 = vperm.xlu1 %3217, %v1300_v15   ;;  %3106 = vmatprep.mubr.msk.bf16.mxu0 %vm1055_vm0, %v3229_v16  ;;  %v3231_v24 = vld [vmem:[%s4332_s28] sm:$0xff]   ;;  %v3232_v28 = vld [vmem:[%s4332_s28 + $0x8] sm:$0xff]   ;;  %v3234_v36 = vld [vmem:[%s4332_s28 + $0x18] sm:$0xff]   ;;  %s3397_s17 = smov 4   ;;  %s4343_s30 = sld [smem:[#allocation28_spill]] }
  0x39   : > { %1365 = vperm.xlu0 %3216, %v1355_v20   ;;  %v1689_v57 = vld [vmem:[%s3711_s0] sm:$0xff]  ;;  %v1627_v58 = vld [vmem:[%s3693_s14 + $0x10] sm:$0xff]  ;;  %v1692_v61 = vld [vmem:[%s3711_s0 + $0x18] sm:$0xff] }
  0x3a   : > { %3110 = vmatprep.subr.bf16.mxu0 %v1025_v14  ;;  %v1480_v47 = vld [vmem:[%s4334_s26 + $0x8] sm:$0xff]  ;;  %v1479_v49 = vld [vmem:[%s4334_s26] sm:$0xff]  ;;  %v1482_v53 = vld [vmem:[%s4334_s26 + $0x18] sm:$0xff]  ;;  %v1635_v60 = vadd.f32 1.0, %v1627_v58 }
  0x3b   : > { %3111 = vmatpush3.bf16.msra.mxu0 %v1025_v14  ;;  %v1481_v54 = vld [vmem:[%s4334_s26 + $0x10] sm:$0xff]  ;;  %v1776_v6 = vld [vmem:[%s4336_s25 + $0x18] sm:$0xff]  ;;  %v1877_v7 = vld [vmem:[%s3746_s29] sm:$0xff] }
  0x3c   : > { %1370 = vperm.xlu1 %3217, %v1356_v18   ;;  %v1691_v62 = vld [vmem:[%s3711_s0 + $0x10] sm:$0xff]  ;;  %v1881_v10 = vadd.f32 1.0, %v1877_v7  ;;  %v1852_v12 = vld [vmem:[%s4340_s4 + $0x18] sm:$0xff]  ;;  %v1849_v14 = vld [vmem:[%s4340_s4] sm:$0xff] }
  0x3d   : > { %1319 = vperm.xlu0 %3216, %v1301_v25   ;;  %v1775_v4 = vld [vmem:[%s4336_s25 + $0x10] sm:$0xff]  ;;  %v1910_v15 = vld [vmem:[%s3760_s18 + $0x8] sm:$0xff]  ;;  %v1909_v25 = vld [vmem:[%s3760_s18] sm:$0xff] }
  0x3e   : > { %v1850_v18 = vld [vmem:[%s4340_s4 + $0x8] sm:$0xff] }
  0x3f   : > { %3107 = vmatmul.mubr.msk.bf16.gmra.mrb[4].mxu0 %vm1055_vm0, %v3230_v22  ;;  %v1878_v19 = vld [vmem:[%s3746_s29 + $0x8] sm:$0xff] }
  0x40   : > { %1324 = vperm.xlu1 %3217, %v1302_v23   ;;  %3112 = vmatprep.mubr.msk.bf16.mxu0 %vm1157_vm2, %v3231_v24  ;;  %v1882_v20 = vadd.f32 1.0, %v1878_v19  ;;  %v1851_v23 = vld [vmem:[%s4340_s4 + $0x10] sm:$0xff] }
  0x41   : > { %1265 = vperm.xlu0 %3216, %v1239_v27  }
  0x44   : > { %1270 = vperm.xlu1 %3217, %v1240_v26  }
  0x45   : > { %1375 = vperm.xlu0 %3216, %v1357_v32  }
  0x47   : > { %3113 = vmatmul.mubr.msk.bf16.vlgmr.msra.gmra.mrb[0].mxu0 %vm1157_vm2, %v3232_v28 }
  0x48   : > { %1380 = vperm.xlu1 %3217, %v1358_v30   ;;  %3116 = vmatprep.mubr.msk.bf16.mxu0 %vm1157_vm2, %v3233_v29 }
  0x49   : > { %1329 = vperm.xlu0 %3216, %v1303_v35  }
  0x4c   : > { %1334 = vperm.xlu1 %3217, %v1304_v34  }
  0x4d   : > { %1275 = vperm.xlu0 %3216, %v1241_v38  }
  0x4f   : > { %3117 = vmatmul.mubr.msk.bf16.gmra.mrb[4].mxu0 %vm1157_vm2, %v3234_v36 }
  0x50   : > { %1280 = vperm.xlu1 %3217, %v1242_v37  }
  0x51   : > { %1385 = vperm.xlu0 %3216, %v1359_v41  }
  0x54   : > { %1390 = vperm.xlu1 %3217, %v1360_v39  }
  0x55   : > { %1339 = vperm.xlu0 %3216, %v1305_v44  }
  0x58   : > { %1344 = vperm.xlu1 %3217, %v1306_v43  }
  0x59   : > { %1395 = vperm.xlu0 %3216, %v1361_v46  }
  0x5c   : > { %1400 = vperm.xlu1 %3217, %v1362_v45  }
  0x5d   : > { %1489 = vperm.xlu0 %3216, %v1479_v49  }
  0x60   : > { %1494 = vperm.xlu1 %3217, %v1480_v47  }
  0x61   : > { %1643 = vperm.xlu0 %3216, %v1633_v52  }
  0x64   : > { %1648 = vperm.xlu1 %3217, %v1634_v51  }
  0x65   : > { %1499 = vperm.xlu0 %3216, %v1481_v54  }
  0x68   : > { %1504 = vperm.xlu1 %3217, %v1482_v53  }
  0x69   : > { %1699 = vperm.xlu0 %3216, %v1689_v57  }
  0x6c   : > { %1704 = vperm.xlu1 %3217, %v1690_v55  }
  0x6d   : > { %1653 = vperm.xlu0 %3216, %v1635_v60  }
  0x70   : > { %1658 = vperm.xlu1 %3217, %v1636_v59  }
  0x71   : > { %1709 = vperm.xlu0 %3216, %v1691_v62  }
  0x74   : > { %1714 = vperm.xlu1 %3217, %v1692_v61  }
  0x75   : > { %3218 = vset.pattern.permute.xlu0 %v3392_v1 }
  0x76   : > { %1802 = vperm.xlu0 %3218, %v1773_v2  }
  0x78   : > { %1784 = vperm.xlu1 %3217, %v1774_v63  }
  0x7a   : > { %1810 = vperm.xlu0 %3218, %v1775_v4  }
  0x7c   : > { %3219 = vset.pattern.permute.xlu1 %v3392_v1 }
  0x7d   : > { %1806 = vperm.xlu1 %3219, %v1774_v63  }
  0x7e   : > { %3222 = vset.pattern.permute.xlu0 %v3393_v5 }
  0x7f   : > { %1830 = vperm.xlu0 %3222, %v1774_v63  }
  0x81   : > { %3220 = vset.pattern.permute.xlu1 %v3393_v5 }
  0x82   : > { %1826 = vperm.xlu1 %3220, %v1773_v2  }
  0x83   : > { %1838 = vperm.xlu0 %3222, %v1776_v6  }
  0x86   : > { %3221 = vset.pattern.permute.xlu1 %v3391_v3 }
  0x87   : > { %1789 = vperm.xlu1 %3221, %v1775_v4   ;;  %3225 = vset.pattern.permute.xlu0 %v3391_v3 }
  0x88   : > { %1779 = vperm.xlu0 %3225, %v1773_v2  }
  0x8b   : > { %1794 = vperm.xlu1 %3221, %v1776_v6  }
  0x8c   : > { %1887 = vperm.xlu0 %3225, %v1881_v10  }
  0x8f   : > { %3223 = vset.pattern.permute.xlu1 %v3392_v1 }
  0x90   : > { %1814 = vperm.xlu1 %3223, %v1776_v6   ;;  %1870 = vperm.xlu0 %3225, %v1852_v12  }
  0x94   : > { %3224 = vset.pattern.permute.xlu1 %v3393_v5  ;;  %1920 = vperm.xlu0 %3225, %v1910_v15  }
  0x95   : > { %1834 = vperm.xlu1 %3224, %v1775_v4  }
  0x99   : > { %3226 = vset.pattern.permute.xlu1 %v3391_v3 }
  0x9a   : > { %1855 = vperm.xlu1 %3226, %v1849_v14  }
  0x9e   : > { %1860 = vperm.xlu1 %3226, %v1850_v18  }
  0xa2   : > { %1892 = vperm.xlu1 %3226, %v1882_v20  }
  0xa6   : > { %1865 = vperm.xlu1 %3226, %v1851_v23  }
  0xaa   : > { %1915 = vperm.xlu1 %3226, %v1909_v25  }
  0xab   : > { %v1246_v8 = vpop.permute.xlu0 %1245  ;;  %v1261_v9 = vpop.permute.xlu1 %1260 }
  0xaf   : > { %v1251_v11 = vpop.permute.xlu0 %1250 }
  0xb3   : > { %v1310_v13 = vpop.permute.xlu1 %1309 }
  0xb4   : > { %v1256_v16 = vpop.permute.xlu0 %1255 }
  0xb7   : > { %v1315_v17 = vpop.permute.xlu1 %1314 }
  0xb8   : > { %v1366_v21 = vpop.permute.xlu0 %1365 }
  0xbb   : > { %v1371_v22 = vpop.permute.xlu1 %1370 }
  0xbc   : > { %v1320_v24 = vpop.permute.xlu0 %1319 }
  0xbf   : > { %v1325_v3 = vpop.permute.xlu1 %1324 }
  0xc0   : > { %v1266_v26 = vpop.permute.xlu0 %1265 }
  0xc3   : > { %v1271_v27 = vpop.permute.xlu1 %1270 }
  0xc4   : > { %v1376_v28 = vpop.permute.xlu0 %1375 }
  0xc7   : > { %v1381_v29 = vpop.permute.xlu1 %1380 }
  0xc8   : > { %v1330_v30 = vpop.permute.xlu0 %1329 }
  0xcb   : > { %v1335_v31 = vpop.permute.xlu1 %1334 }
  0xcc   : > { %v1276_v32 = vpop.permute.xlu0 %1275 }
  0xcf   : > { %v1281_v33 = vpop.permute.xlu1 %1280 }
  0xd0   : > { %v1386_v34 = vpop.permute.xlu0 %1385 }
  0xd3   : > { %v1391_v38 = vpop.permute.xlu1 %1390 }
  0xd4   : > { %v1340_v48 = vpop.permute.xlu0 %1339 }
  0xd7   : > { %v1345_v53 = vpop.permute.xlu1 %1344 }
  0xd8   : > { %v1396_v2 = vpop.permute.xlu0 %1395 }
 0x11a   : > { %v3114_v35 = vpop.f32.mrb[0].mxu0 }
 0x11b   : > { %v1285_v36 = vadd.f32 %v3114_v35, %v1256_v16  ;;  %v1204_v37 = vpop.f32.mrb[1].mxu0 }
 0x11c   : > { %v1283_v39 = vadd.f32 %v1246_v8, %v1204_v37  ;;  %v3115_v40 = vpop.f32.mrb[2].mxu0  ;;  %v1401_v8 = vpop.permute.xlu1 %1400 }
 0x11d   : > { %v1349_v41 = vmul.f32 %v1320_v24, %v1285_v36  ;;  %v1286_v42 = vadd.f32 %v3115_v40, %v1261_v9  ;;  %v1207_v43 = vpop.f32.mrb[3].mxu0 }
 0x11e   : > { %v1347_v44 = vmul.f32 %v1310_v13, %v1283_v39  ;;  %v1284_v45 = vadd.f32 %v1251_v11, %v1207_v43 }
 0x11f   : > { %v3772_v46 = vadd.f32 %v1376_v28, %v1349_v41  ;;  %v1350_v47 = vmul.f32 %v1325_v3, %v1286_v42 }
 0x120   : > { %v3774_v49 = vadd.f32 %v1366_v21, %v1347_v44  ;;  %v1348_v50 = vmul.f32 %v1315_v17, %v1284_v45 }
 0x121   : > { %v3015_v51 = vmul.f32 -1.442695, %v3772_v46  ;;  %v3777_v52 = vadd.f32 %v1381_v29, %v1350_v47 }
 0x122   : > { %v3013_v54 = vmul.f32 -1.442695, %v3774_v49  ;;  %v3780_v55 = vadd.f32 %v1371_v22, %v1348_v50  ;;  %v3118_v56 = vpop.f32.mrb[4].mxu0 }
 0x123   : > { %3245 = vpow2.f32 %v3015_v51  ;;  %v3016_v57 = vmul.f32 -1.442695, %v3777_v52  ;;  %v1289_v58 = vadd.f32 %v3118_v56, %v1276_v32  ;;  %v1220_v59 = vpop.f32.mrb[5].mxu0 }
 0x124   : > { %3247 = vpow2.f32 %v3013_v54  ;;  %v3014_v60 = vmul.f32 -1.442695, %v3780_v55  ;;  %v1287_v61 = vadd.f32 %v1266_v26, %v1220_v59  ;;  %v3119_v62 = vpop.f32.mrb[6].mxu0  ;;  %v1495_v54 = vpop.permute.xlu1 %1494 }
 0x125   : > { %3249 = vpow2.f32 %v3016_v57  ;;  %v1353_v63 = vmul.f32 %v1340_v48, %v1289_v58  ;;  %v1290_v0 = vadd.f32 %v3119_v62, %v1281_v33  ;;  %v1223_v1 = vpop.f32.mrb[7].mxu0 }
 0x126   : > { %3251 = vpow2.f32 %v3014_v60  ;;  %v1351_v4 = vmul.f32 %v1330_v30, %v1287_v61  ;;  %v1288_v5 = vadd.f32 %v1271_v27, %v1223_v1 }
 0x127   : > { %v1409_v6 = vadd.f32 %v1396_v2, %v1353_v63  ;;  %v1354_v7 = vmul.f32 %v1345_v53, %v1290_v0  ;;  %v1490_v53 = vpop.permute.xlu0 %1489 }
 0x128   : > { %v1407_v9 = vadd.f32 %v1386_v34, %v1351_v4  ;;  %v1352_v10 = vmul.f32 %v1335_v31, %v1288_v5  ;;  %v1649_v56 = vpop.permute.xlu1 %1648 }
 0x129   : > { %v3019_v11 = vmul.f32 -1.442695, %v1409_v6  ;;  %v1410_v12 = vadd.f32 %v1401_v8, %v1354_v7 }
 0x12a   : > { %v3017_v13 = vmul.f32 -1.442695, %v1407_v9  ;;  %v1408_v14 = vadd.f32 %v1391_v38, %v1352_v10 }
 0x12b   : > { %3253 = vpow2.f32 %v3019_v11  ;;  %v3020_v15 = vmul.f32 -1.442695, %v1410_v12 }
 0x12c   : > { %3255 = vpow2.f32 %v3017_v13  ;;  %v3018_v16 = vmul.f32 -1.442695, %v1408_v14  ;;  %v1505_v58 = vpop.permute.xlu1 %1504 }
 0x12d   : > { %v3246_v17 = vpop.eup %3245  ;;  %3257 = vpow2.f32 %v3020_v15 }
 0x12e   : > { %v3248_v18 = vpop.eup %3247  ;;  %v1437_v19 = vadd.f32 1.0, %v3246_v17  ;;  %3259 = vpow2.f32 %v3018_v16  ;;  %v1879_v17 = vld [vmem:[%s3746_s29 + $0x10] sm:$0xff] }
 0x12f   : > { %v3250_v20 = vpop.eup %3249  ;;  %v1435_v21 = vadd.f32 1.0, %v3248_v18 }
 0x130   : > { %v3252_v22 = vpop.eup %3251  ;;  %3261 = vrcp.f32 %v1437_v19  ;;  %v1438_v23 = vadd.f32 1.0, %v3250_v20  ;;  %v1705_v60 = vpop.permute.xlu1 %1704  ;;  %v1880_v19 = vld [vmem:[%s3746_s29 + $0x18] sm:$0xff]  ;;  %v1883_v20 = vadd.f32 1.0, %v1879_v17  ;;  %s4345_s29 = sld [smem:[#allocation27_spill]] }
 0x131   : > { %3263 = vrcp.f32 %v1435_v21  ;;  %v1436_v24 = vadd.f32 1.0, %v3252_v22  ;;  %v1884_v21 = vadd.f32 1.0, %v1880_v19  ;;  %v1911_v22 = vld [vmem:[%s3760_s18 + $0x10] sm:$0xff]  ;;  %v1745_v19 = vlaneseq }
 0x132   : > { %3265 = vrcp.f32 %v1438_v23  ;;  %v1912_v23 = vld [vmem:[%s3760_s18 + $0x18] sm:$0xff]  ;;  %s3396_s18 = smov 2  }
 0x133   : > { %3267 = vrcp.f32 %v1436_v24  ;;  %v1979_v24 = vld [vmem:[%s4264_s11 + $0x20] sm:$0xff] }
 0x134   : > { %v1659_v4 = vpop.permute.xlu1 %1658 }
 0x135   : > { %v3254_v3 = vpop.eup %3253 }
 0x136   : > { %v3256_v25 = vpop.eup %3255  ;;  %v1441_v26 = vadd.f32 1.0, %v3254_v3  ;;  %v2125_v3 = vld [vmem:[%s3820_s16 + $0x20] sm:$0xff] }
 0x137   : > { %v3258_v27 = vpop.eup %3257  ;;  %v1439_v28 = vadd.f32 1.0, %v3256_v25  ;;  %v1980_v25 = vld [vmem:[%s4264_s11 + $0x28] sm:$0xff] }
 0x138   : > { %v3260_v29 = vpop.eup %3259  ;;  %3269 = vrcp.f32 %v1441_v26  ;;  %v1442_v30 = vadd.f32 1.0, %v3258_v27  ;;  %v1715_v13 = vpop.permute.xlu1 %1714  ;;  %v2126_v26 = vld [vmem:[%s3820_s16 + $0x28] sm:$0xff]  ;;  %v2133_v27 = vadd.f32 1.0, %v2125_v3 }
 0x139   : > { %3271 = vrcp.f32 %v1439_v28  ;;  %v1440_v31 = vadd.f32 1.0, %v3260_v29  ;;  %v2134_v28 = vadd.f32 1.0, %v2126_v26  ;;  %v1981_v29 = vld [vmem:[%s4264_s11 + $0x30] sm:$0xff] }
 0x13a   : > { %v3262_v32 = vpop.eup %3261  ;;  %3273 = vrcp.f32 %v1442_v30  ;;  %v1982_v30 = vld [vmem:[%s4264_s11 + $0x38] sm:$0xff] }
 0x13b   : > { %v3264_v33 = vpop.eup %3263  ;;  %3275 = vrcp.f32 %v1440_v31  ;;  %v1461_v36 = vmul.f32 %v3262_v32, %v3772_v46  ;;  %v2127_v32 = vld [vmem:[%s3820_s16 + $0x30] sm:$0xff] }
 0x13c   : > { %v3266_v34 = vpop.eup %3265  ;;  %v1459_v38 = vmul.f32 %v3264_v33, %v3774_v49  ;;  %v3236_v49 = vld [vmem:[%s4338_s9 + $0x8] sm:$0xff]  }
 0x13d   : > { %v3268_v35 = vpop.eup %3267  ;;  %v1462_v37 = vmul.f32 %v3266_v34, %v3777_v52  ;;  %v2128_v34 = vld [vmem:[%s3820_s16 + $0x38] sm:$0xff] }
 0x13e   : > { %v1460_v39 = vmul.f32 %v3268_v35, %v3780_v55  ;;  %v1644_v55 = vpop.permute.xlu0 %1643  ;;  %v2135_v35 = vadd.f32 1.0, %v2127_v32 }
 0x13f   : > { %v1476_v40 = vpack.c.bf16 %v1462_v37, %v1461_v36  ;;  %v2136_v36 = vadd.f32 1.0, %v2128_v34 }
 0x140   : > { %v1475_v41 = vpack.c.bf16 %v1460_v39, %v1459_v38  ;;  %v3237_v39 = vld [vmem:[%s4338_s9 + $0x10] sm:$0xff]  }
 0x142   : > { %v3270_v42 = vpop.eup %3269  ;;  %3120 = vmatprep.subr.bf16.mxu1 %v1475_v41  ;;  %v1500_v57 = vpop.permute.xlu0 %1499 }
 0x143   : > { %v3272_v43 = vpop.eup %3271  ;;  %3121 = vmatpush3.bf16.msra.mxu1 %v1475_v41  ;;  %v1465_v47 = vmul.f32 %v3270_v42, %v1409_v6  ;;  %v1975_v41 = vld [vmem:[%s4264_s11] sm:$0xff] }
 0x144   : > { %v3274_v44 = vpop.eup %3273  ;;  %3122 = vmatprep.subr.bf16.mxu1 %v1476_v40  ;;  %v1463_v50 = vmul.f32 %v3272_v43, %v1407_v9  ;;  %v2121_v42 = vld [vmem:[%s3820_s16] sm:$0xff]  ;;  %v1976_v43 = vld [vmem:[%s4264_s11 + $0x8] sm:$0xff] }
 0x145   : > { %v3276_v45 = vpop.eup %3275  ;;  %v1466_v48 = vmul.f32 %v3274_v44, %v1410_v12  ;;  %v2122_v44 = vld [vmem:[%s3820_s16 + $0x8] sm:$0xff] }
 0x146   : > { %v1464_v51 = vmul.f32 %v3276_v45, %v1408_v14  ;;  %v1700_v59 = vpop.permute.xlu0 %1699  ;;  %v3864_v45 = vpop.permute.xlu1 %1784 }
 0x147   : > { %3123 = vmatpush3.bf16.msra.mxu1 %v1476_v40  ;;  %v1478_v46 = vpack.c.bf16 %v1466_v48, %v1465_v47  ;;  %v3238_v40 = vld [vmem:[%s4338_s9 + $0x18] sm:$0xff]   ;;  %v2129_v47 = vadd.f32 1.0, %v2121_v42  ;;  %v2130_v48 = vadd.f32 1.0, %v2122_v44 }
 0x148   : > { %v1477_v52 = vpack.c.bf16 %v1464_v51, %v1463_v50  ;;  %v1977_v51 = vld [vmem:[%s4264_s11 + $0x10] sm:$0xff] }
 0x14a   : > { %3124 = vmatprep.subr.bf16.mxu1 %v1477_v52  ;;  %v1654_v61 = vpop.permute.xlu0 %1653  ;;  %v3866_v50 = vpop.permute.xlu1 %1806 }
 0x14b   : > { %3125 = vmatpush3.bf16.msra.mxu1 %v1477_v52  ;;  %v3239_v52 = vld [vmem:[%s4263_s10] sm:$0xff]  }
 0x14c   : > { %3126 = vmatprep.subr.bf16.mxu1 %v1478_v46 }
 0x14e   : > { %v1710_v8 = vpop.permute.xlu0 %1709 }
 0x14f   : > { %3127 = vmatpush3.bf16.msra.mxu1 %v1478_v46  ;;  %v1978_v46 = vld [vmem:[%s4264_s11 + $0x18] sm:$0xff] }
 0x152   : > { %3129 = vmatmul.mubr.msk.bf16.vlgmr.msra.gmra.mrb[0].mxu1 %vm1547_vm3, %v3236_v49 }
 0x153   : > { %3132 = vmatprep.mubr.msk.bf16.mxu1 %vm1547_vm3, %v3237_v39 }
 0x15a   : > { %3133 = vmatmul.mubr.msk.bf16.gmra.mrb[4].mxu1 %vm1547_vm3, %v3238_v40 }
 0x15b   : > { %3140 = vmatprep.mubr.msk.bf16.mxu1 %vm2043_vm4, %v3239_v52 }
 0x225   : > { %v3130_v62 = vpop.f32.mrb[0].mxu1 }
 0x226   : > { %v1603_v63 = vadd.f32 %v3130_v62, %v1500_v57  ;;  %v1594_v0 = vpop.f32.mrb[1].mxu1 }
 0x227   : > { %v1595_v1 = vadd.f32 %v1594_v0, %v1490_v53  ;;  %v3131_v2 = vpop.f32.mrb[2].mxu1  ;;  %v2123_v53 = vld [vmem:[%s3820_s16 + $0x10] sm:$0xff] }
 0x228   : > { %v1683_v5 = vmul.f32 %v1654_v61, %v1603_v63  ;;  %v1606_v6 = vadd.f32 %v3131_v2, %v1505_v58  ;;  %v1597_v7 = vpop.f32.mrb[3].mxu1  ;;  %v2131_v57 = vadd.f32 1.0, %v2123_v53  ;;  %v1803_v63 = vpop.permute.xlu0 %1802 }
 0x229   : > { %v1681_v9 = vmul.f32 %v1644_v55, %v1595_v1  ;;  %v1598_v14 = vadd.f32 %v1597_v7, %v1495_v54  ;;  %v1827_v54 = vpop.permute.xlu1 %1826 }
 0x22a   : > { %v3792_v10 = vadd.f32 %v1710_v8, %v1683_v5  ;;  %v1684_v12 = vmul.f32 %v1659_v4, %v1606_v6 }
 0x22b   : > { %v3794_v11 = vadd.f32 %v1700_v59, %v1681_v9  ;;  %v1682_v16 = vmul.f32 %v1649_v56, %v1598_v14  ;;  %v2124_v56 = vld [vmem:[%s3820_s16 + $0x18] sm:$0xff]  ;;  %s3399_s16 = smov 16  }
 0x22c   : > { %1752 = vrot.lane.b32.xlu1 %v3792_v10, %s4296_s3  ;;  %v3799_v15 = vadd.f32 %v1715_v13, %v1684_v12  ;;  %v2132_v58 = vadd.f32 1.0, %v2124_v56  ;;  %v1811_v1 = vpop.permute.xlu0 %1810 }
 0x22d   : > { %1761 = vrot.lane.b32.xlu0 %v3794_v11, %s3395_s8  ;;  %v3808_v18 = vadd.f32 %v1705_v60, %v1682_v16  ;;  %v1790_v59 = vpop.permute.xlu1 %1789 }
 0x230   : > { %1765 = vrot.lane.b32.xlu1 %v3792_v10, %s3395_s8  ;;  %v1831_v4 = vpop.permute.xlu0 %1830 }
 0x231   : > { %1754 = vrot.lane.b32.xlu0 %v3799_v15, %s4296_s3  ;;  %v1795_v62 = vpop.permute.xlu1 %1794 }
 0x234   : > { %1748 = vrot.lane.b32.xlu1 %v3794_v11, %s4296_s3  ;;  %v1839_v6 = vpop.permute.xlu0 %1838 }
 0x235   : > { %1767 = vrot.lane.b32.xlu0 %v3799_v15, %s3395_s8  ;;  %v1815_v0 = vpop.permute.xlu1 %1814 }
 0x236   : > { %v1820_v53 = vmul.f32 %v1815_v0, %v3799_v15 }
 0x238   : > { %1763 = vrot.lane.b32.xlu1 %v3808_v18, %s3395_s8  ;;  %v1780_v8 = vpop.permute.xlu0 %1779  ;;  %s4341_s8 = smov 1  }
 0x239   : > { %1750 = vrot.lane.b32.xlu0 %v3808_v18, %s4296_s3  ;;  %s3840_s3 = scalar_lea.vmem %s4274_s21, %s3599_s5  ;;  %v1835_v2 = vpop.permute.xlu1 %1834  ;;  %s1007_s5 = scalar_lea.vmem %s4276_s23, %s3740_s15 }
 0x23a   : > { %v2189_v31 = vld [vmem:[%s3840_s3 + $0x20] sm:$0xff]  ;;  %v2190_v33 = vld [vmem:[%s3840_s3 + $0x28] sm:$0xff]  ;;  %v2191_v37 = vld [vmem:[%s3840_s3 + $0x30] sm:$0xff] }
 0x23b   : > { %v2192_v38 = vld [vmem:[%s3840_s3 + $0x38] sm:$0xff]  ;;  %v2185_v49 = vld [vmem:[%s3840_s3] sm:$0xff]  ;;  %v2186_v55 = vld [vmem:[%s3840_s3 + $0x8] sm:$0xff] }
 0x23c   : > { %1897 = vperm.xlu1 %3226, %v1883_v20   ;;  %v2187_v60 = vld [vmem:[%s3840_s3 + $0x10] sm:$0xff]  ;;  %v2188_v61 = vld [vmem:[%s3840_s3 + $0x18] sm:$0xff]  ;;  %v1888_v12 = vpop.permute.xlu0 %1887  ;;  %s3400_s3 = smov 32  }
 0x23d   : > { %1902 = vperm.xlu0 %3225, %v1884_v21   ;;  %v1856_v5 = vpop.permute.xlu1 %1855 }
 0x240   : > { %1925 = vperm.xlu1 %3226, %v1911_v22   ;;  %v1871_v14 = vpop.permute.xlu0 %1870  ;;  %v3884_v22 = vand.u32 127, %v1745_v19 }
 0x241   : > { %1930 = vperm.xlu0 %3225, %v1912_v23   ;;  %v1861_v7 = vpop.permute.xlu1 %1860 }
 0x242   : > { %vm1760_vm5 = vcmp.lt.s32.totalorder %v3884_v22, 127  ;;  %vm1747_vm6 = vcmp.ge.s32.totalorder %v3884_v22, 1  ;;  %vm2309_vm7 = vcmp.ge.s32.totalorder %v3884_v22, 2  ;;  %vm2346_vm8 = vcmp.ge.s32.totalorder %v3884_v22, 4 }
 0x243   : > { %vm2383_vm9 = vcmp.ge.s32.totalorder %v3884_v22, 8  ;;  %vm2420_vm10 = vcmp.ge.s32.totalorder %v3884_v22, 16  ;;  %vm2457_vm11 = vcmp.ge.s32.totalorder %v3884_v22, 32  ;;  %vm2494_vm12 = vcmp.ge.s32.totalorder %v3884_v22, 64  ;;  %v3244_v22 = vld [vmem:[%s4265_s12 + $0x8] sm:$0xff]  }
 0x244   : > { %2005 = vperm.xlu1 %3226, %v1979_v24   ;;  %v1921_v17 = vpop.permute.xlu0 %1920 }
 0x245   : > { %2010 = vperm.xlu0 %3225, %v1980_v25   ;;  %v1893_v9 = vpop.permute.xlu1 %1892 }
 0x248   : > { %2159 = vperm.xlu1 %3226, %v2133_v27  }
 0x249   : > { %2164 = vperm.xlu0 %3225, %v2134_v28   ;;  %v1866_v13 = vpop.permute.xlu1 %1865  ;;  %v1817_v28 = vmul.f32 %v1803_v63, %v3794_v11 }
 0x24c   : > { %2015 = vperm.xlu1 %3226, %v1981_v29  }
 0x24d   : > { %2020 = vperm.xlu0 %3225, %v1982_v30   ;;  %v1916_v16 = vpop.permute.xlu1 %1915 }
 0x250   : > { %2215 = vperm.xlu1 %3226, %v2189_v31  }
 0x251   : > { %2220 = vperm.xlu0 %3225, %v2190_v33  }
 0x254   : > { %2169 = vperm.xlu1 %3226, %v2135_v35  }
 0x255   : > { %2174 = vperm.xlu0 %3225, %v2136_v36  }
 0x258   : > { %2225 = vperm.xlu1 %3226, %v2191_v37   ;;  %v1818_v37 = vmul.f32 %v3866_v50, %v3808_v18 }
 0x259   : > { %2230 = vperm.xlu0 %3225, %v2192_v38  }
 0x25c   : > { %1985 = vperm.xlu1 %3226, %v1975_v41  }
 0x25d   : > { %1990 = vperm.xlu0 %3225, %v1976_v43  }
 0x260   : > { %2139 = vperm.xlu1 %3226, %v2129_v47  }
 0x261   : > { %2144 = vperm.xlu0 %3225, %v2130_v48  }
 0x264   : > { %1995 = vperm.xlu1 %3226, %v1977_v51  }
 0x265   : > { %2000 = vperm.xlu0 %3225, %v1978_v46   ;;  %v1819_v46 = vmul.f32 %v1811_v1, %v3792_v10 }
 0x268   : > { %2195 = vperm.xlu1 %3226, %v2185_v49  }
 0x269   : > { %2200 = vperm.xlu0 %3225, %v2186_v55  }
 0x26c   : > { %2149 = vperm.xlu1 %3226, %v2131_v57  }
 0x26d   : > { %2154 = vperm.xlu0 %3225, %v2132_v58  }
 0x270   : > { %2205 = vperm.xlu1 %3226, %v2187_v60  }
 0x271   : > { %2210 = vperm.xlu0 %3225, %v2188_v61  }
 0x29e   : > { %v1753_v20 = vpop.permute.xlu1 %1752 }
 0x29f   : > { %v1762_v21 = vpop.permute.xlu0 %1761  ;;  %v1758_v11 = vsel %vm1747_vm6, %v1753_v20, 0.0 }
 0x2a0   : > { %v1769_v25 = vsel %vm1760_vm5, %v1762_v21, 0.0  ;;  %v1799_v48 = vmul.f32 %v1790_v59, %v1758_v11 }
 0x2a1   : > { %v1841_v30 = vmul.f32 %v1827_v54, %v1769_v25 }
 0x2a2   : > { %v1766_v23 = vpop.permute.xlu1 %1765  ;;  %v1823_v56 = vadd.f32 %v1819_v46, %v1799_v48 }
 0x2a3   : > { %v1755_v24 = vpop.permute.xlu0 %1754  ;;  %v1771_v44 = vsel %vm1760_vm5, %v1766_v23, 0.0 }
 0x2a4   : > { %v1759_v42 = vsel %vm1747_vm6, %v1755_v24, 0.0  ;;  %v1843_v52 = vmul.f32 %v1835_v2, %v1771_v44 }
 0x2a6   : > { %v1749_v3 = vpop.permute.xlu1 %1748  ;;  %v1847_v60 = vadd.f32 %v1843_v52, %v1823_v56 }
 0x2a7   : > { %v1756_v26 = vsel %vm1747_vm6, %v1749_v3, 0.0  ;;  %v1768_v27 = vpop.permute.xlu0 %1767 }
 0x2a8   : > { %v1797_v29 = vmul.f32 %v1780_v8, %v1756_v26  ;;  %v1772_v18 = vsel %vm1760_vm5, %v1768_v27, 0.0 }
 0x2a9   : > { %v1844_v54 = vmul.f32 %v1839_v6, %v1772_v18 }
 0x2aa   : > { %v1821_v31 = vadd.f32 %v1817_v28, %v1797_v29  ;;  %v1764_v32 = vpop.permute.xlu1 %1763 }
 0x2ab   : > { %v1751_v33 = vpop.permute.xlu0 %1750  ;;  %v1770_v35 = vsel %vm1760_vm5, %v1764_v32, 0.0  ;;  %v3241_v32 = vld [vmem:[%s4263_s10 + $0x10] sm:$0xff]  }
 0x2ac   : > { %v1845_v34 = vadd.f32 %v1841_v30, %v1821_v31  ;;  %v1757_v36 = vsel %vm1747_vm6, %v1751_v33, 0.0  ;;  %v1842_v40 = vmul.f32 %v1831_v4, %v1770_v35  ;;  %v1875_v4 = vadd.f32 %v1866_v13, %v1847_v60  ;;  %v3240_v31 = vld [vmem:[%s4263_s10 + $0x8] sm:$0xff]   ;;  %v3242_v33 = vld [vmem:[%s4263_s10 + $0x18] sm:$0xff]  }
 0x2ad   : > { %v1798_v38 = vmul.f32 %v3864_v45, %v1757_v36  ;;  %v1800_v45 = vmul.f32 %v1795_v62, %v1759_v42 }
 0x2ae   : > { %v1873_v39 = vadd.f32 %v1856_v5, %v1845_v34  ;;  %v3922_v34 = vpop.f32.mrb[4].mxu1 }
 0x2af   : > { %v1822_v41 = vadd.f32 %v1818_v37, %v1798_v38  ;;  %v1824_v57 = vadd.f32 %v1820_v53, %v1800_v45  ;;  %v3924_v35 = vpop.f32.mrb[5].mxu1 }
 0x2b0   : > { %v1905_v43 = vmul.f32 %v1888_v12, %v1873_v39  ;;  %v3926_v36 = vpop.f32.mrb[6].mxu1 }
 0x2b1   : > { %v1846_v47 = vadd.f32 %v1842_v40, %v1822_v41  ;;  %v1848_v59 = vadd.f32 %v1844_v54, %v1824_v57  ;;  %v3928_v37 = vpop.f32.mrb[7].mxu1 }
 0x2b2   : > { %v1933_v50 = vadd.f32 %v1916_v16, %v1905_v43 }
 0x2b3   : > { %v1874_v51 = vadd.f32 %v1861_v7, %v1846_v47  ;;  %v1876_v5 = vadd.f32 %v1871_v14, %v1848_v59 }
 0x2b4   : > { %v3029_v49 = vmul.f32 -1.442695, %v1933_v50 }
 0x2b5   : > { %v1906_v55 = vmul.f32 %v1893_v9, %v1874_v51 }
 0x2b6   : > { %3277 = vpow2.f32 %v3029_v49 }
 0x2b7   : > { %v1934_v58 = vadd.f32 %v1921_v17, %v1906_v55 }
 0x2b9   : > { %v3030_v61 = vmul.f32 -1.442695, %v1934_v58 }
 0x2bb   : > { %v1898_v63 = vpop.permute.xlu1 %1897  ;;  %3279 = vpow2.f32 %v3030_v61 }
 0x2bc   : > { %v1903_v62 = vpop.permute.xlu0 %1902  ;;  %v1907_v7 = vmul.f32 %v1898_v63, %v1875_v4 }
 0x2bd   : > { %v1908_v10 = vmul.f32 %v1903_v62, %v1876_v5 }
 0x2bf   : > { %v1926_v1 = vpop.permute.xlu1 %1925 }
 0x2c0   : > { %v3278_v2 = vpop.eup %3277  ;;  %v1935_v8 = vadd.f32 %v1926_v1, %v1907_v7  ;;  %v1931_v15 = vpop.permute.xlu0 %1930 }
 0x2c1   : > { %v1936_v0 = vadd.f32 %v1931_v15, %v1908_v10  ;;  %v1949_v9 = vadd.f32 1.0, %v3278_v2 }
 0x2c2   : > { %v3031_v6 = vmul.f32 -1.442695, %v1935_v8 }
 0x2c3   : > { %v3032_v12 = vmul.f32 -1.442695, %v1936_v0  ;;  %v2006_v38 = vpop.permute.xlu1 %2005 }
 0x2c4   : > { %3281 = vpow2.f32 %v3031_v6  ;;  %v2011_v39 = vpop.permute.xlu0 %2010 }
 0x2c5   : > { %v3280_v16 = vpop.eup %3279  ;;  %3283 = vpow2.f32 %v3032_v12 }
 0x2c6   : > { %v1950_v17 = vadd.f32 1.0, %v3280_v16  ;;  %3285 = vrcp.f32 %v1949_v9 }
 0x2c7   : > { %v2160_v11 = vpop.permute.xlu1 %2159 }
 0x2c8   : > { %3287 = vrcp.f32 %v1950_v17  ;;  %v2165_v40 = vpop.permute.xlu0 %2164 }
 0x2cb   : > { %v2016_v41 = vpop.permute.xlu1 %2015 }
 0x2cc   : > { %v2021_v42 = vpop.permute.xlu0 %2020 }
 0x2ce   : > { %v3282_v19 = vpop.eup %3281 }
 0x2cf   : > { %v3284_v13 = vpop.eup %3283  ;;  %v1951_v20 = vadd.f32 1.0, %v3282_v19  ;;  %v2216_v43 = vpop.permute.xlu1 %2215 }
 0x2d0   : > { %v3286_v14 = vpop.eup %3285  ;;  %v1952_v21 = vadd.f32 1.0, %v3284_v13  ;;  %v2221_v44 = vpop.permute.xlu0 %2220 }
 0x2d1   : > { %3289 = vrcp.f32 %v1951_v20  ;;  %v1961_v24 = vmul.f32 %v3286_v14, %v1933_v50 }
 0x2d2   : > { %v3288_v23 = vpop.eup %3287  ;;  %3291 = vrcp.f32 %v1952_v21 }
 0x2d3   : > { %v1962_v3 = vmul.f32 %v3288_v23, %v1934_v58  ;;  %v2170_v47 = vpop.permute.xlu1 %2169 }
 0x2d4   : > { %v2175_v48 = vpop.permute.xlu0 %2174 }
 0x2d5   : > { %v1973_v25 = vpack.c.bf16 %v1962_v3, %v1961_v24 }
 0x2d7   : > { %3136 = vmatprep.subr.bf16.mxu1 %v1973_v25  ;;  %v2226_v45 = vpop.permute.xlu1 %2225 }
 0x2d8   : > { %3137 = vmatpush3.bf16.msra.mxu1 %v1973_v25  ;;  %v2231_v52 = vpop.permute.xlu0 %2230 }
 0x2db   : > { %v3290_v26 = vpop.eup %3289  ;;  %v1986_v49 = vpop.permute.xlu1 %1985 }
 0x2dc   : > { %v3292_v27 = vpop.eup %3291  ;;  %v1963_v28 = vmul.f32 %v3290_v26, %v1935_v8  ;;  %v1991_v56 = vpop.permute.xlu0 %1990 }
 0x2dd   : > { %v1964_v29 = vmul.f32 %v3292_v27, %v1936_v0 }
 0x2df   : > { %v1974_v30 = vpack.c.bf16 %v1964_v29, %v1963_v28  ;;  %v2140_v7 = vpop.permute.xlu1 %2139 }
 0x2e0   : > { %v2145_v15 = vpop.permute.xlu0 %2144 }
 0x2e1   : > { %3138 = vmatprep.subr.bf16.mxu1 %v1974_v30 }
 0x2e2   : > { %3139 = vmatpush3.bf16.msra.mxu1 %v1974_v30 }
 0x2e3   : > { %v1996_v16 = vpop.permute.xlu1 %1995 }
 0x2e4   : > { %v2001_v17 = vpop.permute.xlu0 %2000 }
 0x2e5   : > { %3141 = vmatmul.mubr.msk.bf16.vlgmr.msra.gmra.mrb[8].mxu1 %vm2043_vm4, %v3240_v31 }
 0x2e6   : > { %3144 = vmatprep.mubr.msk.bf16.mxu1 %vm2043_vm4, %v3241_v32 }
 0x2e7   : > { %v2196_v19 = vpop.permute.xlu1 %2195 }
 0x2e8   : > { %v2201_v14 = vpop.permute.xlu0 %2200 }
 0x2eb   : > { %v2150_v28 = vpop.permute.xlu1 %2149 }
 0x2ec   : > { %v2155_v31 = vpop.permute.xlu0 %2154 }
 0x2ed   : > { %3145 = vmatmul.mubr.msk.bf16.gmra.mrb[12].mxu1 %vm2043_vm4, %v3242_v33 }
 0x3b8   : > { %v3142_v18 = vpop.f32.mrb[8].mxu1 }
 0x3b9   : > { %v2090_v50 = vpop.f32.mrb[9].mxu1  ;;  %v2099_v26 = vadd.f32 %v3142_v18, %v1996_v16 }
 0x3ba   : > { %v3143_v51 = vpop.f32.mrb[10].mxu1  ;;  %v2091_v29 = vadd.f32 %v2090_v50, %v1986_v49 }
 0x3bb   : > { %v2093_v46 = vpop.f32.mrb[11].mxu1  ;;  %v2102_v30 = vadd.f32 %v3143_v51, %v2001_v17  ;;  %v2179_v33 = vmul.f32 %v2150_v28, %v2099_v26 }
 0x3bc   : > { %v2094_v32 = vadd.f32 %v2093_v46, %v1991_v56 }
 0x3c0   : > { %v3146_v53 = vpop.f32.mrb[12].mxu1 }
 0x3c1   : > { %v2115_v54 = vadd.f32 %v3146_v53, %v2016_v41  ;;  %v2106_v55 = vpop.f32.mrb[13].mxu1 }
 0x3c2   : > { %v2107_v57 = vadd.f32 %v2106_v55, %v2006_v38  ;;  %v3147_v58 = vpop.f32.mrb[14].mxu1  ;;  %v2177_v38 = vmul.f32 %v2140_v7, %v2091_v29 }
 0x3c3   : > { %v2183_v60 = vmul.f32 %v2170_v47, %v2115_v54  ;;  %v2118_v59 = vadd.f32 %v3147_v58, %v2021_v42  ;;  %v2109_v61 = vpop.f32.mrb[15].mxu1 }
 0x3c4   : > { %v2181_v63 = vmul.f32 %v2160_v11, %v2107_v57  ;;  %v2110_v4 = vadd.f32 %v2109_v61, %v2011_v39  ;;  %v2180_v39 = vmul.f32 %v2155_v31, %v2102_v30  ;;  %v2206_v11 = vpop.permute.xlu1 %2205 }
 0x3c5   : > { %v2239_v62 = vadd.f32 %v2226_v45, %v2183_v60  ;;  %v2184_v5 = vmul.f32 %v2175_v48, %v2118_v59  ;;  %v2235_v41 = vadd.f32 %v2206_v11, %v2179_v33 }
 0x3c6   : > { %v2237_v10 = vadd.f32 %v2216_v43, %v2181_v63  ;;  %v2182_v1 = vmul.f32 %v2165_v40, %v2110_v4  ;;  %v2178_v40 = vmul.f32 %v2145_v15, %v2094_v32  ;;  %v2211_v43 = vpop.permute.xlu0 %2210 }
 0x3c7   : > { %v3043_v2 = vmul.f32 -1.442695, %v2239_v62  ;;  %v2240_v8 = vadd.f32 %v2231_v52, %v2184_v5  ;;  %v2236_v48 = vadd.f32 %v2211_v43, %v2180_v39 }
 0x3c8   : > { %v3041_v0 = vmul.f32 -1.442695, %v2237_v10  ;;  %v2238_v6 = vadd.f32 %v2221_v44, %v2182_v1  ;;  %v2233_v44 = vadd.f32 %v2196_v19, %v2177_v38  ;;  %v2234_v52 = vadd.f32 %v2201_v14, %v2178_v40 }
 0x3c9   : > { %3293 = vpow2.f32 %v3043_v2  ;;  %v3044_v9 = vmul.f32 -1.442695, %v2240_v8 }
 0x3ca   : > { %3295 = vpow2.f32 %v3041_v0  ;;  %v3042_v12 = vmul.f32 -1.442695, %v2238_v6 }
 0x3cb   : > { %3297 = vpow2.f32 %v3044_v9 }
 0x3cc   : > { %3299 = vpow2.f32 %v3042_v12 }
 0x3d3   : > { %v3294_v13 = vpop.eup %3293 }
 0x3d4   : > { %v3296_v20 = vpop.eup %3295  ;;  %v2255_v21 = vadd.f32 1.0, %v3294_v13 }
 0x3d5   : > { %v3298_v23 = vpop.eup %3297  ;;  %v2253_v24 = vadd.f32 1.0, %v3296_v20 }
 0x3d6   : > { %v3300_v3 = vpop.eup %3299  ;;  %3301 = vrcp.f32 %v2255_v21  ;;  %v2256_v25 = vadd.f32 1.0, %v3298_v23 }
 0x3d7   : > { %3303 = vrcp.f32 %v2253_v24  ;;  %v2254_v27 = vadd.f32 1.0, %v3300_v3 }
 0x3d8   : > { %3305 = vrcp.f32 %v2256_v25 }
 0x3d9   : > { %3307 = vrcp.f32 %v2254_v27 }
 0x3e0   : > { %v3302_v42 = vpop.eup %3301 }
 0x3e1   : > { %v3304_v47 = vpop.eup %3303  ;;  %v2271_v18 = vmul.f32 %v3302_v42, %v2235_v41  ;;  %v2267_v55 = vsub.f32 1.0, %v3302_v42 }
 0x3e2   : > { %v3306_v45 = vpop.eup %3305  ;;  %v2269_v50 = vmul.f32 %v3304_v47, %v2233_v44  ;;  %v2265_v53 = vsub.f32 1.0, %v3304_v47 }
 0x3e3   : > { %v3308_v49 = vpop.eup %3307  ;;  %v2272_v51 = vmul.f32 %v3306_v45, %v2236_v48  ;;  %v2268_v54 = vsub.f32 1.0, %v3306_v45 }
 0x3e4   : > { %2285 = vrot.lane.b32.xlu1 %v2269_v50, %s4341_s8  ;;  %v2270_v46 = vmul.f32 %v3308_v49, %v2234_v52  ;;  %v2266_v56 = vsub.f32 1.0, %v3308_v49 }
 0x3e6   : > { %2287 = vrot.lane.b32.xlu0 %v2270_v46, %s4341_s8 }
 0x3e8   : > { %2289 = vrot.lane.b32.xlu1 %v2271_v18, %s4341_s8 }
 0x3ea   : > { %2291 = vrot.lane.b32.xlu0 %v2272_v51, %s4341_s8 }
 0x3ec   : > { %2273 = vrot.lane.b32.xlu1 %v2265_v53, %s4341_s8 }
 0x3ee   : > { %2279 = vrot.lane.b32.xlu0 %v2268_v54, %s4341_s8 }
 0x3f0   : > { %2277 = vrot.lane.b32.xlu1 %v2267_v55, %s4341_s8 }
 0x3f2   : > { %2275 = vrot.lane.b32.xlu0 %v2266_v56, %s4341_s8  ;;  %s1002_s8 = scalar_lea.vmem %s4275_s22, %s3740_s15  ;;  %s3071_s15 = sshll.u32 %s3555_s7, 8 }
 0x456   : > { %v2286_v57 = vpop.permute.xlu1 %2285 }
 0x457   : > { %v2293_v58 = vsel %vm1747_vm6, %v2286_v57, 0.0 }
 0x458   : > { %v2297_v60 = vmul.f32 %v2293_v58, %v2265_v53  ;;  %v2288_v59 = vpop.permute.xlu0 %2287 }
 0x459   : > { %v2294_v61 = vsel %vm1747_vm6, %v2288_v59, 0.0 }
 0x45a   : > { %v2301_v63 = vadd.f32 %v2297_v60, %v2269_v50  ;;  %v2298_v4 = vmul.f32 %v2294_v61, %v2266_v56  ;;  %v2290_v62 = vpop.permute.xlu1 %2289 }
 0x45b   : > { %v2295_v5 = vsel %vm1747_vm6, %v2290_v62, 0.0 }
 0x45c   : > { %v2302_v7 = vadd.f32 %v2298_v4, %v2270_v46  ;;  %v2299_v10 = vmul.f32 %v2295_v5, %v2267_v55  ;;  %v2292_v1 = vpop.permute.xlu0 %2291  ;;  %2322 = vrot.lane.b32.xlu1 %v2301_v63, %s3396_s18 }
 0x45d   : > { %v2296_v2 = vsel %vm1747_vm6, %v2292_v1, 0.0 }
 0x45e   : > { %v2303_v8 = vadd.f32 %v2299_v10, %v2271_v18  ;;  %v2300_v15 = vmul.f32 %v2296_v2, %v2268_v54  ;;  %2324 = vrot.lane.b32.xlu0 %v2302_v7, %s3396_s18  ;;  %v2274_v0 = vpop.permute.xlu1 %2273 }
 0x45f   : > { %v2281_v6 = vsel %vm1747_vm6, %v2274_v0, 1.0 }
 0x460   : > { %v2304_v9 = vadd.f32 %v2300_v15, %v2272_v51  ;;  %v2280_v12 = vpop.permute.xlu0 %2279  ;;  %2326 = vrot.lane.b32.xlu1 %v2303_v8, %s3396_s18  ;;  %v2305_v16 = vmul.f32 %v2281_v6, %v2265_v53 }
 0x461   : > { %v2284_v23 = vsel %vm1747_vm6, %v2280_v12, 1.0 }
 0x462   : > { %2328 = vrot.lane.b32.xlu0 %v2304_v9, %s3396_s18  ;;  %v2278_v17 = vpop.permute.xlu1 %2277  ;;  %v2308_v24 = vmul.f32 %v2284_v23, %v2268_v54 }
 0x463   : > { %v2283_v19 = vsel %vm1747_vm6, %v2278_v17, 1.0 }
 0x464   : > { %v2276_v13 = vpop.permute.xlu0 %2275  ;;  %2310 = vrot.lane.b32.xlu1 %v2305_v16, %s3396_s18  ;;  %v2307_v14 = vmul.f32 %v2283_v19, %v2267_v55 }
 0x465   : > { %v2282_v20 = vsel %vm1747_vm6, %v2276_v13, 1.0 }
 0x466   : > { %v2306_v21 = vmul.f32 %v2282_v20, %v2266_v56 }
 0x468   : > { %2312 = vrot.lane.b32.xlu0 %v2306_v21, %s3396_s18  ;;  %2314 = vrot.lane.b32.xlu1 %v2307_v14, %s3396_s18 }
 0x46c   : > { %2316 = vrot.lane.b32.xlu0 %v2308_v24, %s3396_s18 }
 0x4ce   : > { %v2323_v3 = vpop.permute.xlu1 %2322 }
 0x4cf   : > { %v2330_v25 = vsel %vm2309_vm7, %v2323_v3, 0.0 }
 0x4d0   : > { %v2334_v26 = vmul.f32 %v2330_v25, %v2305_v16  ;;  %v2325_v27 = vpop.permute.xlu0 %2324 }
 0x4d1   : > { %v2331_v28 = vsel %vm2309_vm7, %v2325_v27, 0.0 }
 0x4d2   : > { %v2338_v29 = vadd.f32 %v2334_v26, %v2301_v63  ;;  %v2335_v30 = vmul.f32 %v2331_v28, %v2306_v21  ;;  %v2327_v31 = vpop.permute.xlu1 %2326 }
 0x4d3   : > { %v2332_v32 = vsel %vm2309_vm7, %v2327_v31, 0.0 }
 0x4d4   : > { %v2339_v33 = vadd.f32 %v2335_v30, %v2302_v7  ;;  %v2336_v38 = vmul.f32 %v2332_v32, %v2307_v14  ;;  %v2329_v39 = vpop.permute.xlu0 %2328  ;;  %2359 = vrot.lane.b32.xlu1 %v2338_v29, %s3397_s17 }
 0x4d5   : > { %v2333_v11 = vsel %vm2309_vm7, %v2329_v39, 0.0 }
 0x4d6   : > { %v2340_v40 = vadd.f32 %v2336_v38, %v2303_v8  ;;  %v2337_v41 = vmul.f32 %v2333_v11, %v2308_v24  ;;  %2361 = vrot.lane.b32.xlu0 %v2339_v33, %s3397_s17  ;;  %v2311_v42 = vpop.permute.xlu1 %2310 }
 0x4d7   : > { %v2318_v43 = vsel %vm2309_vm7, %v2311_v42, 1.0 }
 0x4d8   : > { %v2341_v44 = vadd.f32 %v2337_v41, %v2304_v9  ;;  %2363 = vrot.lane.b32.xlu1 %v2340_v40, %s3397_s17  ;;  %v2342_v47 = vmul.f32 %v2318_v43, %v2305_v16 }
 0x4da   : > { %2365 = vrot.lane.b32.xlu0 %v2341_v44, %s3397_s17  ;;  %v2313_v48 = vpop.permute.xlu0 %2312  ;;  %v2315_v18 = vpop.permute.xlu1 %2314 }
 0x4db   : > { %v2319_v45 = vsel %vm2309_vm7, %v2313_v48, 1.0  ;;  %v2320_v52 = vsel %vm2309_vm7, %v2315_v18, 1.0 }
 0x4dc   : > { %v2343_v50 = vmul.f32 %v2319_v45, %v2306_v21  ;;  %2347 = vrot.lane.b32.xlu1 %v2342_v47, %s3397_s17  ;;  %v2344_v49 = vmul.f32 %v2320_v52, %v2307_v14 }
 0x4de   : > { %2349 = vrot.lane.b32.xlu0 %v2343_v50, %s3397_s17  ;;  %v2317_v51 = vpop.permute.xlu0 %2316 }
 0x4df   : > { %v2321_v46 = vsel %vm2309_vm7, %v2317_v51, 1.0 }
 0x4e0   : > { %v2345_v53 = vmul.f32 %v2321_v46, %v2308_v24  ;;  %2351 = vrot.lane.b32.xlu1 %v2344_v49, %s3397_s17 }
 0x4e2   : > { %2353 = vrot.lane.b32.xlu0 %v2345_v53, %s3397_s17 }
 0x546   : > { %v2360_v54 = vpop.permute.xlu1 %2359 }
 0x547   : > { %v2367_v55 = vsel %vm2346_vm8, %v2360_v54, 0.0 }
 0x548   : > { %v2371_v56 = vmul.f32 %v2367_v55, %v2342_v47  ;;  %v2362_v57 = vpop.permute.xlu0 %2361 }
 0x549   : > { %v2368_v58 = vsel %vm2346_vm8, %v2362_v57, 0.0 }
 0x54a   : > { %v2375_v60 = vadd.f32 %v2371_v56, %v2338_v29  ;;  %v2372_v59 = vmul.f32 %v2368_v58, %v2343_v50  ;;  %v2364_v61 = vpop.permute.xlu1 %2363 }
 0x54b   : > { %v2369_v63 = vsel %vm2346_vm8, %v2364_v61, 0.0 }
 0x54c   : > { %v2376_v4 = vadd.f32 %v2372_v59, %v2339_v33  ;;  %v2373_v62 = vmul.f32 %v2369_v63, %v2344_v49  ;;  %v2366_v5 = vpop.permute.xlu0 %2365  ;;  %2396 = vrot.lane.b32.xlu1 %v2375_v60, %s4299_s6 }
 0x54d   : > { %v2370_v7 = vsel %vm2346_vm8, %v2366_v5, 0.0 }
 0x54e   : > { %v2377_v10 = vadd.f32 %v2373_v62, %v2340_v40  ;;  %v2374_v1 = vmul.f32 %v2370_v7, %v2345_v53  ;;  %2398 = vrot.lane.b32.xlu0 %v2376_v4, %s4299_s6  ;;  %v2348_v2 = vpop.permute.xlu1 %2347 }
 0x54f   : > { %v2355_v8 = vsel %vm2346_vm8, %v2348_v2, 1.0  ;;  %v1484_v2 = vld [vmem:[%s4334_s26 + $0x28] sm:$0xff] }
 0x550   : > { %v2378_v15 = vadd.f32 %v2374_v1, %v2341_v44  ;;  %v2350_v0 = vpop.permute.xlu0 %2349  ;;  %2400 = vrot.lane.b32.xlu1 %v2377_v10, %s4299_s6  ;;  %v2379_v9 = vmul.f32 %v2355_v8, %v2342_v47  ;;  %v1629_v1 = vld [vmem:[%s3693_s14 + $0x20] sm:$0xff]  ;;  %v1630_v8 = vld [vmem:[%s3693_s14 + $0x28] sm:$0xff] }
 0x551   : > { %v2356_v6 = vsel %vm2346_vm8, %v2350_v0, 1.0  ;;  %v1638_v0 = vadd.f32 1.0, %v1630_v8 }
 0x552   : > { %2402 = vrot.lane.b32.xlu0 %v2378_v15, %s4299_s6  ;;  %v2352_v12 = vpop.permute.xlu1 %2351  ;;  %v2380_v17 = vmul.f32 %v2356_v6, %v2343_v50  ;;  %v1485_v6 = vld [vmem:[%s4334_s26 + $0x30] sm:$0xff] }
 0x553   : > { %v2357_v16 = vsel %vm2346_vm8, %v2352_v12, 1.0  ;;  %v1693_v12 = vld [vmem:[%s3711_s0 + $0x20] sm:$0xff] }
 0x554   : > { %v2354_v19 = vpop.permute.xlu0 %2353  ;;  %2384 = vrot.lane.b32.xlu1 %v2379_v9, %s4299_s6  ;;  %v2381_v20 = vmul.f32 %v2357_v16, %v2344_v49  ;;  %v1631_v16 = vld [vmem:[%s3693_s14 + $0x30] sm:$0xff] }
 0x555   : > { %v2358_v13 = vsel %vm2346_vm8, %v2354_v19, 1.0  ;;  %v1632_v19 = vld [vmem:[%s3693_s14 + $0x38] sm:$0xff]  ;;  %s3401_s14 = smov 64  }
 0x556   : > { %2386 = vrot.lane.b32.xlu0 %v2380_v17, %s4299_s6  ;;  %v2382_v14 = vmul.f32 %v2358_v13, %v2345_v53  ;;  %v1639_v13 = vadd.f32 1.0, %v1631_v16 }
 0x558   : > { %2388 = vrot.lane.b32.xlu1 %v2381_v20, %s4299_s6 }
 0x55a   : > { %2390 = vrot.lane.b32.xlu0 %v2382_v14, %s4299_s6  ;;  %s3402_s6 = smov [#allocation2]  }
 0x5be   : > { %v2397_v21 = vpop.permute.xlu1 %2396 }
 0x5bf   : > { %v2404_v23 = vsel %vm2383_vm9, %v2397_v21, 0.0 }
 0x5c0   : > { %v2408_v24 = vmul.f32 %v2404_v23, %v2379_v9  ;;  %v2399_v3 = vpop.permute.xlu0 %2398  ;;  %v1695_v23 = vld [vmem:[%s3711_s0 + $0x30] sm:$0xff] }
 0x5c1   : > { %v2405_v25 = vsel %vm2383_vm9, %v2399_v3, 0.0  ;;  %v1696_v3 = vld [vmem:[%s3711_s0 + $0x38] sm:$0xff] }
 0x5c2   : > { %v2412_v26 = vadd.f32 %v2408_v24, %v2375_v60  ;;  %v2409_v27 = vmul.f32 %v2405_v25, %v2380_v17  ;;  %v2401_v28 = vpop.permute.xlu1 %2400 }
 0x5c3   : > { %v2406_v29 = vsel %vm2383_vm9, %v2401_v28, 0.0 }
 0x5c4   : > { %v2413_v30 = vadd.f32 %v2409_v27, %v2376_v4  ;;  %v2410_v31 = vmul.f32 %v2406_v29, %v2381_v20  ;;  %v2403_v32 = vpop.permute.xlu0 %2402  ;;  %2433 = vrot.lane.b32.xlu1 %v2412_v26, %s3399_s16 }
 0x5c5   : > { %v2407_v33 = vsel %vm2383_vm9, %v2403_v32, 0.0 }
 0x5c6   : > { %v2414_v38 = vadd.f32 %v2410_v31, %v2377_v10  ;;  %v2411_v39 = vmul.f32 %v2407_v33, %v2382_v14  ;;  %2435 = vrot.lane.b32.xlu0 %v2413_v30, %s3399_s16  ;;  %v2385_v11 = vpop.permute.xlu1 %2384  ;;  %v1483_v10 = vld [vmem:[%s4334_s26 + $0x20] sm:$0xff] }
 0x5c7   : > { %v2392_v40 = vsel %vm2383_vm9, %v2385_v11, 1.0 }
 0x5c8   : > { %v2415_v41 = vadd.f32 %v2411_v39, %v2378_v15  ;;  %v2387_v42 = vpop.permute.xlu0 %2386  ;;  %2437 = vrot.lane.b32.xlu1 %v2414_v38, %s3399_s16  ;;  %v4009_v44 = vmul.f32 %v2392_v40, %v2379_v9  ;;  %v1637_v15 = vadd.f32 1.0, %v1629_v1  ;;  %v1486_v9 = vld [vmem:[%s4334_s26 + $0x38] sm:$0xff] }
 0x5c9   : > { %v2393_v43 = vsel %vm2383_vm9, %v2387_v42, 1.0  ;;  %v2677_v1 = vld [vmem:[%s1007_s5 + $0x18] sm:$0xff] }
 0x5ca   : > { %2439 = vrot.lane.b32.xlu0 %v2415_v41, %s3399_s16  ;;  %v2389_v47 = vpop.permute.xlu1 %2388  ;;  %v4013_v18 = vmul.f32 %v2393_v43, %v2380_v17  ;;  %v1694_v17 = vld [vmem:[%s3711_s0 + $0x28] sm:$0xff] }
 0x5cb   : > { %v2394_v48 = vsel %vm2383_vm9, %v2389_v47, 1.0 }
 0x5cc   : > { %v2391_v45 = vpop.permute.xlu0 %2390  ;;  %2421 = vrot.lane.b32.xlu1 %v4009_v44, %s3399_s16  ;;  %v4018_v50 = vmul.f32 %v2394_v48, %v2381_v20 }
 0x5cd   : > { %v2395_v52 = vsel %vm2383_vm9, %v2391_v45, 1.0 }
 0x5ce   : > { %2423 = vrot.lane.b32.xlu0 %v4013_v18, %s3399_s16  ;;  %v4021_v49 = vmul.f32 %v2395_v52, %v2382_v14  ;;  %v1640_v14 = vadd.f32 1.0, %v1632_v19 }
 0x5d0   : > { %2425 = vrot.lane.b32.xlu1 %v4018_v50, %s3399_s16 }
 0x5d2   : > { %2427 = vrot.lane.b32.xlu0 %v4021_v49, %s3399_s16  ;;  %s4342_s16 = sld [smem:[#allocation14_spill]] }
 0x5d8   : > { %s957_s0 = scalar_lea.vmem %s4342_s16, %s3613_s24 }
 0x636   : > { %v2434_v51 = vpop.permute.xlu1 %2433 }
 0x637   : > { %v2441_v46 = vsel %vm2420_vm10, %v2434_v51, 0.0  ;;  %v3243_v51 = vld [vmem:[%s4265_s12] sm:$0xff]  }
 0x638   : > { %v2445_v53 = vmul.f32 %v2441_v46, %v4009_v44  ;;  %v2436_v54 = vpop.permute.xlu0 %2435  ;;  %3152 = vmatprep.mubr.msk.bf16.mxu0 %vm2043_vm4, %v3243_v51 }
 0x639   : > { %v2442_v55 = vsel %vm2420_vm10, %v2436_v54, 0.0  ;;  %v2554_v54 = vld [vmem:[%s4266_s13 + $0x8] sm:$0xff] }
 0x63a   : > { %v4031_v56 = vadd.f32 %v2445_v53, %v2412_v26  ;;  %v2446_v57 = vmul.f32 %v2442_v55, %v4013_v18  ;;  %v2438_v58 = vpop.permute.xlu1 %2437  ;;  %v2553_v53 = vld [vmem:[%s4266_s13] sm:$0xff]  ;;  %v2555_v55 = vld [vmem:[%s4266_s13 + $0x10] sm:$0xff] }
 0x63b   : > { %v2443_v60 = vsel %vm2420_vm10, %v2438_v58, 0.0  ;;  %v2643_v58 = vld [vmem:[%s1002_s8 + $0x8] sm:$0xff] }
 0x63c   : > { %v4036_v59 = vadd.f32 %v2446_v57, %v2413_v30  ;;  %v2447_v61 = vmul.f32 %v2443_v60, %v4018_v50  ;;  %v2440_v63 = vpop.permute.xlu0 %2439  ;;  %2470 = vrot.lane.b32.xlu1 %v4031_v56, %s3400_s3  ;;  %v2556_v57 = vld [vmem:[%s4266_s13 + $0x18] sm:$0xff] }
 0x63d   : > { %v2444_v4 = vsel %vm2420_vm10, %v2440_v63, 0.0  ;;  %v2645_v63 = vld [vmem:[%s1002_s8 + $0x18] sm:$0xff] }
 0x63e   : > { %v4043_v62 = vadd.f32 %v2447_v61, %v2414_v38  ;;  %v2448_v5 = vmul.f32 %v2444_v4, %v4021_v49  ;;  %2472 = vrot.lane.b32.xlu0 %v4036_v59, %s3400_s3  ;;  %v2422_v20 = vpop.permute.xlu1 %2421  ;;  %v2647_v61 = vadd.f32 1.0, %v2643_v58 }
 0x63f   : > { %v2429_v24 = vsel %vm2420_vm10, %v2422_v20, 1.0 }
 0x640   : > { %v4048_v7 = vadd.f32 %v2448_v5, %v2415_v41  ;;  %2474 = vrot.lane.b32.xlu1 %v4043_v62, %s3400_s3  ;;  %v2424_v21 = vpop.permute.xlu0 %2423  ;;  %v4079_v27 = vmul.f32 %v2429_v24, %v4009_v44  ;;  %v2674_v5 = vld [vmem:[%s1007_s5] sm:$0xff] }
 0x641   : > { %v2430_v26 = vsel %vm2420_vm10, %v2424_v21, 1.0 }
 0x642   : > { %2476 = vrot.lane.b32.xlu0 %v4048_v7, %s3400_s3  ;;  %v2426_v25 = vpop.permute.xlu1 %2425  ;;  %v4084_v30 = vmul.f32 %v2430_v26, %v4013_v18 }
 0x643   : > { %v2431_v29 = vsel %vm2420_vm10, %v2426_v25, 1.0 }
 0x644   : > { %1509 = vperm.xlu1 %3226, %v1483_v10   ;;  %v2428_v28 = vpop.permute.xlu0 %2427  ;;  %v4091_v32 = vmul.f32 %v2431_v29, %v4018_v50  ;;  %v2676_v10 = vld [vmem:[%s1007_s5 + $0x10] sm:$0xff] }
 0x645   : > { %v2432_v31 = vsel %vm2420_vm10, %v2428_v28, 1.0 }
 0x646   : > { %1514 = vperm.xlu0 %3225, %v1484_v2   ;;  %v4096_v33 = vmul.f32 %v2432_v31, %v4021_v49 }
 0x648   : > { %1663 = vperm.xlu1 %3226, %v1637_v15  }
 0x64a   : > { %1668 = vperm.xlu0 %3225, %v1638_v0  }
 0x64c   : > { %1519 = vperm.xlu1 %3226, %v1485_v6  }
 0x64e   : > { %1524 = vperm.xlu0 %3225, %v1486_v9  }
 0x650   : > { %1719 = vperm.xlu1 %3226, %v1693_v12  }
 0x652   : > { %1724 = vperm.xlu0 %3225, %v1694_v17  }
 0x654   : > { %1673 = vperm.xlu1 %3226, %v1639_v13  }
 0x656   : > { %1678 = vperm.xlu0 %3225, %v1640_v14  }
 0x658   : > { %1729 = vperm.xlu1 %3226, %v1695_v23  }
 0x65a   : > { %1734 = vperm.xlu0 %3225, %v1696_v3  }
 0x65c   : > { %2458 = vrot.lane.b32.xlu1 %v4079_v27, %s3400_s3 }
 0x65e   : > { %2460 = vrot.lane.b32.xlu0 %v4084_v30, %s3400_s3 }
 0x660   : > { %2462 = vrot.lane.b32.xlu1 %v4091_v32, %s3400_s3 }
 0x662   : > { %2464 = vrot.lane.b32.xlu0 %v4096_v33, %s3400_s3 }
 0x6ae   : > { %v2471_v38 = vpop.permute.xlu1 %2470 }
 0x6af   : > { %v2478_v39 = vsel %vm2457_vm11, %v2471_v38, 0.0 }
 0x6b0   : > { %v2482_v11 = vmul.f32 %v2478_v39, %v4079_v27  ;;  %v2473_v40 = vpop.permute.xlu0 %2472 }
 0x6b1   : > { %v2479_v41 = vsel %vm2457_vm11, %v2473_v40, 0.0 }
 0x6b2   : > { %v4109_v42 = vadd.f32 %v2482_v11, %v4031_v56  ;;  %v2483_v43 = vmul.f32 %v2479_v41, %v4084_v30  ;;  %v2475_v44 = vpop.permute.xlu1 %2474  ;;  %v2642_v56 = vld [vmem:[%s1002_s8] sm:$0xff] }
 0x6b3   : > { %v2480_v47 = vsel %vm2457_vm11, %v2475_v44, 0.0  ;;  %v2646_v60 = vadd.f32 1.0, %v2642_v56 }
 0x6b4   : > { %v4115_v48 = vadd.f32 %v2483_v43, %v4036_v59  ;;  %v2484_v18 = vmul.f32 %v2480_v47, %v4091_v32  ;;  %v2477_v45 = vpop.permute.xlu0 %2476  ;;  %2495 = vrot.lane.b32.xlu1 %v4109_v42, %s3401_s14  ;;  %v2644_v59 = vld [vmem:[%s1002_s8 + $0x10] sm:$0xff]  ;;  %s934_s8 = sand.u32 1, %s3381_s2  }
 0x6b5   : > { %v2481_v52 = vsel %vm2457_vm11, %v2477_v45, 0.0  ;;  %v2648_v4 = vadd.f32 1.0, %v2644_v59  ;;  %s2969_s3 = sshll.u32 %s934_s8, 4  ;;  %s4211_s7 = scalar_lea.sflag [#allocation3], %s934_s8 }
 0x6b6   : > { %v4122_v50 = vadd.f32 %v2484_v18, %v4043_v62  ;;  %v2485_v49 = vmul.f32 %v2481_v52, %v4096_v33  ;;  %2497 = vrot.lane.b32.xlu0 %v4115_v48, %s3401_s14  ;;  %v2649_v62 = vadd.f32 1.0, %v2645_v63  ;;  %s936_s4 = scalar_lea.vmem [#allocation2], %s2969_s3  ;;  %s3331_s3 = sshll.u32 %s3402_s6, 4  ;;  %s3332_s3 = int_to_ptr.vmem [resolvable:$false] %s3331_s3 }
 0x6b7   : > { %s2731_s18 = sshll.u32 %s936_s4, 4  ;;  %s4207_s18 = int_to_ptr.vmem [resolvable:$true] %s2731_s18 }
 0x6b8   : > { %v4130_v46 = vadd.f32 %v2485_v49, %v4048_v7  ;;  %2499 = vrot.lane.b32.xlu1 %v4122_v50, %s3401_s14  ;;  %v2675_v7 = vld [vmem:[%s1007_s5 + $0x8] sm:$0xff]  ;;  %s1012_s5 = scalar_lea.vmem %s4343_s30, %s3613_s24  ;;  %s4204_s24 = scalar_lea.hbm %s4345_s29, %s3071_s15 }
 0x6b9   : > { %p3334_p0 = scmp.lt.s32.totalorder %s4207_s18, %s3332_s3 }
 0x6ba   : > { %2501 = vrot.lane.b32.xlu0 %v4130_v46, %s3401_s14  ;;  %s4346_s14 = smov %s4345_s29 }
 0x6bc   : > { %2559 = vperm.xlu1 %3226, %v2553_v53  }
 0x6be   : > { %2564 = vperm.xlu0 %3225, %v2554_v54  }
 0x6c0   : > { %2569 = vperm.xlu1 %3226, %v2555_v55  }
 0x6c2   : > { %2574 = vperm.xlu0 %3225, %v2556_v57  }
 0x6c3   : > { %v1510_v2 = vpop.permute.xlu1 %1509 }
 0x6c4   : > { %2652 = vperm.xlu1 %3226, %v2646_v60   ;;  %v1611_v19 = vadd.f32 %v3924_v35, %v1510_v2 }
 0x6c5   : > { %v1515_v8 = vpop.permute.xlu0 %1514 }
 0x6c6   : > { %2657 = vperm.xlu0 %3225, %v2647_v61   ;;  %v1614_v20 = vadd.f32 %v3928_v37, %v1515_v8 }
 0x6c7   : > { %v1664_v15 = vpop.permute.xlu1 %1663 }
 0x6c8   : > { %2662 = vperm.xlu1 %3226, %v2648_v4   ;;  %v1685_v14 = vmul.f32 %v1664_v15, %v1611_v19 }
 0x6c9   : > { %v1669_v0 = vpop.permute.xlu0 %1668 }
 0x6ca   : > { %2667 = vperm.xlu0 %3225, %v2649_v62   ;;  %v1686_v21 = vmul.f32 %v1669_v0, %v1614_v20 }
 0x6cb   : > { %v1520_v6 = vpop.permute.xlu1 %1519 }
 0x6cc   : > { %2680 = vperm.xlu1 %3226, %v2674_v5   ;;  %v1619_v23 = vadd.f32 %v3922_v34, %v1520_v6 }
 0x6cd   : > { %v1525_v9 = vpop.permute.xlu0 %1524 }
 0x6ce   : > { %2685 = vperm.xlu0 %3225, %v2675_v7   ;;  %v1622_v25 = vadd.f32 %v3926_v36, %v1525_v9 }
 0x6cf   : > { %v1720_v12 = vpop.permute.xlu1 %1719 }
 0x6d0   : > { %2690 = vperm.xlu1 %3226, %v2676_v10   ;;  %v1741_v24 = vadd.f32 %v1720_v12, %v1685_v14 }
 0x6d1   : > { %v1725_v16 = vpop.permute.xlu0 %1724 }
 0x6d2   : > { %2695 = vperm.xlu0 %3225, %v2677_v1   ;;  %v1742_v26 = vadd.f32 %v1725_v16, %v1686_v21  ;;  %v3045_v31 = vmul.f32 -1.442695, %v1741_v24 }
 0x6d3   : > { %v1674_v17 = vpop.permute.xlu1 %1673 }
 0x6d4   : > { %v1687_v28 = vmul.f32 %v1674_v17, %v1619_v23  ;;  %v3046_v11 = vmul.f32 -1.442695, %v1742_v26  ;;  %3309 = vpow2.f32 %v3045_v31 }
 0x6d5   : > { %v1679_v13 = vpop.permute.xlu0 %1678 }
 0x6d6   : > { %v1688_v38 = vmul.f32 %v1679_v13, %v1622_v25  ;;  %3311 = vpow2.f32 %v3046_v11 }
 0x6d7   : > { %v1730_v3 = vpop.permute.xlu1 %1729 }
 0x6d8   : > { %v1743_v39 = vadd.f32 %v1730_v3, %v1687_v28 }
 0x6d9   : > { %v1735_v29 = vpop.permute.xlu0 %1734 }
 0x6da   : > { %v1744_v40 = vadd.f32 %v1735_v29, %v1688_v38  ;;  %v3047_v35 = vmul.f32 -1.442695, %v1743_v39 }
 0x6db   : > { %v2459_v18 = vpop.permute.xlu1 %2458 }
 0x6dc   : > { %v3048_v37 = vmul.f32 -1.442695, %v1744_v40  ;;  %3313 = vpow2.f32 %v3047_v35  ;;  %v2466_v53 = vsel %vm2457_vm11, %v2459_v18, 1.0  ;;  %v2706_v18 = vld [vmem:[%s957_s0] sm:$0xff] }
 0x6dd   : > { %v2461_v52 = vpop.permute.xlu0 %2460  ;;  %v2490_v56 = vmul.f32 %v2466_v53, %v4079_v27 }
 0x6de   : > { %3315 = vpow2.f32 %v3048_v37  ;;  %v3310_v41 = vpop.eup %3309  ;;  %v2467_v55 = vsel %vm2457_vm11, %v2461_v52, 1.0 }
 0x6df   : > { %v2527_v43 = vadd.f32 1.0, %v3310_v41  ;;  %v2463_v51 = vpop.permute.xlu1 %2462  ;;  %v2491_v61 = vmul.f32 %v2467_v55, %v4084_v30  ;;  %v2707_v55 = vld [vmem:[%s957_s0 + $0x8] sm:$0xff]  ;;  %s3327_s0 = scalar_lea.vmem %s4207_s18, 256 }
 0x6e0   : > { %v3312_v34 = vpop.eup %3311  ;;  %v2468_v60 = vsel %vm2457_vm11, %v2463_v51, 1.0  ;;  %p3328_p11 = scmp.ne.s32.totalorder %s4207_s18, %s3327_s0 }
 0x6e1   : > { %v2528_v47 = vadd.f32 1.0, %v3312_v34  ;;  %3317 = vrcp.f32 %v2527_v43  ;;  %v2465_v54 = vpop.permute.xlu0 %2464  ;;  %v2492_v10 = vmul.f32 %v2468_v60, %v4091_v32  ;;  %v3325_v60 = vld [vmem:[%s3623_s1] sm:$0xff] }
 0x6e2   : > { %v2469_v63 = vsel %vm2457_vm11, %v2465_v54, 1.0  ;;  %p3329_p12 = pnand %p3328_p11, %p3572_p5 }
 0x6e3   : > { %3319 = vrcp.f32 %v2528_v47  ;;  %v2493_v0 = vmul.f32 %v2469_v63, %v4096_v33 }
 0x6e4   : > { %p3330_p13 = pneg %p3329_p12 }
 0x6e6   : > { %v3314_v44 = vpop.eup %3313 }
 0x6e7   : > { %v2529_v45 = vadd.f32 1.0, %v3314_v44 }
 0x6e8   : > { %v3316_v36 = vpop.eup %3315 }
 0x6e9   : > { %v2530_v49 = vadd.f32 1.0, %v3316_v36  ;;  %3321 = vrcp.f32 %v2529_v45 }
 0x6eb   : > { %3323 = vrcp.f32 %v2530_v49  ;;  %v3318_v58 = vpop.eup %3317 }
 0x6ec   : > { %v2539_v27 = vmul.f32 %v3318_v58, %v1741_v24 }
 0x6ed   : > { %v3320_v5 = vpop.eup %3319 }
 0x6ee   : > { %v2540_v6 = vmul.f32 %v3320_v5, %v1742_v26 }
 0x6f3   : > { %v3322_v15 = vpop.eup %3321 }
 0x6f4   : > { %v2541_v13 = vmul.f32 %v3322_v15, %v1743_v39 }
 0x6f5   : > { %v3324_v19 = vpop.eup %3323 }
 0x6f6   : > { %v2542_v21 = vmul.f32 %v3324_v19, %v1744_v40 }
 0x726   : > { %v2496_v57 = vpop.permute.xlu1 %2495 }
 0x727   : > { %v2503_v59 = vsel %vm2494_vm12, %v2496_v57, 0.0 }
 0x728   : > { %v2507_v4 = vmul.f32 %v2503_v59, %v2490_v56  ;;  %v2498_v62 = vpop.permute.xlu0 %2497 }
 0x729   : > { %v2504_v7 = vsel %vm2494_vm12, %v2498_v62, 0.0 }
 0x72a   : > { %v2511_v1 = vadd.f32 %v2507_v4, %v4109_v42  ;;  %v2508_v2 = vmul.f32 %v2504_v7, %v2491_v61  ;;  %v2500_v8 = vpop.permute.xlu1 %2499  ;;  %v3326_v4 = vld [vmem:[%s3623_s1 + $0x8] sm:$0xff]  ;;  %s3333_s1 = scalar_lea.vmem %s3332_s3, 512 }
 0x72b   : > { %v2505_v30 = vsel %vm2494_vm12, %v2500_v8, 0.0  ;;  %p3335_p1 = scmp.lt.s32.totalorder %s3333_s1, %s3327_s0 }
 0x72c   : > { %v2543_v9 = vmul.f32 %v2539_v27, %v2511_v1  ;;  %v2512_v12 = vadd.f32 %v2508_v2, %v4115_v48  ;;  %v2509_v16 = vmul.f32 %v2505_v30, %v2492_v10  ;;  %v2502_v17 = vpop.permute.xlu0 %2501 }
 0x72d   : > { %v2506_v32 = vsel %vm2494_vm12, %v2502_v17, 0.0  ;;  %p3336_p2 = por %p3335_p1, %p3334_p0 }
 0x72e   : > { %v2544_v42 = vmul.f32 %v2540_v6, %v2512_v12  ;;  %v2513_v20 = vadd.f32 %v2509_v16, %v4122_v50  ;;  %v2510_v14 = vmul.f32 %v2506_v32, %v2493_v0 }
 0x72f   : > { %p3337_p3 = pnand %p3336_p2, %p3330_p13 }
 0x730   : > { %v2545_v33 = vmul.f32 %v2541_v13, %v2513_v20  ;;  %v2514_v23 = vadd.f32 %v2510_v14, %v4130_v46  ;;  %v2551_v24 = vpack.c.bf16 %v2544_v42, %v2543_v9 }
 0x732   : > { %v2546_v3 = vmul.f32 %v2542_v21, %v2514_v23  ;;  %3148 = vmatprep.subr.bf16.mxu0 %v2551_v24 }
 0x733   : > { %3149 = vmatpush3.bf16.msra.mxu0 %v2551_v24 }
 0x734   : > { %v2552_v48 = vpack.c.bf16 %v2546_v3, %v2545_v33 }
 0x736   : > { %3150 = vmatprep.subr.bf16.mxu0 %v2552_v48 }
 0x737   : > { %3151 = vmatpush3.bf16.msra.mxu0 %v2552_v48 }
 0x73a   : > { %3153 = vmatmul.mubr.msk.bf16.vlgmr.msra.gmra.mrb[8].mxu0 %vm2043_vm4, %v3244_v22 }
 0x73b   : > { %v2560_v50 = vpop.permute.xlu1 %2559 }
 0x73d   : > { %v2565_v25 = vpop.permute.xlu0 %2564 }
 0x73f   : > { %v2570_v26 = vpop.permute.xlu1 %2569 }
 0x741   : > { %v2575_v46 = vpop.permute.xlu0 %2574 }
 0x743   : > { %v2653_v28 = vpop.permute.xlu1 %2652 }
 0x745   : > { %v2658_v29 = vpop.permute.xlu0 %2657 }
 0x747   : > { %v2663_v31 = vpop.permute.xlu1 %2662 }
 0x749   : > { %v2668_v38 = vpop.permute.xlu0 %2667 }
 0x74b   : > { %v2681_v39 = vpop.permute.xlu1 %2680 }
 0x74d   : > { %v2686_v11 = vpop.permute.xlu0 %2685 }
 0x74f   : > { %v2691_v36 = vpop.permute.xlu1 %2690 }
 0x751   : > { %v2696_v53 = vpop.permute.xlu0 %2695 }
 0x80d   : > { %v3154_v40 = vpop.f32.mrb[8].mxu0 }
 0x80e   : > { %v2636_v35 = vadd.f32 %v3154_v40, %v2570_v26  ;;  %v2627_v37 = vpop.f32.mrb[9].mxu0 }
 0x80f   : > { %v2628_v41 = vadd.f32 %v2627_v37, %v2560_v50  ;;  %v3155_v34 = vpop.f32.mrb[10].mxu0 }
 0x810   : > { %v2672_v43 = vmul.f32 %v2663_v31, %v2636_v35  ;;  %v2639_v44 = vadd.f32 %v3155_v34, %v2575_v46  ;;  %v2630_v47 = vpop.f32.mrb[11].mxu0 }
 0x811   : > { %v2670_v45 = vmul.f32 %v2653_v28, %v2628_v41  ;;  %v2631_v52 = vadd.f32 %v2630_v47, %v2565_v25 }
 0x812   : > { %v2700_v49 = vadd.f32 %v2691_v36, %v2672_v43  ;;  %v2673_v51 = vmul.f32 %v2668_v38, %v2639_v44 }
 0x813   : > { %v2698_v54 = vadd.f32 %v2681_v39, %v2670_v45  ;;  %v2671_v56 = vmul.f32 %v2658_v29, %v2631_v52 }
 0x814   : > { %v2708_v57 = vadd.f32 %v2706_v18, %v2700_v49  ;;  %v2701_v58 = vadd.f32 %v2696_v53, %v2673_v51 }
 0x815   : > { %v2702_v59 = vadd.f32 %v3325_v60, %v2698_v54  ;;  %v2699_v61 = vadd.f32 %v2686_v11, %v2671_v56 }
 0x816   : > { %2710 = vst [vmem:[%s1012_s5] sm:$0xff] %v2708_v57  ;;  %v2709_v63 = vadd.f32 %v2707_v55, %v2701_v58 }
 0x817   : > { %2704 = vst [vmem:[%s936_s4] sm:$0xff] %v2702_v59  ;;  %v2703_v62 = vadd.f32 %v3326_v4, %v2699_v61 }
 0x818   : > { %2711 = vst [vmem:[%s1012_s5 + $0x8] sm:$0xff] %v2709_v63 }
 0x819   : > { %2705 = vst [vmem:[%s936_s4 + $0x8] sm:$0xff] %v2703_v62 }
 0x81a   : > { %3340 = shalt.err (!%p3337_p3)
}
 0x81b   : > { %s3341_s8 = scalar_lea.hbm %s4204_s24, 256  ;;  %s3345_s15 = scalar_lea.hbm %s4346_s14, 512 }
 0x81c   : > { %p3342_p4 = scmp.ne.s32.totalorder %s4204_s24, %s3341_s8  ;;  %p3346_p9 = scmp.lt.u32.totalorder %s4204_s24, %s4346_s14 }
 0x81d   : > { %p3347_p10 = scmp.lt.u32.totalorder %s3345_s15, %s3341_s8  ;;  %p3349_p12 = scmp.lt.u32.totalorder %s3341_s8, %s4204_s24 }
 0x81e   : > { %p3343_p7 = pnand %p3342_p4, %p3572_p5 }
 0x81f   : > { %p3348_p11 = por %p3347_p10, %p3346_p9 }
 0x820   : > { %p3344_p8 = pneg %p3343_p7 }
 0x821   : > { %p3350_p13 = por %p3349_p12, %p3348_p11 }
 0x823   : > { %p3351_p0 = pnand %p3350_p13, %p3344_p8 }
 0x825   : > { %3354 = shalt.err (!%p3351_p0)
}
 0x826   : > { %s3403_s29 = smov 128   ;;  %s4347_s0 = smov 8  }
 0x827   : > { %3165 = dma.vmem_to_hbm [thread:$0]  (%p3572_p5), %s4207_s18, 256, %s4204_s24, %s4211_s7, %s3403_s29, %s3403_s29, %s4347_s0  }
 0x828 PF: > { %s4348_s6 = sld [smem:[#allocation7_spill]]  ;;  %s4349_s3 = sld [smem:[#allocation5_spill]] }
 0x82e   : > { %p3171_p1 = scmp.ge.s32.totalorder %s4348_s6, 2  ;;  %s2749_s30 = sand.u32 1, %s4349_s3  }
 0x82f   : > { %s2750_s8 = scalar_lea.sflag [#allocation3], %s2749_s30 }
 0x830   : > { %p3168_p2 = pnand %p3171_p1, %p3576_p6 }
 0x832   : > { %3372 = dma.done.wait (!%p3168_p2), %s2750_s8, 256  }
 0x833   : > { %3374 = vsyncadd (!%p3168_p2), %s2750_s8, 4294967040  ;;  %s4351_s30 = sld [smem:[#allocation8_spill]]  ;;  %s4352_s5 = sld [smem:[#allocation6_spill]] }
 0x834   : > { %s4353_s6 = sld [smem:[#allocation9_spill]]  ;;  %s4354_s29 = smov %s3381_s2 }
 0x839   : > { %p36_p3 = scmp.ge.s32.totalorder %s4351_s30, 4   ;;  %s4355_s2 = smov %s4352_s5 }
 0x83b   :  { %38 = sbr.rel (!%p36_p3) target bundleno = 21 (0x15), region = 199 }
 0x842   :  { %2763 = vsyncpa [#allocation3], 1 }
 0x843   :  { %2765 = vsyncpa [#allocation3 + $0x1], 1 }

</bundles_post_ra>
